<compile_context>
chip_gen: v7x
topology: tpu7x:2x2x1
jax: 0.10.0
libtpu: 0.0.40
codegen_flags: <defaults>
</compile_context>

<pallas_src>
import functools

import jax
import jax.numpy as jnp
import numpy as np
from jax.experimental import pallas as pl
from jax.experimental.pallas import tpu as pltpu

KERNEL_SIZE = 3
LEAKY = 0.01          # nn.LeakyReLU default negative_slope
EPS = 1e-5            # nn.BatchNorm2d default eps (eval mode)
BATCH_TILE = 128      # max samples per grid step (MXU-dense M for the head matmuls)
POL_PAD = 128         # policy logits padded to one full lane group
HEAD2_PAD = 128       # fused val/col output padded to one full lane group


def _round_up(a, b):
    return ((a + b - 1) // b) * b


def _leaky(x):
    return jnp.where(x > 0, x, LEAKY * x)


def _vmem_limit_bytes():
    # Generation-dependent VMEM budget (review): 3/4 of physical, capped at 96 MiB.
    cap = 64 << 20
    try:
        cap = int(getattr(pltpu.get_tpu_info(), "vmem_capacity_bytes", cap))
    except Exception:
        pass
    return int(min(cap * 3 // 4, 96 << 20))


def net_kernel(xr_ref, wmat_ref, bc_ref, sel_ref, blk_w_ref, blk_b_ref,
               hw_ref, hb_ref, w2_ref, b2_ref, out_ref, *, n_cols, n_blocks):
    rows = xr_ref.shape[0]           # NB * H  (one row per (sample, output row))
    F = bc_ref.shape[1]              # filters padded to a full lane group

    # --- conv_in (3x3, pad=1) + folded BN + LeakyReLU + HxH avg-pool, on MXU --
    # Each xr row holds the 3 padded input rows feeding one output row
    # (K = 3*(H+2)); column block j of wmat holds the 3x3 taps for output
    # column j, so each dot emits one output column for every (sample, row).
    # LeakyReLU + spatial accumulation happen per column, so the full
    # (NB, H, H, F) activation is never live in VMEM.
    lhs = xr_ref[...]                                           # (rows, 3*(H+2)) bf16
    bc = bc_ref[...]                                            # (1, F) f32
    pooled_rows = jnp.zeros((rows, F), jnp.float32)
    for j in range(n_cols):
        wj = wmat_ref[:, j * F:(j + 1) * F]                     # (3*(H+2), F) bf16
        a = jnp.dot(lhs, wj, preferred_element_type=jnp.float32) + bc
        pooled_rows = pooled_rows + _leaky(a)

    # per-sample reduction of the H row-sums via a 0/1 selector matmul
    v = jnp.dot(sel_ref[...], pooled_rows.astype(jnp.bfloat16),
                preferred_element_type=jnp.float32) * (1.0 / float(n_cols * n_cols))

    # --- residual blocks: center-tap conv + folded BN + LeakyReLU + skip ------
    for l in range(n_blocks):
        y = jnp.dot(v.astype(jnp.bfloat16), blk_w_ref[l],
                    preferred_element_type=jnp.float32) + blk_b_ref[l]
        v = _leaky(y) + v

    # --- fused heads ----------------------------------------------------------
    # stage 1: [policy(pad 128) | value hidden(512) | colab hidden(512)]
    h_all = jnp.dot(v.astype(jnp.bfloat16), hw_ref[...],
                    preferred_element_type=jnp.float32) + hb_ref[...]
    pol = h_all[:, :POL_PAD]                                    # raw policy logits
    hc = _leaky(h_all[:, POL_PAD:])                             # (NB, 1024)
    # stage 2: block-diagonal [val_w2 ; col_w2] padded to 128 lanes, then tanh
    vc = jnp.tanh(jnp.dot(hc.astype(jnp.bfloat16), w2_ref[...],
                          preferred_element_type=jnp.float32) + b2_ref[...])

    out_ref[:, :POL_PAD] = pol
    out_ref[:, POL_PAD:] = vc


def net_forward(x, params):
    """x: (N, 1, H, W) float32, NCHW like PyTorch."""
    N, C, H, W = x.shape
    assert C == 1
    # Matches STATE_SHAPE geometry: F.avg_pool2d(v, H) must yield a 1x1 output.
    assert H <= W < 2 * H

    # adaptive batch tile: MXU-dense (up to 128 rows) for real batches, no
    # wasted padding compute for tiny ones; N>128 naturally gives >=2 grid
    # steps for v7x's two TensorCores.
    NB = min(BATCH_TILE, _round_up(max(N, 1), 8))
    Npad = _round_up(N, NB)

    F = params['conv_w'].shape[0]
    F_pad = max(128, _round_up(F, 128))           # lane-dense filter axis
    L = params['blk_w'].shape[0]
    P = params['pol_w'].shape[0]
    assert P <= POL_PAD
    Hv = params['val_w1'].shape[0]
    Hc = params['col_w1'].shape[0]
    Wp2 = H + 2
    K3 = 3 * Wp2

    # ---- input prep: zero-pad, crop to the H+2 columns the pool reads, and
    #      pre-concatenate the 3 input rows feeding each output row -----------
    x2 = jnp.pad(x[:, 0].astype(jnp.float32), ((0, Npad - N), (1, 1), (1, 1)))
    x2 = x2[:, :, :Wp2]                                              # (Npad, H+2, H+2)
    xrows = jnp.concatenate([x2[:, 0:H, :], x2[:, 1:H + 1, :], x2[:, 2:H + 2, :]],
                            axis=2)                                  # (Npad, H, 3*(H+2))
    xrows = xrows.reshape(Npad * H, K3).astype(jnp.bfloat16)

    # ---- fold eval-mode BatchNorm (+ conv bias) into the conv weights -------
    s_in = params['bn_in_g'] * jax.lax.rsqrt(params['bn_in_v'] + EPS)            # (F,)
    w_eff = jnp.transpose(params['conv_w'][:, 0] * s_in[:, None, None], (1, 2, 0))  # (3,3,F)
    w_eff = jnp.pad(w_eff, ((0, 0), (0, 0), (0, F_pad - F)))                     # (3,3,F_pad)
    bc = jnp.pad((params['conv_b'] - params['bn_in_m']) * s_in + params['bn_in_b'],
                 (0, F_pad - F))[None, :]                                        # (1, F_pad)

    # banded conv weight matrix: wmat[ky*(H+2)+c, j*F_pad+f] = w_eff[ky, c-j, f]
    cj = jnp.arange(Wp2)[:, None] - jnp.arange(H)[None, :]                       # (Wp2, H)
    valid = (cj >= 0) & (cj <= KERNEL_SIZE - 1)
    taps = w_eff[:, jnp.clip(cj, 0, KERNEL_SIZE - 1), :]                         # (3,Wp2,H,F_pad)
    wmat = jnp.where(valid[None, :, :, None], taps, 0.0)
    wmat = wmat.reshape(K3, H * F_pad).astype(jnp.bfloat16)

    # 0/1 selector that sums the H per-row results belonging to each sample
    sel = (jnp.arange(NB * H) // H == jnp.arange(NB)[:, None]).astype(jnp.bfloat16)

    # ---- residual blocks: center tap + folded BN, padded to F_pad lanes ------
    s_blk = params['blk_g'] * jax.lax.rsqrt(params['blk_v'] + EPS)               # (L, F)
    blk_w = jnp.transpose(params['blk_w'][:, :, :, 1, 1] * s_blk[:, :, None], (0, 2, 1))
    blk_w = jnp.pad(blk_w, ((0, 0), (0, F_pad - F), (0, F_pad - F))).astype(jnp.bfloat16)
    blk_b = jnp.pad(params['blk_b'] - params['blk_m'] * s_blk,
                    ((0, 0), (0, F_pad - F)))[:, None, :]                        # (L,1,F_pad)
    if L == 0:
        blk_w = jnp.zeros((1, F_pad, F_pad), jnp.bfloat16)
        blk_b = jnp.zeros((1, 1, F_pad), jnp.float32)
    L_spec = max(L, 1)

    # ---- fused stage-1 head: [policy(pad 128) | val hidden | col hidden] -----
    wp = jnp.pad(params['pol_w'].T, ((0, F_pad - F), (0, POL_PAD - P)))
    vw1 = jnp.pad(params['val_w1'].T, ((0, F_pad - F), (0, 0)))
    cw1 = jnp.pad(params['col_w1'].T, ((0, F_pad - F), (0, 0)))
    hw = jnp.concatenate([wp, vw1, cw1], axis=1).astype(jnp.bfloat16)            # (F_pad, 1152)
    hb = jnp.concatenate([jnp.pad(params['pol_b'], (0, POL_PAD - P)),
                          params['val_b1'], params['col_b1']])[None, :]

    # ---- fused stage-2 head: block-diagonal, padded to 128 lanes -------------
    w2 = jnp.zeros((Hv + Hc, HEAD2_PAD), jnp.float32)
    w2 = w2.at[:Hv, 0:1].set(params['val_w2'].T)
    w2 = w2.at[Hv:, 1:5].set(params['col_w2'].T)
    w2 = w2.astype(jnp.bfloat16)
    b2 = jnp.zeros((HEAD2_PAD,), jnp.float32)
    b2 = b2.at[0:1].set(params['val_b2'])
    b2 = b2.at[1:5].set(params['col_b2'])
    b2 = b2[None, :]

    head1_w = POL_PAD + Hv + Hc
    out_cols = POL_PAD + HEAD2_PAD
    grid = (Npad // NB,)

    kernel = functools.partial(net_kernel, n_cols=H, n_blocks=L)

    in_specs = [
        pl.BlockSpec((NB * H, K3), lambda i: (i, 0)),              # conv rows per tile
        pl.BlockSpec((K3, H * F_pad), lambda i: (0, 0)),           # banded conv weights
        pl.BlockSpec((1, F_pad), lambda i: (0, 0)),                # folded conv bias
        pl.BlockSpec((NB, NB * H), lambda i: (0, 0)),              # row -> sample selector
        pl.BlockSpec((L_spec, F_pad, F_pad), lambda i: (0, 0, 0)),  # residual weights
        pl.BlockSpec((L_spec, 1, F_pad), lambda i: (0, 0, 0)),      # residual biases
        pl.BlockSpec((F_pad, head1_w), lambda i: (0, 0)),          # fused stage-1 head
        pl.BlockSpec((1, head1_w), lambda i: (0, 0)),
        pl.BlockSpec((Hv + Hc, HEAD2_PAD), lambda i: (0, 0)),      # fused stage-2 head
        pl.BlockSpec((1, HEAD2_PAD), lambda i: (0, 0)),
    ]
    out_spec = pl.BlockSpec((NB, out_cols), lambda i: (i, 0))

    out = pl.pallas_call(
        kernel,
        out_shape=jax.ShapeDtypeStruct((Npad, out_cols), jnp.float32),
        grid=grid,
        in_specs=in_specs,
        out_specs=out_spec,
        compiler_params=pltpu.CompilerParams(
            dimension_semantics=("parallel",),       # shard batch tiles across cores
            vmem_limit_bytes=_vmem_limit_bytes(),
        ),
    )(xrows, wmat, bc, sel, blk_w, blk_b, hw, hb, w2, b2)

    pol = out[:N, :P]
    val = out[:N, POL_PAD:POL_PAD + 1]
    col = out[:N, POL_PAD + 1:POL_PAD + 5]
    return pol, val, col


def init_params(key, residual_layers, filters, in_channels=1, policy_shape=111):
    ks = jax.random.split(key, 24)

    def rn(k, shape, scale=0.05):
        return scale * jax.random.normal(k, shape, dtype=jnp.float32)

    p = {}
    p['conv_w'] = rn(ks[0], (filters, in_channels, 3, 3))
    p['conv_b'] = rn(ks[1], (filters,))
    p['bn_in_g'] = 1.0 + rn(ks[2], (filters,))
    p['bn_in_b'] = rn(ks[3], (filters,))
    p['bn_in_m'] = rn(ks[4], (filters,))
    p['bn_in_v'] = 1.0 + jnp.abs(rn(ks[5], (filters,)))
    p['blk_w'] = rn(ks[6], (residual_layers, filters, filters, 3, 3))
    p['blk_g'] = 1.0 + rn(ks[7], (residual_layers, filters))
    p['blk_b'] = rn(ks[8], (residual_layers, filters))
    p['blk_m'] = rn(ks[9], (residual_layers, filters))
    p['blk_v'] = 1.0 + jnp.abs(rn(ks[10], (residual_layers, filters)))
    p['pol_w'] = rn(ks[11], (policy_shape, filters))
    p['pol_b'] = rn(ks[12], (policy_shape,))
    p['val_w1'] = rn(ks[13], (512, filters))
    p['val_b1'] = rn(ks[14], (512,))
    p['val_w2'] = rn(ks[15], (1, 512))
    p['val_b2'] = rn(ks[16], (1,))
    p['col_w1'] = rn(ks[17], (512, filters))
    p['col_b1'] = rn(ks[18], (512,))
    p['col_w2'] = rn(ks[19], (4, 512))
    p['col_b2'] = rn(ks[20], (4,))
    return p


def reference_forward(x, params):
    """Pure-JAX reference with identical math (for correctness check)."""
    dn = ('NCHW', 'OIHW', 'NCHW')
    hp = jax.lax.Precision.HIGHEST
    v = jax.lax.conv_general_dilated(x, params['conv_w'], (1, 1), ((1, 1), (1, 1)),
                                     dimension_numbers=dn, precision=hp)
    v = v + params['conv_b'][None, :, None, None]

    def bn4(t, g, b, m, var):
        return (t - m[None, :, None, None]) * (
            g[None, :, None, None] * jax.lax.rsqrt(var[None, :, None, None] + EPS)
        ) + b[None, :, None, None]

    v = bn4(v, params['bn_in_g'], params['bn_in_b'], params['bn_in_m'], params['bn_in_v'])
    v = jnp.where(v > 0, v, LEAKY * v)
    H = x.shape[2]
    v = jnp.mean(v[:, :, :H, :H], axis=(2, 3))          # == F.avg_pool2d(v, H)
    for l in range(params['blk_w'].shape[0]):
        y = jnp.dot(v, params['blk_w'][l, :, :, 1, 1].T, precision=hp)
        y = (y - params['blk_m'][l]) * (
            params['blk_g'][l] * jax.lax.rsqrt(params['blk_v'][l] + EPS)) + params['blk_b'][l]
        v = jnp.where(y > 0, y, LEAKY * y) + v
    pol = jnp.dot(v, params['pol_w'].T, precision=hp) + params['pol_b']
    h = jnp.dot(v, params['val_w1'].T, precision=hp) + params['val_b1']
    h = jnp.where(h > 0, h, LEAKY * h)
    val = jnp.tanh(jnp.dot(h, params['val_w2'].T, precision=hp) + params['val_b2'])
    c = jnp.dot(v, params['col_w1'].T, precision=hp) + params['col_b1']
    c = jnp.where(c > 0, c, LEAKY * c)
    col = jnp.tanh(jnp.dot(c, params['col_w2'].T, precision=hp) + params['col_b2'])
    return pol, val, col


if __name__ == "__main__":
    # Small shapes consistent with the module: STATE_SHAPE=(1,41,62) -> here (1,16,24)
    N, C, H, W = 2, 1, 16, 24
    residual_layers, filters, policy_shape = 2, 32, 111

    key = jax.random.PRNGKey(0)
    kx, kp = jax.random.split(key)
    x = jax.random.normal(kx, (N, C, H, W), dtype=jnp.float32)
    params = init_params(kp, residual_layers, filters, in_channels=C,
                         policy_shape=policy_shape)

    fwd = jax.jit(net_forward)
    pol, val, col = fwd(x, params)
    jax.block_until_ready((pol, val, col))

    assert pol.shape == (N, policy_shape)
    assert val.shape == (N, 1)
    assert col.shape == (N, 4)

    pol_r, val_r, col_r = reference_forward(x, params)
    np.testing.assert_allclose(np.asarray(pol), np.asarray(pol_r), rtol=2e-2, atol=2e-2)
    np.testing.assert_allclose(np.asarray(val), np.asarray(val_r), rtol=2e-2, atol=2e-2)
    np.testing.assert_allclose(np.asarray(col), np.asarray(col_r), rtol=2e-2, atol=2e-2)

    print("KERNEL_OK")
</pallas_src>

<mosaic_0001>
module attributes {stable_mosaic.version = 11 : i64} {
  func.func @net_kernel(%arg0: i32, %arg1: memref<128x54xbf16, #tpu.memory_space<vmem>>, %arg2: memref<54x2048xbf16, #tpu.memory_space<vmem>>, %arg3: memref<1x128xf32, #tpu.memory_space<vmem>>, %arg4: memref<8x128xbf16, #tpu.memory_space<vmem>>, %arg5: memref<2x128x128xbf16, #tpu.memory_space<vmem>>, %arg6: memref<2x1x128xf32, #tpu.memory_space<vmem>>, %arg7: memref<128x1152xbf16, #tpu.memory_space<vmem>>, %arg8: memref<1x1152xf32, #tpu.memory_space<vmem>>, %arg9: memref<1024x128xbf16, #tpu.memory_space<vmem>>, %arg10: memref<1x128xf32, #tpu.memory_space<vmem>>, %arg11: memref<8x256xf32, #tpu.memory_space<vmem>>) attributes {dimension_semantics = [#tpu.dimension_semantics<parallel>], iteration_bounds = array<i64: 1>, scalar_prefetch = 0 : i64, scratch_operands = 0 : i64, tpu.core_type = #tpu.core_type<tc>, window_params = [{transform_indices = @transform_0, window_bounds = array<i64: 128, 54>}, {pipeline_mode = #tpu.pipeline_mode<synchronous>, transform_indices = @transform_1, window_bounds = array<i64: 54, 2048>}, {pipeline_mode = #tpu.pipeline_mode<synchronous>, transform_indices = @transform_2, window_bounds = array<i64: 1, 128>}, {pipeline_mode = #tpu.pipeline_mode<synchronous>, transform_indices = @transform_3, window_bounds = array<i64: 8, 128>}, {pipeline_mode = #tpu.pipeline_mode<synchronous>, transform_indices = @transform_4, window_bounds = array<i64: 2, 128, 128>}, {pipeline_mode = #tpu.pipeline_mode<synchronous>, transform_indices = @transform_5, window_bounds = array<i64: 2, 1, 128>}, {pipeline_mode = #tpu.pipeline_mode<synchronous>, transform_indices = @transform_6, window_bounds = array<i64: 128, 1152>}, {pipeline_mode = #tpu.pipeline_mode<synchronous>, transform_indices = @transform_7, window_bounds = array<i64: 1, 1152>}, {pipeline_mode = #tpu.pipeline_mode<synchronous>, transform_indices = @transform_8, window_bounds = array<i64: 1024, 128>}, {pipeline_mode = #tpu.pipeline_mode<synchronous>, transform_indices = @transform_9, window_bounds = array<i64: 1, 128>}, {transform_indices = @transform_10, window_bounds = array<i64: 8, 256>}]} {
    %c0 = arith.constant 0 : index
    %c0_0 = arith.constant 0 : index
    %0 = vector.load %arg1[%c0, %c0_0] : memref<128x54xbf16, #tpu.memory_space<vmem>>, vector<128x54xbf16>
    %c0_1 = arith.constant 0 : index
    %c0_2 = arith.constant 0 : index
    %1 = vector.load %arg3[%c0_1, %c0_2] : memref<1x128xf32, #tpu.memory_space<vmem>>, vector<1x128xf32>
    %cst = arith.constant 0.000000e+00 : f32
    %2 = vector.broadcast %cst : f32 to vector<128x128xf32>
    %c0_3 = arith.constant 0 : index
    %c0_4 = arith.constant 0 : index
    %3 = vector.load %arg2[%c0_3, %c0_4] : memref<54x2048xbf16, #tpu.memory_space<vmem>>, vector<54x128xbf16>
    %cst_5 = arith.constant dense<0.000000e+00> : vector<128x128xf32>
    %4 = tpu.matmul %0, %3, %cst_5 {dimension_numbers = #tpu.dot_dimension_numbers<[1], [0], [0], [1], [0, 0, 1, 1], [], []>} : vector<128x54xbf16>, vector<54x128xbf16>, vector<128x128xf32> -> vector<128x128xf32>
    %5 = vector.broadcast %1 : vector<1x128xf32> to vector<128x128xf32>
    %6 = arith.addf %4, %5 : vector<128x128xf32>
    %cst_6 = arith.constant 0.000000e+00 : f32
    %7 = vector.broadcast %cst_6 : f32 to vector<128x128xf32>
    %8 = arith.cmpf ogt, %6, %7 : vector<128x128xf32>
    %cst_7 = arith.constant 0.00999999977 : f32
    %9 = vector.broadcast %cst_7 : f32 to vector<128x128xf32>
    %10 = arith.mulf %9, %6 : vector<128x128xf32>
    %11 = arith.select %8, %6, %10 : vector<128x128xi1>, vector<128x128xf32>
    %12 = arith.addf %2, %11 : vector<128x128xf32>
    %c0_8 = arith.constant 0 : index
    %c128 = arith.constant 128 : index
    %13 = vector.load %arg2[%c0_8, %c128] : memref<54x2048xbf16, #tpu.memory_space<vmem>>, vector<54x128xbf16>
    %cst_9 = arith.constant dense<0.000000e+00> : vector<128x128xf32>
    %14 = tpu.matmul %0, %13, %cst_9 {dimension_numbers = #tpu.dot_dimension_numbers<[1], [0], [0], [1], [0, 0, 1, 1], [], []>} : vector<128x54xbf16>, vector<54x128xbf16>, vector<128x128xf32> -> vector<128x128xf32>
    %15 = vector.broadcast %1 : vector<1x128xf32> to vector<128x128xf32>
    %16 = arith.addf %14, %15 : vector<128x128xf32>
    %cst_10 = arith.constant 0.000000e+00 : f32
    %17 = vector.broadcast %cst_10 : f32 to vector<128x128xf32>
    %18 = arith.cmpf ogt, %16, %17 : vector<128x128xf32>
    %cst_11 = arith.constant 0.00999999977 : f32
    %19 = vector.broadcast %cst_11 : f32 to vector<128x128xf32>
    %20 = arith.mulf %19, %16 : vector<128x128xf32>
    %21 = arith.select %18, %16, %20 : vector<128x128xi1>, vector<128x128xf32>
    %22 = arith.addf %12, %21 : vector<128x128xf32>
    %c0_12 = arith.constant 0 : index
    %c256 = arith.constant 256 : index
    %23 = vector.load %arg2[%c0_12, %c256] : memref<54x2048xbf16, #tpu.memory_space<vmem>>, vector<54x128xbf16>
    %cst_13 = arith.constant dense<0.000000e+00> : vector<128x128xf32>
    %24 = tpu.matmul %0, %23, %cst_13 {dimension_numbers = #tpu.dot_dimension_numbers<[1], [0], [0], [1], [0, 0, 1, 1], [], []>} : vector<128x54xbf16>, vector<54x128xbf16>, vector<128x128xf32> -> vector<128x128xf32>
    %25 = vector.broadcast %1 : vector<1x128xf32> to vector<128x128xf32>
    %26 = arith.addf %24, %25 : vector<128x128xf32>
    %cst_14 = arith.constant 0.000000e+00 : f32
    %27 = vector.broadcast %cst_14 : f32 to vector<128x128xf32>
    %28 = arith.cmpf ogt, %26, %27 : vector<128x128xf32>
    %cst_15 = arith.constant 0.00999999977 : f32
    %29 = vector.broadcast %cst_15 : f32 to vector<128x128xf32>
    %30 = arith.mulf %29, %26 : vector<128x128xf32>
    %31 = arith.select %28, %26, %30 : vector<128x128xi1>, vector<128x128xf32>
    %32 = arith.addf %22, %31 : vector<128x128xf32>
    %c0_16 = arith.constant 0 : index
    %c384 = arith.constant 384 : index
    %33 = vector.load %arg2[%c0_16, %c384] : memref<54x2048xbf16, #tpu.memory_space<vmem>>, vector<54x128xbf16>
    %cst_17 = arith.constant dense<0.000000e+00> : vector<128x128xf32>
    %34 = tpu.matmul %0, %33, %cst_17 {dimension_numbers = #tpu.dot_dimension_numbers<[1], [0], [0], [1], [0, 0, 1, 1], [], []>} : vector<128x54xbf16>, vector<54x128xbf16>, vector<128x128xf32> -> vector<128x128xf32>
    %35 = vector.broadcast %1 : vector<1x128xf32> to vector<128x128xf32>
    %36 = arith.addf %34, %35 : vector<128x128xf32>
    %cst_18 = arith.constant 0.000000e+00 : f32
    %37 = vector.broadcast %cst_18 : f32 to vector<128x128xf32>
    %38 = arith.cmpf ogt, %36, %37 : vector<128x128xf32>
    %cst_19 = arith.constant 0.00999999977 : f32
    %39 = vector.broadcast %cst_19 : f32 to vector<128x128xf32>
    %40 = arith.mulf %39, %36 : vector<128x128xf32>
    %41 = arith.select %38, %36, %40 : vector<128x128xi1>, vector<128x128xf32>
    %42 = arith.addf %32, %41 : vector<128x128xf32>
    %c0_20 = arith.constant 0 : index
    %c512 = arith.constant 512 : index
    %43 = vector.load %arg2[%c0_20, %c512] : memref<54x2048xbf16, #tpu.memory_space<vmem>>, vector<54x128xbf16>
    %cst_21 = arith.constant dense<0.000000e+00> : vector<128x128xf32>
    %44 = tpu.matmul %0, %43, %cst_21 {dimension_numbers = #tpu.dot_dimension_numbers<[1], [0], [0], [1], [0, 0, 1, 1], [], []>} : vector<128x54xbf16>, vector<54x128xbf16>, vector<128x128xf32> -> vector<128x128xf32>
    %45 = vector.broadcast %1 : vector<1x128xf32> to vector<128x128xf32>
    %46 = arith.addf %44, %45 : vector<128x128xf32>
    %cst_22 = arith.constant 0.000000e+00 : f32
    %47 = vector.broadcast %cst_22 : f32 to vector<128x128xf32>
    %48 = arith.cmpf ogt, %46, %47 : vector<128x128xf32>
    %cst_23 = arith.constant 0.00999999977 : f32
    %49 = vector.broadcast %cst_23 : f32 to vector<128x128xf32>
    %50 = arith.mulf %49, %46 : vector<128x128xf32>
    %51 = arith.select %48, %46, %50 : vector<128x128xi1>, vector<128x128xf32>
    %52 = arith.addf %42, %51 : vector<128x128xf32>
    %c0_24 = arith.constant 0 : index
    %c640 = arith.constant 640 : index
    %53 = vector.load %arg2[%c0_24, %c640] : memref<54x2048xbf16, #tpu.memory_space<vmem>>, vector<54x128xbf16>
    %cst_25 = arith.constant dense<0.000000e+00> : vector<128x128xf32>
    %54 = tpu.matmul %0, %53, %cst_25 {dimension_numbers = #tpu.dot_dimension_numbers<[1], [0], [0], [1], [0, 0, 1, 1], [], []>} : vector<128x54xbf16>, vector<54x128xbf16>, vector<128x128xf32> -> vector<128x128xf32>
    %55 = vector.broadcast %1 : vector<1x128xf32> to vector<128x128xf32>
    %56 = arith.addf %54, %55 : vector<128x128xf32>
    %cst_26 = arith.constant 0.000000e+00 : f32
    %57 = vector.broadcast %cst_26 : f32 to vector<128x128xf32>
    %58 = arith.cmpf ogt, %56, %57 : vector<128x128xf32>
    %cst_27 = arith.constant 0.00999999977 : f32
    %59 = vector.broadcast %cst_27 : f32 to vector<128x128xf32>
    %60 = arith.mulf %59, %56 : vector<128x128xf32>
    %61 = arith.select %58, %56, %60 : vector<128x128xi1>, vector<128x128xf32>
    %62 = arith.addf %52, %61 : vector<128x128xf32>
    %c0_28 = arith.constant 0 : index
    %c768 = arith.constant 768 : index
    %63 = vector.load %arg2[%c0_28, %c768] : memref<54x2048xbf16, #tpu.memory_space<vmem>>, vector<54x128xbf16>
    %cst_29 = arith.constant dense<0.000000e+00> : vector<128x128xf32>
    %64 = tpu.matmul %0, %63, %cst_29 {dimension_numbers = #tpu.dot_dimension_numbers<[1], [0], [0], [1], [0, 0, 1, 1], [], []>} : vector<128x54xbf16>, vector<54x128xbf16>, vector<128x128xf32> -> vector<128x128xf32>
    %65 = vector.broadcast %1 : vector<1x128xf32> to vector<128x128xf32>
    %66 = arith.addf %64, %65 : vector<128x128xf32>
    %cst_30 = arith.constant 0.000000e+00 : f32
    %67 = vector.broadcast %cst_30 : f32 to vector<128x128xf32>
    %68 = arith.cmpf ogt, %66, %67 : vector<128x128xf32>
    %cst_31 = arith.constant 0.00999999977 : f32
    %69 = vector.broadcast %cst_31 : f32 to vector<128x128xf32>
    %70 = arith.mulf %69, %66 : vector<128x128xf32>
    %71 = arith.select %68, %66, %70 : vector<128x128xi1>, vector<128x128xf32>
    %72 = arith.addf %62, %71 : vector<128x128xf32>
    %c0_32 = arith.constant 0 : index
    %c896 = arith.constant 896 : index
    %73 = vector.load %arg2[%c0_32, %c896] : memref<54x2048xbf16, #tpu.memory_space<vmem>>, vector<54x128xbf16>
    %cst_33 = arith.constant dense<0.000000e+00> : vector<128x128xf32>
    %74 = tpu.matmul %0, %73, %cst_33 {dimension_numbers = #tpu.dot_dimension_numbers<[1], [0], [0], [1], [0, 0, 1, 1], [], []>} : vector<128x54xbf16>, vector<54x128xbf16>, vector<128x128xf32> -> vector<128x128xf32>
    %75 = vector.broadcast %1 : vector<1x128xf32> to vector<128x128xf32>
    %76 = arith.addf %74, %75 : vector<128x128xf32>
    %cst_34 = arith.constant 0.000000e+00 : f32
    %77 = vector.broadcast %cst_34 : f32 to vector<128x128xf32>
    %78 = arith.cmpf ogt, %76, %77 : vector<128x128xf32>
    %cst_35 = arith.constant 0.00999999977 : f32
    %79 = vector.broadcast %cst_35 : f32 to vector<128x128xf32>
    %80 = arith.mulf %79, %76 : vector<128x128xf32>
    %81 = arith.select %78, %76, %80 : vector<128x128xi1>, vector<128x128xf32>
    %82 = arith.addf %72, %81 : vector<128x128xf32>
    %c0_36 = arith.constant 0 : index
    %c1024 = arith.constant 1024 : index
    %83 = vector.load %arg2[%c0_36, %c1024] : memref<54x2048xbf16, #tpu.memory_space<vmem>>, vector<54x128xbf16>
    %cst_37 = arith.constant dense<0.000000e+00> : vector<128x128xf32>
    %84 = tpu.matmul %0, %83, %cst_37 {dimension_numbers = #tpu.dot_dimension_numbers<[1], [0], [0], [1], [0, 0, 1, 1], [], []>} : vector<128x54xbf16>, vector<54x128xbf16>, vector<128x128xf32> -> vector<128x128xf32>
    %85 = vector.broadcast %1 : vector<1x128xf32> to vector<128x128xf32>
    %86 = arith.addf %84, %85 : vector<128x128xf32>
    %cst_38 = arith.constant 0.000000e+00 : f32
    %87 = vector.broadcast %cst_38 : f32 to vector<128x128xf32>
    %88 = arith.cmpf ogt, %86, %87 : vector<128x128xf32>
    %cst_39 = arith.constant 0.00999999977 : f32
    %89 = vector.broadcast %cst_39 : f32 to vector<128x128xf32>
    %90 = arith.mulf %89, %86 : vector<128x128xf32>
    %91 = arith.select %88, %86, %90 : vector<128x128xi1>, vector<128x128xf32>
    %92 = arith.addf %82, %91 : vector<128x128xf32>
    %c0_40 = arith.constant 0 : index
    %c1152 = arith.constant 1152 : index
    %93 = vector.load %arg2[%c0_40, %c1152] : memref<54x2048xbf16, #tpu.memory_space<vmem>>, vector<54x128xbf16>
    %cst_41 = arith.constant dense<0.000000e+00> : vector<128x128xf32>
    %94 = tpu.matmul %0, %93, %cst_41 {dimension_numbers = #tpu.dot_dimension_numbers<[1], [0], [0], [1], [0, 0, 1, 1], [], []>} : vector<128x54xbf16>, vector<54x128xbf16>, vector<128x128xf32> -> vector<128x128xf32>
    %95 = vector.broadcast %1 : vector<1x128xf32> to vector<128x128xf32>
    %96 = arith.addf %94, %95 : vector<128x128xf32>
    %cst_42 = arith.constant 0.000000e+00 : f32
    %97 = vector.broadcast %cst_42 : f32 to vector<128x128xf32>
    %98 = arith.cmpf ogt, %96, %97 : vector<128x128xf32>
    %cst_43 = arith.constant 0.00999999977 : f32
    %99 = vector.broadcast %cst_43 : f32 to vector<128x128xf32>
    %100 = arith.mulf %99, %96 : vector<128x128xf32>
    %101 = arith.select %98, %96, %100 : vector<128x128xi1>, vector<128x128xf32>
    %102 = arith.addf %92, %101 : vector<128x128xf32>
    %c0_44 = arith.constant 0 : index
    %c1280 = arith.constant 1280 : index
    %103 = vector.load %arg2[%c0_44, %c1280] : memref<54x2048xbf16, #tpu.memory_space<vmem>>, vector<54x128xbf16>
    %cst_45 = arith.constant dense<0.000000e+00> : vector<128x128xf32>
    %104 = tpu.matmul %0, %103, %cst_45 {dimension_numbers = #tpu.dot_dimension_numbers<[1], [0], [0], [1], [0, 0, 1, 1], [], []>} : vector<128x54xbf16>, vector<54x128xbf16>, vector<128x128xf32> -> vector<128x128xf32>
    %105 = vector.broadcast %1 : vector<1x128xf32> to vector<128x128xf32>
    %106 = arith.addf %104, %105 : vector<128x128xf32>
    %cst_46 = arith.constant 0.000000e+00 : f32
    %107 = vector.broadcast %cst_46 : f32 to vector<128x128xf32>
    %108 = arith.cmpf ogt, %106, %107 : vector<128x128xf32>
    %cst_47 = arith.constant 0.00999999977 : f32
    %109 = vector.broadcast %cst_47 : f32 to vector<128x128xf32>
    %110 = arith.mulf %109, %106 : vector<128x128xf32>
    %111 = arith.select %108, %106, %110 : vector<128x128xi1>, vector<128x128xf32>
    %112 = arith.addf %102, %111 : vector<128x128xf32>
    %c0_48 = arith.constant 0 : index
    %c1408 = arith.constant 1408 : index
    %113 = vector.load %arg2[%c0_48, %c1408] : memref<54x2048xbf16, #tpu.memory_space<vmem>>, vector<54x128xbf16>
    %cst_49 = arith.constant dense<0.000000e+00> : vector<128x128xf32>
    %114 = tpu.matmul %0, %113, %cst_49 {dimension_numbers = #tpu.dot_dimension_numbers<[1], [0], [0], [1], [0, 0, 1, 1], [], []>} : vector<128x54xbf16>, vector<54x128xbf16>, vector<128x128xf32> -> vector<128x128xf32>
    %115 = vector.broadcast %1 : vector<1x128xf32> to vector<128x128xf32>
    %116 = arith.addf %114, %115 : vector<128x128xf32>
    %cst_50 = arith.constant 0.000000e+00 : f32
    %117 = vector.broadcast %cst_50 : f32 to vector<128x128xf32>
    %118 = arith.cmpf ogt, %116, %117 : vector<128x128xf32>
    %cst_51 = arith.constant 0.00999999977 : f32
    %119 = vector.broadcast %cst_51 : f32 to vector<128x128xf32>
    %120 = arith.mulf %119, %116 : vector<128x128xf32>
    %121 = arith.select %118, %116, %120 : vector<128x128xi1>, vector<128x128xf32>
    %122 = arith.addf %112, %121 : vector<128x128xf32>
    %c0_52 = arith.constant 0 : index
    %c1536 = arith.constant 1536 : index
    %123 = vector.load %arg2[%c0_52, %c1536] : memref<54x2048xbf16, #tpu.memory_space<vmem>>, vector<54x128xbf16>
    %cst_53 = arith.constant dense<0.000000e+00> : vector<128x128xf32>
    %124 = tpu.matmul %0, %123, %cst_53 {dimension_numbers = #tpu.dot_dimension_numbers<[1], [0], [0], [1], [0, 0, 1, 1], [], []>} : vector<128x54xbf16>, vector<54x128xbf16>, vector<128x128xf32> -> vector<128x128xf32>
    %125 = vector.broadcast %1 : vector<1x128xf32> to vector<128x128xf32>
    %126 = arith.addf %124, %125 : vector<128x128xf32>
    %cst_54 = arith.constant 0.000000e+00 : f32
    %127 = vector.broadcast %cst_54 : f32 to vector<128x128xf32>
    %128 = arith.cmpf ogt, %126, %127 : vector<128x128xf32>
    %cst_55 = arith.constant 0.00999999977 : f32
    %129 = vector.broadcast %cst_55 : f32 to vector<128x128xf32>
    %130 = arith.mulf %129, %126 : vector<128x128xf32>
    %131 = arith.select %128, %126, %130 : vector<128x128xi1>, vector<128x128xf32>
    %132 = arith.addf %122, %131 : vector<128x128xf32>
    %c0_56 = arith.constant 0 : index
    %c1664 = arith.constant 1664 : index
    %133 = vector.load %arg2[%c0_56, %c1664] : memref<54x2048xbf16, #tpu.memory_space<vmem>>, vector<54x128xbf16>
    %cst_57 = arith.constant dense<0.000000e+00> : vector<128x128xf32>
    %134 = tpu.matmul %0, %133, %cst_57 {dimension_numbers = #tpu.dot_dimension_numbers<[1], [0], [0], [1], [0, 0, 1, 1], [], []>} : vector<128x54xbf16>, vector<54x128xbf16>, vector<128x128xf32> -> vector<128x128xf32>
    %135 = vector.broadcast %1 : vector<1x128xf32> to vector<128x128xf32>
    %136 = arith.addf %134, %135 : vector<128x128xf32>
    %cst_58 = arith.constant 0.000000e+00 : f32
    %137 = vector.broadcast %cst_58 : f32 to vector<128x128xf32>
    %138 = arith.cmpf ogt, %136, %137 : vector<128x128xf32>
    %cst_59 = arith.constant 0.00999999977 : f32
    %139 = vector.broadcast %cst_59 : f32 to vector<128x128xf32>
    %140 = arith.mulf %139, %136 : vector<128x128xf32>
    %141 = arith.select %138, %136, %140 : vector<128x128xi1>, vector<128x128xf32>
    %142 = arith.addf %132, %141 : vector<128x128xf32>
    %c0_60 = arith.constant 0 : index
    %c1792 = arith.constant 1792 : index
    %143 = vector.load %arg2[%c0_60, %c1792] : memref<54x2048xbf16, #tpu.memory_space<vmem>>, vector<54x128xbf16>
    %cst_61 = arith.constant dense<0.000000e+00> : vector<128x128xf32>
    %144 = tpu.matmul %0, %143, %cst_61 {dimension_numbers = #tpu.dot_dimension_numbers<[1], [0], [0], [1], [0, 0, 1, 1], [], []>} : vector<128x54xbf16>, vector<54x128xbf16>, vector<128x128xf32> -> vector<128x128xf32>
    %145 = vector.broadcast %1 : vector<1x128xf32> to vector<128x128xf32>
    %146 = arith.addf %144, %145 : vector<128x128xf32>
    %cst_62 = arith.constant 0.000000e+00 : f32
    %147 = vector.broadcast %cst_62 : f32 to vector<128x128xf32>
    %148 = arith.cmpf ogt, %146, %147 : vector<128x128xf32>
    %cst_63 = arith.constant 0.00999999977 : f32
    %149 = vector.broadcast %cst_63 : f32 to vector<128x128xf32>
    %150 = arith.mulf %149, %146 : vector<128x128xf32>
    %151 = arith.select %148, %146, %150 : vector<128x128xi1>, vector<128x128xf32>
    %152 = arith.addf %142, %151 : vector<128x128xf32>
    %c0_64 = arith.constant 0 : index
    %c1920 = arith.constant 1920 : index
    %153 = vector.load %arg2[%c0_64, %c1920] : memref<54x2048xbf16, #tpu.memory_space<vmem>>, vector<54x128xbf16>
    %cst_65 = arith.constant dense<0.000000e+00> : vector<128x128xf32>
    %154 = tpu.matmul %0, %153, %cst_65 {dimension_numbers = #tpu.dot_dimension_numbers<[1], [0], [0], [1], [0, 0, 1, 1], [], []>} : vector<128x54xbf16>, vector<54x128xbf16>, vector<128x128xf32> -> vector<128x128xf32>
    %155 = vector.broadcast %1 : vector<1x128xf32> to vector<128x128xf32>
    %156 = arith.addf %154, %155 : vector<128x128xf32>
    %cst_66 = arith.constant 0.000000e+00 : f32
    %157 = vector.broadcast %cst_66 : f32 to vector<128x128xf32>
    %158 = arith.cmpf ogt, %156, %157 : vector<128x128xf32>
    %cst_67 = arith.constant 0.00999999977 : f32
    %159 = vector.broadcast %cst_67 : f32 to vector<128x128xf32>
    %160 = arith.mulf %159, %156 : vector<128x128xf32>
    %161 = arith.select %158, %156, %160 : vector<128x128xi1>, vector<128x128xf32>
    %162 = arith.addf %152, %161 : vector<128x128xf32>
    %c0_68 = arith.constant 0 : index
    %c0_69 = arith.constant 0 : index
    %163 = vector.load %arg4[%c0_68, %c0_69] : memref<8x128xbf16, #tpu.memory_space<vmem>>, vector<8x128xbf16>
    %164 = arith.truncf %162 : vector<128x128xf32> to vector<128x128xbf16>
    %cst_70 = arith.constant dense<0.000000e+00> : vector<8x128xf32>
    %165 = tpu.matmul %163, %164, %cst_70 {dimension_numbers = #tpu.dot_dimension_numbers<[1], [0], [0], [1], [0, 0, 1, 1], [], []>} : vector<8x128xbf16>, vector<128x128xbf16>, vector<8x128xf32> -> vector<8x128xf32>
    %cst_71 = arith.constant 3.906250e-03 : f32
    %166 = vector.broadcast %cst_71 : f32 to vector<8x128xf32>
    %167 = arith.mulf %165, %166 : vector<8x128xf32>
    %168 = arith.truncf %167 : vector<8x128xf32> to vector<8x128xbf16>
    %c0_72 = arith.constant 0 : index
    %c0_73 = arith.constant 0 : index
    %c0_74 = arith.constant 0 : index
    %169 = vector.load %arg5[%c0_72, %c0_73, %c0_74] : memref<2x128x128xbf16, #tpu.memory_space<vmem>>, vector<1x128x128xbf16>
    %170 = vector.shape_cast %169 : vector<1x128x128xbf16> to vector<128x128xbf16>
    %cst_75 = arith.constant dense<0.000000e+00> : vector<8x128xf32>
    %171 = tpu.matmul %168, %170, %cst_75 {dimension_numbers = #tpu.dot_dimension_numbers<[1], [0], [0], [1], [0, 0, 1, 1], [], []>} : vector<8x128xbf16>, vector<128x128xbf16>, vector<8x128xf32> -> vector<8x128xf32>
    %c0_76 = arith.constant 0 : index
    %c0_77 = arith.constant 0 : index
    %c0_78 = arith.constant 0 : index
    %172 = vector.load %arg6[%c0_76, %c0_77, %c0_78] : memref<2x1x128xf32, #tpu.memory_space<vmem>>, vector<1x1x128xf32>
    %173 = vector.shape_cast %172 : vector<1x1x128xf32> to vector<1x128xf32>
    %174 = vector.broadcast %173 : vector<1x128xf32> to vector<8x128xf32>
    %175 = arith.addf %171, %174 : vector<8x128xf32>
    %cst_79 = arith.constant 0.000000e+00 : f32
    %176 = vector.broadcast %cst_79 : f32 to vector<8x128xf32>
    %177 = arith.cmpf ogt, %175, %176 : vector<8x128xf32>
    %cst_80 = arith.constant 0.00999999977 : f32
    %178 = vector.broadcast %cst_80 : f32 to vector<8x128xf32>
    %179 = arith.mulf %178, %175 : vector<8x128xf32>
    %180 = arith.select %177, %175, %179 : vector<8x128xi1>, vector<8x128xf32>
    %181 = arith.addf %180, %167 : vector<8x128xf32>
    %182 = arith.truncf %181 : vector<8x128xf32> to vector<8x128xbf16>
    %c1 = arith.constant 1 : index
    %c0_81 = arith.constant 0 : index
    %c0_82 = arith.constant 0 : index
    %183 = vector.load %arg5[%c1, %c0_81, %c0_82] : memref<2x128x128xbf16, #tpu.memory_space<vmem>>, vector<1x128x128xbf16>
    %184 = vector.shape_cast %183 : vector<1x128x128xbf16> to vector<128x128xbf16>
    %cst_83 = arith.constant dense<0.000000e+00> : vector<8x128xf32>
    %185 = tpu.matmul %182, %184, %cst_83 {dimension_numbers = #tpu.dot_dimension_numbers<[1], [0], [0], [1], [0, 0, 1, 1], [], []>} : vector<8x128xbf16>, vector<128x128xbf16>, vector<8x128xf32> -> vector<8x128xf32>
    %c1_84 = arith.constant 1 : index
    %c0_85 = arith.constant 0 : index
    %c0_86 = arith.constant 0 : index
    %186 = vector.load %arg6[%c1_84, %c0_85, %c0_86] : memref<2x1x128xf32, #tpu.memory_space<vmem>>, vector<1x1x128xf32>
    %187 = vector.shape_cast %186 : vector<1x1x128xf32> to vector<1x128xf32>
    %188 = vector.broadcast %187 : vector<1x128xf32> to vector<8x128xf32>
    %189 = arith.addf %185, %188 : vector<8x128xf32>
    %cst_87 = arith.constant 0.000000e+00 : f32
    %190 = vector.broadcast %cst_87 : f32 to vector<8x128xf32>
    %191 = arith.cmpf ogt, %189, %190 : vector<8x128xf32>
    %cst_88 = arith.constant 0.00999999977 : f32
    %192 = vector.broadcast %cst_88 : f32 to vector<8x128xf32>
    %193 = arith.mulf %192, %189 : vector<8x128xf32>
    %194 = arith.select %191, %189, %193 : vector<8x128xi1>, vector<8x128xf32>
    %195 = arith.addf %194, %181 : vector<8x128xf32>
    %196 = arith.truncf %195 : vector<8x128xf32> to vector<8x128xbf16>
    %c0_89 = arith.constant 0 : index
    %c0_90 = arith.constant 0 : index
    %197 = vector.load %arg7[%c0_89, %c0_90] : memref<128x1152xbf16, #tpu.memory_space<vmem>>, vector<128x1152xbf16>
    %cst_91 = arith.constant dense<0.000000e+00> : vector<8x1152xf32>
    %198 = tpu.matmul %196, %197, %cst_91 {dimension_numbers = #tpu.dot_dimension_numbers<[1], [0], [0], [1], [0, 0, 1, 1], [], []>} : vector<8x128xbf16>, vector<128x1152xbf16>, vector<8x1152xf32> -> vector<8x1152xf32>
    %c0_92 = arith.constant 0 : index
    %c0_93 = arith.constant 0 : index
    %199 = vector.load %arg8[%c0_92, %c0_93] : memref<1x1152xf32, #tpu.memory_space<vmem>>, vector<1x1152xf32>
    %200 = vector.broadcast %199 : vector<1x1152xf32> to vector<8x1152xf32>
    %201 = arith.addf %198, %200 : vector<8x1152xf32>
    %202 = vector.extract_strided_slice %201 {offsets = [0, 0], sizes = [8, 128], strides = [1, 1]} : vector<8x1152xf32> to vector<8x128xf32>
    %203 = vector.extract_strided_slice %201 {offsets = [0, 128], sizes = [8, 1024], strides = [1, 1]} : vector<8x1152xf32> to vector<8x1024xf32>
    %cst_94 = arith.constant 0.000000e+00 : f32
    %204 = vector.broadcast %cst_94 : f32 to vector<8x1024xf32>
    %205 = arith.cmpf ogt, %203, %204 : vector<8x1024xf32>
    %cst_95 = arith.constant 0.00999999977 : f32
    %206 = vector.broadcast %cst_95 : f32 to vector<8x1024xf32>
    %207 = arith.mulf %206, %203 : vector<8x1024xf32>
    %208 = arith.select %205, %203, %207 : vector<8x1024xi1>, vector<8x1024xf32>
    %209 = arith.truncf %208 : vector<8x1024xf32> to vector<8x1024xbf16>
    %c0_96 = arith.constant 0 : index
    %c0_97 = arith.constant 0 : index
    %210 = vector.load %arg9[%c0_96, %c0_97] : memref<1024x128xbf16, #tpu.memory_space<vmem>>, vector<1024x128xbf16>
    %cst_98 = arith.constant dense<0.000000e+00> : vector<8x128xf32>
    %211 = tpu.matmul %209, %210, %cst_98 {dimension_numbers = #tpu.dot_dimension_numbers<[1], [0], [0], [1], [0, 0, 1, 1], [], []>} : vector<8x1024xbf16>, vector<1024x128xbf16>, vector<8x128xf32> -> vector<8x128xf32>
    %c0_99 = arith.constant 0 : index
    %c0_100 = arith.constant 0 : index
    %212 = vector.load %arg10[%c0_99, %c0_100] : memref<1x128xf32, #tpu.memory_space<vmem>>, vector<1x128xf32>
    %213 = vector.broadcast %212 : vector<1x128xf32> to vector<8x128xf32>
    %214 = arith.addf %211, %213 : vector<8x128xf32>
    %215 = math.tanh %214 : vector<8x128xf32>
    %c0_101 = arith.constant 0 : index
    %c0_102 = arith.constant 0 : index
    %216 = vector.load %arg11[%c0_101, %c0_102] : memref<8x256xf32, #tpu.memory_space<vmem>>, vector<8x128xf32>
    tpu.vector_store %arg11[%c0_101, %c0_102], %202 {strides = array<i32>} : memref<8x256xf32, #tpu.memory_space<vmem>>, vector<8x128xf32>,
    %c0_103 = arith.constant 0 : index
    %c128_104 = arith.constant 128 : index
    %217 = vector.load %arg11[%c0_103, %c128_104] : memref<8x256xf32, #tpu.memory_space<vmem>>, vector<8x128xf32>
    tpu.vector_store %arg11[%c0_103, %c128_104], %215 {strides = array<i32>} : memref<8x256xf32, #tpu.memory_space<vmem>>, vector<8x128xf32>,
    return
  }
  func.func @transform_0(%arg0: i32) -> (i32, i32) {
    %c0_i32 = arith.constant 0 : i32
    %c0_i32_0 = arith.constant 0 : i32
    return %arg0, %c0_i32 : i32, i32
  }
  func.func @transform_1(%arg0: i32) -> (i32, i32) {
    %c0_i32 = arith.constant 0 : i32
    %c0_i32_0 = arith.constant 0 : i32
    %c0_i32_1 = arith.constant 0 : i32
    return %c0_i32, %c0_i32_0 : i32, i32
  }
  func.func @transform_2(%arg0: i32) -> (i32, i32) {
    %c0_i32 = arith.constant 0 : i32
    %c0_i32_0 = arith.constant 0 : i32
    %c0_i32_1 = arith.constant 0 : i32
    return %c0_i32, %c0_i32_0 : i32, i32
  }
  func.func @transform_3(%arg0: i32) -> (i32, i32) {
    %c0_i32 = arith.constant 0 : i32
    %c0_i32_0 = arith.constant 0 : i32
    %c0_i32_1 = arith.constant 0 : i32
    return %c0_i32, %c0_i32_0 : i32, i32
  }
  func.func @transform_4(%arg0: i32) -> (i32, i32, i32) {
    %c0_i32 = arith.constant 0 : i32
    %c0_i32_0 = arith.constant 0 : i32
    %c0_i32_1 = arith.constant 0 : i32
    %c0_i32_2 = arith.constant 0 : i32
    return %c0_i32, %c0_i32_0, %c0_i32_1 : i32, i32, i32
  }
  func.func @transform_5(%arg0: i32) -> (i32, i32, i32) {
    %c0_i32 = arith.constant 0 : i32
    %c0_i32_0 = arith.constant 0 : i32
    %c0_i32_1 = arith.constant 0 : i32
    %c0_i32_2 = arith.constant 0 : i32
    return %c0_i32, %c0_i32_0, %c0_i32_1 : i32, i32, i32
  }
  func.func @transform_6(%arg0: i32) -> (i32, i32) {
    %c0_i32 = arith.constant 0 : i32
    %c0_i32_0 = arith.constant 0 : i32
    %c0_i32_1 = arith.constant 0 : i32
    return %c0_i32, %c0_i32_0 : i32, i32
  }
  func.func @transform_7(%arg0: i32) -> (i32, i32) {
    %c0_i32 = arith.constant 0 : i32
    %c0_i32_0 = arith.constant 0 : i32
    %c0_i32_1 = arith.constant 0 : i32
    return %c0_i32, %c0_i32_0 : i32, i32
  }
  func.func @transform_8(%arg0: i32) -> (i32, i32) {
    %c0_i32 = arith.constant 0 : i32
    %c0_i32_0 = arith.constant 0 : i32
    %c0_i32_1 = arith.constant 0 : i32
    return %c0_i32, %c0_i32_0 : i32, i32
  }
  func.func @transform_9(%arg0: i32) -> (i32, i32) {
    %c0_i32 = arith.constant 0 : i32
    %c0_i32_0 = arith.constant 0 : i32
    %c0_i32_1 = arith.constant 0 : i32
    return %c0_i32, %c0_i32_0 : i32, i32
  }
  func.func @transform_10(%arg0: i32) -> (i32, i32) {
    %c0_i32 = arith.constant 0 : i32
    %c0_i32_0 = arith.constant 0 : i32
    return %arg0, %c0_i32 : i32, i32
  }
}

</mosaic_0001>

<bundles_post_ra>
// kernel: net_forward.1
= control target key start
LH: loop header
LB: loop body
LE: loop exit
PB: predicated region body
PF: predicated region fallthrough
CT: control target
= control target key end

     0   :  { %vm127_vm0 = vcmask 441344   ;;  %vm152_vm1 = vcmask 1042432   ;;  %s8766_s1 = inlined_call_operand.vmem [shape: bf16[54,2048], index: 1, kind: input, shape index: {}]   ;;  %s8767_s0 = inlined_call_operand.vmem [shape: bf16[128,54], index: 0, kind: input, shape index: {}]   ;;  %s8768_s2 = inlined_call_operand.vmem [shape: f32[1,128], index: 2, kind: input, shape index: {}]   ;;  %s8769_s4 = inlined_call_operand.vmem [shape: bf16[2,128,128], index: 4, kind: input, shape index: {}]   ;;  %s8770_s3 = inlined_call_operand.vmem [shape: bf16[8,128], index: 3, kind: input, shape index: {}]   ;;  %s8771_s6 = inlined_call_operand.vmem [shape: bf16[128,1152], index: 6, kind: input, shape index: {}]   ;;  %s8772_s5 = inlined_call_operand.vmem [shape: f32[2,1,128], index: 5, kind: input, shape index: {}]   ;;  %s8773_s8 = inlined_call_operand.vmem [shape: bf16[1024,128], index: 8, kind: input, shape index: {}]   ;;  %s8774_s7 = inlined_call_operand.vmem [shape: f32[1,1152], index: 7, kind: input, shape index: {}]   ;;  %s8775_s10 = inlined_call_operand.vmem [shape: f32[8,256], index: 10, kind: output, shape index: {}]   ;;  %s8776_s9 = inlined_call_operand.vmem [shape: f32[1,128], index: 9, kind: input, shape index: {}]  }
   0x1   :  { %v53_v0 = vld [vmem:[%s8766_s1] sm:$0xf]  ;;  %v317_v2 = vld [vmem:[%s8766_s1 + $0x4] sm:$0xf]  ;;  %v509_v21 = vld [vmem:[%s8766_s1 + $0x8] sm:$0xf] }
   0x2   :  { %v54_v1 = vld [vmem:[%s8766_s1 + $0x40] sm:$0xf]  ;;  %v318_v4 = vld [vmem:[%s8766_s1 + $0x44] sm:$0xf]  ;;  %v510_v22 = vld [vmem:[%s8766_s1 + $0x48] sm:$0xf] }
   0x3   :  { %v4910_v3 = vcombine.low %v53_v0, %v54_v1  ;;  %v55_v5 = vld [vmem:[%s8766_s1 + $0x80] sm:$0xf]  ;;  %v4922_v7 = vcombine.low %v317_v2, %v318_v4  ;;  %v319_v9 = vld [vmem:[%s8766_s1 + $0x84] sm:$0xf]  ;;  %v701_v23 = vld [vmem:[%s8766_s1 + $0xc] sm:$0xf]  ;;  %v4934_v26 = vcombine.low %v509_v21, %v510_v22 }
   0x4   :  { %v56_v6 = vld [vmem:[%s8766_s1 + $0xc0] sm:$0xf]  ;;  %v320_v10 = vld [vmem:[%s8766_s1 + $0xc4] sm:$0xf]  ;;  %v702_v24 = vld [vmem:[%s8766_s1 + $0x4c] sm:$0xf] }
   0x5   :  { %v4911_v8 = vcombine.low %v55_v5, %v56_v6  ;;  %v57_v11 = vld [vmem:[%s8766_s1 + $0x100] sm:$0xf]  ;;  %5591 = vmatprep.subr.bf16.mxu0 %v4910_v3  ;;  %v4923_v12 = vcombine.low %v319_v9, %v320_v10  ;;  %v321_v14 = vld [vmem:[%s8766_s1 + $0x104] sm:$0xf]  ;;  %5615 = vmatprep.subr.bf16.mxu1 %v4922_v7  ;;  %v6416_v28 = vld [vmem:[%s8767_s0 + $0x8] sm:$0xff]   ;;  %v4946_v29 = vcombine.low %v701_v23, %v702_v24 }
   0x6   :  { %v58_v13 = vld [vmem:[%s8766_s1 + $0x140] sm:$0xf]  ;;  %v322_v15 = vld [vmem:[%s8766_s1 + $0x144] sm:$0xf]  ;;  %5592 = vmatpush3.bf16.msra.mxu0 %v4910_v3  ;;  %5616 = vmatpush3.bf16.msra.mxu1 %v4922_v7  ;;  %v511_v30 = vld [vmem:[%s8766_s1 + $0x88] sm:$0xf] }
   0x7   :  { %v6385_v16 = vld [vmem:[%s8767_s0] sm:$0xff]   ;;  %5593 = vmatprep.subr.bf16.mxu0 %v4911_v8  ;;  %v4912_v17 = vcombine.low %v57_v11, %v58_v13  ;;  %5617 = vmatprep.subr.bf16.mxu1 %v4923_v12  ;;  %v4924_v18 = vcombine.low %v321_v14, %v322_v15  ;;  %v512_v31 = vld [vmem:[%s8766_s1 + $0xc8] sm:$0xf]  ;;  %v703_v32 = vld [vmem:[%s8766_s1 + $0x8c] sm:$0xf] }
   0x8   :  { %5599 = vmatprep.mubr.msk.bf16.mxu0 %vm127_vm0, %v6385_v16  ;;  %5623 = vmatprep.mubr.msk.bf16.mxu1 %vm127_vm0, %v6385_v16  ;;  %v6074_v19 = vld [vmem:[%s8766_s1 + $0x180] ss:$0 sps:$4 sm:$0x77]   ;;  %v6075_v20 = vld [vmem:[%s8766_s1 + $0x184] ss:$0 sps:$4 sm:$0x77]   ;;  %v4935_v35 = vcombine.low %v511_v30, %v512_v31 }
   0x9   :  { %v154_v25 = vsel %vm152_vm1, %v6074_v19, 0  ;;  %v346_v27 = vsel %vm152_vm1, %v6075_v20, 0  ;;  %v704_v33 = vld [vmem:[%s8766_s1 + $0xcc] sm:$0xf]  ;;  %v6433_v34 = vld [vmem:[%s8767_s0 + $0x10] sm:$0xff]   ;;  %v6458_v43 = vld [vmem:[%s8767_s0 + $0x18] sm:$0xff]  }
   0xa   :  { %5594 = vmatpush3.bf16.msra.mxu0 %v4911_v8  ;;  %5618 = vmatpush3.bf16.msra.mxu1 %v4923_v12  ;;  %v513_v36 = vld [vmem:[%s8766_s1 + $0x108] sm:$0xf]  ;;  %v4947_v38 = vcombine.low %v703_v32, %v704_v33  ;;  %v705_v39 = vld [vmem:[%s8766_s1 + $0x10c] sm:$0xf]  ;;  %v6463_v44 = vld [vmem:[%s8767_s0 + $0x20] sm:$0xff]  }
   0xb   :  { %5595 = vmatprep.subr.bf16.mxu0 %v4912_v17  ;;  %5619 = vmatprep.subr.bf16.mxu1 %v4924_v18  ;;  %v514_v37 = vld [vmem:[%s8766_s1 + $0x148] sm:$0xf]  ;;  %v706_v40 = vld [vmem:[%s8766_s1 + $0x14c] sm:$0xf]  ;;  %v893_v47 = vld [vmem:[%s8766_s1 + $0x10] sm:$0xf] }
   0xc   :  { %v4936_v41 = vcombine.low %v513_v36, %v514_v37  ;;  %v4948_v42 = vcombine.low %v705_v39, %v706_v40  ;;  %v6084_v45 = vld [vmem:[%s8766_s1 + $0x188] ss:$0 sps:$4 sm:$0x77]   ;;  %v6085_v46 = vld [vmem:[%s8766_s1 + $0x18c] ss:$0 sps:$4 sm:$0x77]  }
   0xd   :  { %v894_v48 = vld [vmem:[%s8766_s1 + $0x50] sm:$0xf]  ;;  %v1085_v49 = vld [vmem:[%s8766_s1 + $0x14] sm:$0xf]  ;;  %v538_v51 = vsel %vm152_vm1, %v6084_v45, 0  ;;  %v6496_v53 = vld [vmem:[%s8767_s0 + $0x28] sm:$0xff]  }
   0xe   :  { %5596 = vmatpush3.bf16.msra.mxu0 %v4912_v17  ;;  %5620 = vmatpush3.bf16.msra.mxu1 %v4924_v18  ;;  %v1086_v50 = vld [vmem:[%s8766_s1 + $0x54] sm:$0xf]  ;;  %v4958_v52 = vcombine.low %v893_v47, %v894_v48  ;;  %v730_v54 = vsel %vm152_vm1, %v6085_v46, 0  ;;  %v6516_v57 = vld [vmem:[%s8767_s0 + $0x38] sm:$0xff]   ;;  %v895_v58 = vld [vmem:[%s8766_s1 + $0x90] sm:$0xf] }
   0xf   :  { %6055 = vmatprep.subr.msk.bf16.mxu0 %vm152_vm1, %v6074_v19  ;;  %6056 = vmatprep.subr.msk.bf16.mxu1 %vm152_vm1, %v6075_v20  ;;  %v4970_v55 = vcombine.low %v1085_v49, %v1086_v50  ;;  %v6503_v56 = vld [vmem:[%s8767_s0 + $0x30] sm:$0xff]   ;;  %v1277_v8 = vld [vmem:[%s8766_s1 + $0x18] sm:$0xf]  ;;  %v1469_v10 = vld [vmem:[%s8766_s1 + $0x1c] sm:$0xf] }
  0x10   :  { %v896_v59 = vld [vmem:[%s8766_s1 + $0xd0] sm:$0xf]  ;;  %v1087_v60 = vld [vmem:[%s8766_s1 + $0x94] sm:$0xf]  ;;  %v1278_v9 = vld [vmem:[%s8766_s1 + $0x58] sm:$0xf] }
  0x11   :  { %v1088_v61 = vld [vmem:[%s8766_s1 + $0xd4] sm:$0xf]  ;;  %v4959_v62 = vcombine.low %v895_v58, %v896_v59  ;;  %v897_v63 = vld [vmem:[%s8766_s1 + $0x110] sm:$0xf]  ;;  %v1470_v11 = vld [vmem:[%s8766_s1 + $0x5c] sm:$0xf]  ;;  %v4982_v13 = vcombine.low %v1277_v8, %v1278_v9 }
  0x12   :  { %5598 = vmatpush3.bf16.msra.mxu0 %v154_v25  ;;  %5622 = vmatpush3.bf16.msra.mxu1 %v346_v27  ;;  %v898_v0 = vld [vmem:[%s8766_s1 + $0x150] sm:$0xf]  ;;  %v4971_v1 = vcombine.low %v1087_v60, %v1088_v61  ;;  %v1089_v2 = vld [vmem:[%s8766_s1 + $0x114] sm:$0xf]  ;;  %v4994_v15 = vcombine.low %v1469_v10, %v1470_v11  ;;  %v1279_v17 = vld [vmem:[%s8766_s1 + $0x98] sm:$0xf] }
  0x13   :  { %5639 = vmatprep.subr.bf16.mxu0 %v4934_v26  ;;  %5663 = vmatprep.subr.bf16.mxu1 %v4946_v29  ;;  %v1090_v3 = vld [vmem:[%s8766_s1 + $0x154] sm:$0xf]  ;;  %v4960_v4 = vcombine.low %v897_v63, %v898_v0  ;;  %v6086_v6 = vld [vmem:[%s8766_s1 + $0x190] ss:$0 sps:$4 sm:$0x77]  }
  0x14   :  { %v4972_v5 = vcombine.low %v1089_v2, %v1090_v3  ;;  %v6087_v7 = vld [vmem:[%s8766_s1 + $0x194] ss:$0 sps:$4 sm:$0x77]   ;;  %v922_v12 = vsel %vm152_vm1, %v6086_v6, 0  ;;  %v1280_v18 = vld [vmem:[%s8766_s1 + $0xd8] sm:$0xf] }
  0x15   :  { %5600 = vmatmul.mubr.msk.bf16.vlgmr.msra.gmra.mrb[0].mxu0 %vm127_vm0, %v6416_v28  ;;  %5624 = vmatmul.mubr.msk.bf16.vlgmr.msra.gmra.mrb[0].mxu1 %vm127_vm0, %v6416_v28  ;;  %v1114_v14 = vsel %vm152_vm1, %v6087_v7, 0  ;;  %v1471_v19 = vld [vmem:[%s8766_s1 + $0x9c] sm:$0xf]  ;;  %v4983_v21 = vcombine.low %v1279_v17, %v1280_v18  ;;  %v1281_v22 = vld [vmem:[%s8766_s1 + $0x118] sm:$0xf] }
  0x16   :  { %5640 = vmatpush3.bf16.msra.mxu0 %v4934_v26  ;;  %5664 = vmatpush3.bf16.msra.mxu1 %v4946_v29  ;;  %v1472_v20 = vld [vmem:[%s8766_s1 + $0xdc] sm:$0xf]  ;;  %v1282_v23 = vld [vmem:[%s8766_s1 + $0x158] sm:$0xf]  ;;  %v1661_v32 = vld [vmem:[%s8766_s1 + $0x20] sm:$0xf] }
  0x17   :  { %5603 = vmatprep.mubr.msk.bf16.mxu0 %vm127_vm0, %v6433_v34  ;;  %5627 = vmatprep.mubr.msk.bf16.mxu1 %vm127_vm0, %v6433_v34  ;;  %v4995_v24 = vcombine.low %v1471_v19, %v1472_v20  ;;  %v1473_v25 = vld [vmem:[%s8766_s1 + $0x11c] sm:$0xf]  ;;  %v4984_v27 = vcombine.low %v1281_v22, %v1282_v23  ;;  %v6088_v30 = vld [vmem:[%s8766_s1 + $0x198] ss:$0 sps:$4 sm:$0x77]  }
  0x18   :  { %5641 = vmatprep.subr.bf16.mxu0 %v4935_v35  ;;  %5665 = vmatprep.subr.bf16.mxu1 %v4947_v38  ;;  %v1474_v26 = vld [vmem:[%s8766_s1 + $0x15c] sm:$0xf]  ;;  %v1662_v33 = vld [vmem:[%s8766_s1 + $0x60] sm:$0xf]  ;;  %v1854_v36 = vld [vmem:[%s8766_s1 + $0x64] sm:$0xf] }
  0x19   :  { %v4996_v29 = vcombine.low %v1473_v25, %v1474_v26  ;;  %v6089_v31 = vld [vmem:[%s8766_s1 + $0x19c] ss:$0 sps:$4 sm:$0x77]   ;;  %v1306_v37 = vsel %vm152_vm1, %v6088_v30, 0  ;;  %v1665_v48 = vld [vmem:[%s8766_s1 + $0x120] sm:$0xf] }
  0x1a   :  { %5642 = vmatpush3.bf16.msra.mxu0 %v4935_v35  ;;  %5666 = vmatpush3.bf16.msra.mxu1 %v4947_v38  ;;  %v1853_v35 = vld [vmem:[%s8766_s1 + $0x24] sm:$0xf]  ;;  %v5006_v38 = vcombine.low %v1661_v32, %v1662_v33  ;;  %v1498_v39 = vsel %vm152_vm1, %v6089_v31, 0  ;;  %v1666_v49 = vld [vmem:[%s8766_s1 + $0x160] sm:$0xf] }
  0x1b   :  { %5643 = vmatprep.subr.bf16.mxu0 %v4936_v41  ;;  %5667 = vmatprep.subr.bf16.mxu1 %v4948_v42  ;;  %v5018_v40 = vcombine.low %v1853_v35, %v1854_v36  ;;  %v6090_v58 = vld [vmem:[%s8766_s1 + $0x1a0] ss:$0 sps:$4 sm:$0x77]   ;;  %v6091_v59 = vld [vmem:[%s8766_s1 + $0x1a4] ss:$0 sps:$4 sm:$0x77]  }
  0x1c   :  { %v2045_v60 = vld [vmem:[%s8766_s1 + $0x28] sm:$0xf]  ;;  %v2238_v63 = vld [vmem:[%s8766_s1 + $0x6c] sm:$0xf]  ;;  %v1690_v0 = vsel %vm152_vm1, %v6090_v58, 0  ;;  %v1882_v2 = vsel %vm152_vm1, %v6091_v59, 0 }
  0x1d   :  { %5604 = vmatmul.mubr.msk.bf16.gmra.mrb[4].mxu0 %vm127_vm0, %v6458_v43  ;;  %5628 = vmatmul.mubr.msk.bf16.gmra.mrb[4].mxu1 %vm127_vm0, %v6458_v43  ;;  %v2046_v61 = vld [vmem:[%s8766_s1 + $0x68] sm:$0xf]  ;;  %v6093_v18 = vld [vmem:[%s8766_s1 + $0x1ac] ss:$0 sps:$4 sm:$0x77]  }
  0x1e   :  { %5607 = vmatprep.mubr.msk.bf16.mxu0 %vm127_vm0, %v6463_v44  ;;  %5631 = vmatprep.mubr.msk.bf16.mxu1 %vm127_vm0, %v6463_v44  ;;  %v2049_v9 = vld [vmem:[%s8766_s1 + $0x128] sm:$0xf]  ;;  %v2429_v19 = vld [vmem:[%s8766_s1 + $0x30] sm:$0xf]  ;;  %v2622_v22 = vld [vmem:[%s8766_s1 + $0x74] sm:$0xf] }
  0x1f   :  { %5644 = vmatpush3.bf16.msra.mxu0 %v4936_v41  ;;  %5668 = vmatpush3.bf16.msra.mxu1 %v4948_v42  ;;  %v1663_v41 = vld [vmem:[%s8766_s1 + $0xa0] sm:$0xf]  ;;  %v2050_v10 = vld [vmem:[%s8766_s1 + $0x168] sm:$0xf]  ;;  %v2430_v20 = vld [vmem:[%s8766_s1 + $0x70] sm:$0xf] }
  0x20   :  { %6057 = vmatprep.subr.msk.bf16.mxu0 %vm152_vm1, %v6084_v45  ;;  %6058 = vmatprep.subr.msk.bf16.mxu1 %vm152_vm1, %v6085_v46  ;;  %v1664_v42 = vld [vmem:[%s8766_s1 + $0xe0] sm:$0xf]  ;;  %v1855_v45 = vld [vmem:[%s8766_s1 + $0xa4] sm:$0xf]  ;;  %v2266_v25 = vsel %vm152_vm1, %v6093_v18, 0 }
  0x21   :  { %v1856_v46 = vld [vmem:[%s8766_s1 + $0xe4] sm:$0xf]  ;;  %v5007_v47 = vcombine.low %v1663_v41, %v1664_v42  ;;  %v6092_v17 = vld [vmem:[%s8766_s1 + $0x1a8] ss:$0 sps:$4 sm:$0x77]  }
  0x22   :  { %v5019_v50 = vcombine.low %v1855_v45, %v1856_v46  ;;  %v2074_v23 = vsel %vm152_vm1, %v6092_v17, 0  ;;  %v2433_v33 = vld [vmem:[%s8766_s1 + $0x130] sm:$0xf]  ;;  %v6095_v42 = vld [vmem:[%s8766_s1 + $0x1b4] ss:$0 sps:$4 sm:$0x77]  }
  0x23   :  { %5646 = vmatpush3.bf16.msra.mxu0 %v538_v51  ;;  %5670 = vmatpush3.bf16.msra.mxu1 %v730_v54  ;;  %v1857_v51 = vld [vmem:[%s8766_s1 + $0x124] sm:$0xf]  ;;  %v5008_v54 = vcombine.low %v1665_v48, %v1666_v49  ;;  %v2434_v35 = vld [vmem:[%s8766_s1 + $0x170] sm:$0xf]  ;;  %v2813_v45 = vld [vmem:[%s8766_s1 + $0x38] sm:$0xf] }
  0x24   :  { %5687 = vmatprep.subr.bf16.mxu0 %v4958_v52  ;;  %5711 = vmatprep.subr.bf16.mxu1 %v4970_v55  ;;  %v6094_v41 = vld [vmem:[%s8766_s1 + $0x1b0] ss:$0 sps:$4 sm:$0x77]   ;;  %v2814_v46 = vld [vmem:[%s8766_s1 + $0x78] sm:$0xf] }
  0x25   :  { %5608 = vmatmul.mubr.msk.bf16.gmra.mrb[8].mxu0 %vm127_vm0, %v6496_v53  ;;  %5632 = vmatmul.mubr.msk.bf16.gmra.mrb[8].mxu1 %vm127_vm0, %v6496_v53  ;;  %v3006_v48 = vld [vmem:[%s8766_s1 + $0x7c] sm:$0xf]  ;;  %v2458_v49 = vsel %vm152_vm1, %v6094_v41, 0 }
  0x26   :  { %5611 = vmatprep.mubr.msk.bf16.mxu0 %vm127_vm0, %v6503_v56  ;;  %5635 = vmatprep.mubr.msk.bf16.mxu1 %vm127_vm0, %v6503_v56 }
  0x2d   :  { %5612 = vmatmul.mubr.msk.bf16.gmra.mrb[12].mxu0 %vm127_vm0, %v6516_v57  ;;  %5636 = vmatmul.mubr.msk.bf16.gmra.mrb[12].mxu1 %vm127_vm0, %v6516_v57 }
  0x2e   :  { %5647 = vmatprep.mubr.msk.bf16.mxu0 %vm127_vm0, %v6385_v16  ;;  %5671 = vmatprep.mubr.msk.bf16.mxu1 %vm127_vm0, %v6385_v16 }
  0x35   :  { %5648 = vmatmul.mubr.msk.bf16.vlgmr.msra.gmra.mrb[16].mxu0 %vm127_vm0, %v6416_v28  ;;  %5672 = vmatmul.mubr.msk.bf16.vlgmr.msra.gmra.mrb[16].mxu1 %vm127_vm0, %v6416_v28 }
  0x36   :  { %5688 = vmatpush3.bf16.msra.mxu0 %v4958_v52  ;;  %5712 = vmatpush3.bf16.msra.mxu1 %v4970_v55  ;;  %v1858_v52 = vld [vmem:[%s8766_s1 + $0x164] sm:$0xf] }
  0x37   :  { %5651 = vmatprep.mubr.msk.bf16.mxu0 %vm127_vm0, %v6433_v34  ;;  %5675 = vmatprep.mubr.msk.bf16.mxu1 %vm127_vm0, %v6433_v34  ;;  %v5020_v55 = vcombine.low %v1857_v51, %v1858_v52  ;;  %v2650_v51 = vsel %vm152_vm1, %v6095_v42, 0 }
  0x38   :  { %5689 = vmatprep.subr.bf16.mxu0 %v4959_v62  ;;  %5713 = vmatprep.subr.bf16.mxu1 %v4971_v1 }
  0x3a   :  { %5690 = vmatpush3.bf16.msra.mxu0 %v4959_v62  ;;  %5714 = vmatpush3.bf16.msra.mxu1 %v4971_v1  ;;  %v2237_v62 = vld [vmem:[%s8766_s1 + $0x2c] sm:$0xf]  ;;  %v5030_v1 = vcombine.low %v2045_v60, %v2046_v61  ;;  %v2817_v61 = vld [vmem:[%s8766_s1 + $0x138] sm:$0xf] }
  0x3b   :  { %5691 = vmatprep.subr.bf16.mxu0 %v4960_v4  ;;  %5715 = vmatprep.subr.bf16.mxu1 %v4972_v5  ;;  %v5042_v3 = vcombine.low %v2237_v62, %v2238_v63  ;;  %v2818_v62 = vld [vmem:[%s8766_s1 + $0x178] sm:$0xf] }
  0x3d   :  { %5652 = vmatmul.mubr.msk.bf16.gmra.mrb[20].mxu0 %vm127_vm0, %v6458_v43  ;;  %5676 = vmatmul.mubr.msk.bf16.gmra.mrb[20].mxu1 %vm127_vm0, %v6458_v43 }
  0x3e   :  { %5655 = vmatprep.mubr.msk.bf16.mxu0 %vm127_vm0, %v6463_v44  ;;  %5679 = vmatprep.mubr.msk.bf16.mxu1 %vm127_vm0, %v6463_v44 }
  0x3f   :  { %5692 = vmatpush3.bf16.msra.mxu0 %v4960_v4  ;;  %5716 = vmatpush3.bf16.msra.mxu1 %v4972_v5  ;;  %v2047_v4 = vld [vmem:[%s8766_s1 + $0xa8] sm:$0xf] }
  0x40   :  { %6059 = vmatprep.subr.msk.bf16.mxu0 %vm152_vm1, %v6086_v6  ;;  %6060 = vmatprep.subr.msk.bf16.mxu1 %vm152_vm1, %v6087_v7  ;;  %v2048_v5 = vld [vmem:[%s8766_s1 + $0xe8] sm:$0xf]  ;;  %v2239_v6 = vld [vmem:[%s8766_s1 + $0xac] sm:$0xf] }
  0x41   :  { %v2240_v7 = vld [vmem:[%s8766_s1 + $0xec] sm:$0xf]  ;;  %v5031_v8 = vcombine.low %v2047_v4, %v2048_v5  ;;  %v6096_v4 = vld [vmem:[%s8766_s1 + $0x1b8] ss:$0 sps:$4 sm:$0x77]  }
  0x42   :  { %v5043_v11 = vcombine.low %v2239_v6, %v2240_v7  ;;  %v6097_v5 = vld [vmem:[%s8766_s1 + $0x1bc] ss:$0 sps:$4 sm:$0x77]   ;;  %v2842_v6 = vsel %vm152_vm1, %v6096_v4, 0 }
  0x43   :  { %5694 = vmatpush3.bf16.msra.mxu0 %v922_v12  ;;  %5718 = vmatpush3.bf16.msra.mxu1 %v1114_v14  ;;  %v2241_v12 = vld [vmem:[%s8766_s1 + $0x12c] sm:$0xf]  ;;  %v5032_v14 = vcombine.low %v2049_v9, %v2050_v10  ;;  %v3034_v7 = vsel %vm152_vm1, %v6097_v5, 0 }
  0x44   :  { %5735 = vmatprep.subr.bf16.mxu0 %v4982_v13  ;;  %5759 = vmatprep.subr.bf16.mxu1 %v4994_v15 }
  0x45   :  { %5656 = vmatmul.mubr.msk.bf16.gmra.mrb[24].mxu0 %vm127_vm0, %v6496_v53  ;;  %5680 = vmatmul.mubr.msk.bf16.gmra.mrb[24].mxu1 %vm127_vm0, %v6496_v53 }
  0x46   :  { %5659 = vmatprep.mubr.msk.bf16.mxu0 %vm127_vm0, %v6503_v56  ;;  %5683 = vmatprep.mubr.msk.bf16.mxu1 %vm127_vm0, %v6503_v56 }
  0x4d   :  { %5660 = vmatmul.mubr.msk.bf16.gmra.mrb[28].mxu0 %vm127_vm0, %v6516_v57  ;;  %5684 = vmatmul.mubr.msk.bf16.gmra.mrb[28].mxu1 %vm127_vm0, %v6516_v57 }
  0x4e   :  { %5695 = vmatprep.mubr.msk.bf16.mxu0 %vm127_vm0, %v6385_v16  ;;  %5719 = vmatprep.mubr.msk.bf16.mxu1 %vm127_vm0, %v6385_v16 }
  0x55   :  { %5696 = vmatmul.mubr.msk.bf16.vlgmr.msra.gmra.mrb[32].mxu0 %vm127_vm0, %v6416_v28  ;;  %5720 = vmatmul.mubr.msk.bf16.vlgmr.msra.gmra.mrb[32].mxu1 %vm127_vm0, %v6416_v28 }
  0x56   :  { %5736 = vmatpush3.bf16.msra.mxu0 %v4982_v13  ;;  %5760 = vmatpush3.bf16.msra.mxu1 %v4994_v15  ;;  %v2242_v13 = vld [vmem:[%s8766_s1 + $0x16c] sm:$0xf] }
  0x57   :  { %5699 = vmatprep.mubr.msk.bf16.mxu0 %vm127_vm0, %v6433_v34  ;;  %5723 = vmatprep.mubr.msk.bf16.mxu1 %vm127_vm0, %v6433_v34  ;;  %v5044_v15 = vcombine.low %v2241_v12, %v2242_v13 }
  0x58   :  { %5737 = vmatprep.subr.bf16.mxu0 %v4983_v21  ;;  %5761 = vmatprep.subr.bf16.mxu1 %v4995_v24 }
  0x5a   :  { %5738 = vmatpush3.bf16.msra.mxu0 %v4983_v21  ;;  %5762 = vmatpush3.bf16.msra.mxu1 %v4995_v24  ;;  %v2621_v21 = vld [vmem:[%s8766_s1 + $0x34] sm:$0xf]  ;;  %v5054_v24 = vcombine.low %v2429_v19, %v2430_v20 }
  0x5b   :  { %5739 = vmatprep.subr.bf16.mxu0 %v4984_v27  ;;  %5763 = vmatprep.subr.bf16.mxu1 %v4996_v29  ;;  %v5066_v26 = vcombine.low %v2621_v21, %v2622_v22 }
  0x5d   :  { %5700 = vmatmul.mubr.msk.bf16.gmra.mrb[36].mxu0 %vm127_vm0, %v6458_v43  ;;  %5724 = vmatmul.mubr.msk.bf16.gmra.mrb[36].mxu1 %vm127_vm0, %v6458_v43 }
  0x5e   :  { %5703 = vmatprep.mubr.msk.bf16.mxu0 %vm127_vm0, %v6463_v44  ;;  %5727 = vmatprep.mubr.msk.bf16.mxu1 %vm127_vm0, %v6463_v44 }
  0x5f   :  { %5740 = vmatpush3.bf16.msra.mxu0 %v4984_v27  ;;  %5764 = vmatpush3.bf16.msra.mxu1 %v4996_v29  ;;  %v2431_v27 = vld [vmem:[%s8766_s1 + $0xb0] sm:$0xf] }
  0x60   :  { %6061 = vmatprep.subr.msk.bf16.mxu0 %vm152_vm1, %v6088_v30  ;;  %6062 = vmatprep.subr.msk.bf16.mxu1 %vm152_vm1, %v6089_v31  ;;  %v2432_v29 = vld [vmem:[%s8766_s1 + $0xf0] sm:$0xf]  ;;  %v2623_v30 = vld [vmem:[%s8766_s1 + $0xb4] sm:$0xf] }
  0x61   :  { %v2624_v31 = vld [vmem:[%s8766_s1 + $0xf4] sm:$0xf]  ;;  %v5055_v32 = vcombine.low %v2431_v27, %v2432_v29 }
  0x62   :  { %v5067_v36 = vcombine.low %v2623_v30, %v2624_v31 }
  0x63   :  { %5742 = vmatpush3.bf16.msra.mxu0 %v1306_v37  ;;  %5766 = vmatpush3.bf16.msra.mxu1 %v1498_v39  ;;  %v2625_v37 = vld [vmem:[%s8766_s1 + $0x134] sm:$0xf]  ;;  %v5056_v39 = vcombine.low %v2433_v33, %v2434_v35 }
  0x64   :  { %5783 = vmatprep.subr.bf16.mxu0 %v5006_v38  ;;  %5807 = vmatprep.subr.bf16.mxu1 %v5018_v40 }
  0x65   :  { %5704 = vmatmul.mubr.msk.bf16.gmra.mrb[40].mxu0 %vm127_vm0, %v6496_v53  ;;  %5728 = vmatmul.mubr.msk.bf16.gmra.mrb[40].mxu1 %vm127_vm0, %v6496_v53 }
  0x66   :  { %5707 = vmatprep.mubr.msk.bf16.mxu0 %vm127_vm0, %v6503_v56  ;;  %5731 = vmatprep.mubr.msk.bf16.mxu1 %vm127_vm0, %v6503_v56 }
  0x6d   :  { %5708 = vmatmul.mubr.msk.bf16.gmra.mrb[44].mxu0 %vm127_vm0, %v6516_v57  ;;  %5732 = vmatmul.mubr.msk.bf16.gmra.mrb[44].mxu1 %vm127_vm0, %v6516_v57 }
  0x6e   :  { %5743 = vmatprep.mubr.msk.bf16.mxu0 %vm127_vm0, %v6385_v16  ;;  %5767 = vmatprep.mubr.msk.bf16.mxu1 %vm127_vm0, %v6385_v16 }
  0x75   :  { %5744 = vmatmul.mubr.msk.bf16.vlgmr.msra.gmra.mrb[48].mxu0 %vm127_vm0, %v6416_v28  ;;  %5768 = vmatmul.mubr.msk.bf16.vlgmr.msra.gmra.mrb[48].mxu1 %vm127_vm0, %v6416_v28 }
  0x76   :  { %5784 = vmatpush3.bf16.msra.mxu0 %v5006_v38  ;;  %5808 = vmatpush3.bf16.msra.mxu1 %v5018_v40  ;;  %v2626_v38 = vld [vmem:[%s8766_s1 + $0x174] sm:$0xf] }
  0x77   :  { %5747 = vmatprep.mubr.msk.bf16.mxu0 %vm127_vm0, %v6433_v34  ;;  %5771 = vmatprep.mubr.msk.bf16.mxu1 %vm127_vm0, %v6433_v34  ;;  %v5068_v40 = vcombine.low %v2625_v37, %v2626_v38 }
  0x78   :  { %5785 = vmatprep.subr.bf16.mxu0 %v5007_v47  ;;  %5809 = vmatprep.subr.bf16.mxu1 %v5019_v50 }
  0x7a   :  { %5786 = vmatpush3.bf16.msra.mxu0 %v5007_v47  ;;  %5810 = vmatpush3.bf16.msra.mxu1 %v5019_v50  ;;  %v3005_v47 = vld [vmem:[%s8766_s1 + $0x3c] sm:$0xf]  ;;  %v5078_v50 = vcombine.low %v2813_v45, %v2814_v46 }
  0x7b   :  { %5787 = vmatprep.subr.bf16.mxu0 %v5008_v54  ;;  %5811 = vmatprep.subr.bf16.mxu1 %v5020_v55  ;;  %v5090_v52 = vcombine.low %v3005_v47, %v3006_v48 }
  0x7d   :  { %5748 = vmatmul.mubr.msk.bf16.gmra.mrb[52].mxu0 %vm127_vm0, %v6458_v43  ;;  %5772 = vmatmul.mubr.msk.bf16.gmra.mrb[52].mxu1 %vm127_vm0, %v6458_v43 }
  0x7e   :  { %5751 = vmatprep.mubr.msk.bf16.mxu0 %vm127_vm0, %v6463_v44  ;;  %5775 = vmatprep.mubr.msk.bf16.mxu1 %vm127_vm0, %v6463_v44 }
  0x7f   :  { %5788 = vmatpush3.bf16.msra.mxu0 %v5008_v54  ;;  %5812 = vmatpush3.bf16.msra.mxu1 %v5020_v55  ;;  %v2815_v54 = vld [vmem:[%s8766_s1 + $0xb8] sm:$0xf] }
  0x80   :  { %6063 = vmatprep.subr.msk.bf16.mxu0 %vm152_vm1, %v6090_v58  ;;  %6064 = vmatprep.subr.msk.bf16.mxu1 %vm152_vm1, %v6091_v59  ;;  %v2816_v55 = vld [vmem:[%s8766_s1 + $0xf8] sm:$0xf]  ;;  %v3007_v58 = vld [vmem:[%s8766_s1 + $0xbc] sm:$0xf] }
  0x81   :  { %v3008_v59 = vld [vmem:[%s8766_s1 + $0xfc] sm:$0xf]  ;;  %v5079_v60 = vcombine.low %v2815_v54, %v2816_v55 }
  0x82   :  { %v5091_v63 = vcombine.low %v3007_v58, %v3008_v59 }
  0x83   :  { %5790 = vmatpush3.bf16.msra.mxu0 %v1690_v0  ;;  %5814 = vmatpush3.bf16.msra.mxu1 %v1882_v2  ;;  %v3009_v0 = vld [vmem:[%s8766_s1 + $0x13c] sm:$0xf]  ;;  %v5080_v2 = vcombine.low %v2817_v61, %v2818_v62 }
  0x84   :  { %5831 = vmatprep.subr.bf16.mxu0 %v5030_v1  ;;  %5855 = vmatprep.subr.bf16.mxu1 %v5042_v3 }
  0x85   :  { %5752 = vmatmul.mubr.msk.bf16.gmra.mrb[56].mxu0 %vm127_vm0, %v6496_v53  ;;  %5776 = vmatmul.mubr.msk.bf16.gmra.mrb[56].mxu1 %vm127_vm0, %v6496_v53 }
  0x86   :  { %5755 = vmatprep.mubr.msk.bf16.mxu0 %vm127_vm0, %v6503_v56  ;;  %5779 = vmatprep.mubr.msk.bf16.mxu1 %vm127_vm0, %v6503_v56 }
  0x8d   :  { %5756 = vmatmul.mubr.msk.bf16.gmra.mrb[60].mxu0 %vm127_vm0, %v6516_v57  ;;  %5780 = vmatmul.mubr.msk.bf16.gmra.mrb[60].mxu1 %vm127_vm0, %v6516_v57 }
  0x8e   :  { %5791 = vmatprep.mubr.msk.bf16.mxu0 %vm127_vm0, %v6385_v16  ;;  %5815 = vmatprep.mubr.msk.bf16.mxu1 %vm127_vm0, %v6385_v16 }
  0x95   :  { %5792 = vmatmul.mubr.msk.bf16.vlgmr.msra.gmra.mrb[64].mxu0 %vm127_vm0, %v6416_v28  ;;  %5816 = vmatmul.mubr.msk.bf16.vlgmr.msra.gmra.mrb[64].mxu1 %vm127_vm0, %v6416_v28 }
  0x96   :  { %5832 = vmatpush3.bf16.msra.mxu0 %v5030_v1  ;;  %5856 = vmatpush3.bf16.msra.mxu1 %v5042_v3  ;;  %v3010_v1 = vld [vmem:[%s8766_s1 + $0x17c] sm:$0xf] }
  0x97   :  { %5795 = vmatprep.mubr.msk.bf16.mxu0 %vm127_vm0, %v6433_v34  ;;  %5819 = vmatprep.mubr.msk.bf16.mxu1 %vm127_vm0, %v6433_v34  ;;  %v5092_v3 = vcombine.low %v3009_v0, %v3010_v1 }
  0x98   :  { %5833 = vmatprep.subr.bf16.mxu0 %v5031_v8  ;;  %5857 = vmatprep.subr.bf16.mxu1 %v5043_v11 }
  0x9a   :  { %5834 = vmatpush3.bf16.msra.mxu0 %v5031_v8  ;;  %5858 = vmatpush3.bf16.msra.mxu1 %v5043_v11  ;;  %v6973_v8 = vld [vmem:[%s8768_s2] ss:$0 sm:$0xff] }
  0x9b   :  { %5835 = vmatprep.subr.bf16.mxu0 %v5032_v14  ;;  %5859 = vmatprep.subr.bf16.mxu1 %v5044_v15 }
  0x9d   :  { %5796 = vmatmul.mubr.msk.bf16.gmra.mrb[68].mxu0 %vm127_vm0, %v6458_v43  ;;  %5820 = vmatmul.mubr.msk.bf16.gmra.mrb[68].mxu1 %vm127_vm0, %v6458_v43 }
  0x9e   :  { %5799 = vmatprep.mubr.msk.bf16.mxu0 %vm127_vm0, %v6463_v44  ;;  %5823 = vmatprep.mubr.msk.bf16.mxu1 %vm127_vm0, %v6463_v44 }
  0x9f   :  { %5836 = vmatpush3.bf16.msra.mxu0 %v5032_v14  ;;  %5860 = vmatpush3.bf16.msra.mxu1 %v5044_v15 }
  0xa0   :  { %6065 = vmatprep.subr.msk.bf16.mxu0 %vm152_vm1, %v6092_v17  ;;  %6066 = vmatprep.subr.msk.bf16.mxu1 %vm152_vm1, %v6093_v18 }
  0xa3   :  { %5838 = vmatpush3.bf16.msra.mxu0 %v2074_v23  ;;  %5862 = vmatpush3.bf16.msra.mxu1 %v2266_v25 }
  0xa4   :  { %5879 = vmatprep.subr.bf16.mxu0 %v5054_v24  ;;  %5903 = vmatprep.subr.bf16.mxu1 %v5066_v26 }
  0xa5   :  { %5800 = vmatmul.mubr.msk.bf16.gmra.mrb[72].mxu0 %vm127_vm0, %v6496_v53  ;;  %5824 = vmatmul.mubr.msk.bf16.gmra.mrb[72].mxu1 %vm127_vm0, %v6496_v53 }
  0xa6   :  { %5803 = vmatprep.mubr.msk.bf16.mxu0 %vm127_vm0, %v6503_v56  ;;  %5827 = vmatprep.mubr.msk.bf16.mxu1 %vm127_vm0, %v6503_v56 }
  0xad   :  { %5804 = vmatmul.mubr.msk.bf16.gmra.mrb[76].mxu0 %vm127_vm0, %v6516_v57  ;;  %5828 = vmatmul.mubr.msk.bf16.gmra.mrb[76].mxu1 %vm127_vm0, %v6516_v57 }
  0xae   :  { %5839 = vmatprep.mubr.msk.bf16.mxu0 %vm127_vm0, %v6385_v16  ;;  %5863 = vmatprep.mubr.msk.bf16.mxu1 %vm127_vm0, %v6385_v16 }
  0xb5   :  { %5840 = vmatmul.mubr.msk.bf16.vlgmr.msra.gmra.mrb[80].mxu0 %vm127_vm0, %v6416_v28  ;;  %5864 = vmatmul.mubr.msk.bf16.vlgmr.msra.gmra.mrb[80].mxu1 %vm127_vm0, %v6416_v28 }
  0xb6   :  { %5880 = vmatpush3.bf16.msra.mxu0 %v5054_v24  ;;  %5904 = vmatpush3.bf16.msra.mxu1 %v5066_v26 }
  0xb7   :  { %5843 = vmatprep.mubr.msk.bf16.mxu0 %vm127_vm0, %v6433_v34  ;;  %5867 = vmatprep.mubr.msk.bf16.mxu1 %vm127_vm0, %v6433_v34 }
  0xb8   :  { %5881 = vmatprep.subr.bf16.mxu0 %v5055_v32  ;;  %5905 = vmatprep.subr.bf16.mxu1 %v5067_v36 }
  0xba   :  { %5882 = vmatpush3.bf16.msra.mxu0 %v5055_v32  ;;  %5906 = vmatpush3.bf16.msra.mxu1 %v5067_v36 }
  0xbb   :  { %5883 = vmatprep.subr.bf16.mxu0 %v5056_v39  ;;  %5907 = vmatprep.subr.bf16.mxu1 %v5068_v40 }
  0xbd   :  { %5844 = vmatmul.mubr.msk.bf16.gmra.mrb[84].mxu0 %vm127_vm0, %v6458_v43  ;;  %5868 = vmatmul.mubr.msk.bf16.gmra.mrb[84].mxu1 %vm127_vm0, %v6458_v43 }
  0xbe   :  { %5847 = vmatprep.mubr.msk.bf16.mxu0 %vm127_vm0, %v6463_v44  ;;  %5871 = vmatprep.mubr.msk.bf16.mxu1 %vm127_vm0, %v6463_v44 }
  0xbf   :  { %5884 = vmatpush3.bf16.msra.mxu0 %v5056_v39  ;;  %5908 = vmatpush3.bf16.msra.mxu1 %v5068_v40 }
  0xc0   :  { %6067 = vmatprep.subr.msk.bf16.mxu0 %vm152_vm1, %v6094_v41  ;;  %6068 = vmatprep.subr.msk.bf16.mxu1 %vm152_vm1, %v6095_v42 }
  0xc3   :  { %5886 = vmatpush3.bf16.msra.mxu0 %v2458_v49  ;;  %5910 = vmatpush3.bf16.msra.mxu1 %v2650_v51 }
  0xc4   :  { %5927 = vmatprep.subr.bf16.mxu0 %v5078_v50  ;;  %5951 = vmatprep.subr.bf16.mxu1 %v5090_v52 }
  0xc5   :  { %5848 = vmatmul.mubr.msk.bf16.gmra.mrb[88].mxu0 %vm127_vm0, %v6496_v53  ;;  %5872 = vmatmul.mubr.msk.bf16.gmra.mrb[88].mxu1 %vm127_vm0, %v6496_v53 }
  0xc6   :  { %5851 = vmatprep.mubr.msk.bf16.mxu0 %vm127_vm0, %v6503_v56  ;;  %5875 = vmatprep.mubr.msk.bf16.mxu1 %vm127_vm0, %v6503_v56 }
  0xcd   :  { %5852 = vmatmul.mubr.msk.bf16.gmra.mrb[92].mxu0 %vm127_vm0, %v6516_v57  ;;  %5876 = vmatmul.mubr.msk.bf16.gmra.mrb[92].mxu1 %vm127_vm0, %v6516_v57 }
  0xce   :  { %5887 = vmatprep.mubr.msk.bf16.mxu0 %vm127_vm0, %v6385_v16  ;;  %5911 = vmatprep.mubr.msk.bf16.mxu1 %vm127_vm0, %v6385_v16 }
  0xd5   :  { %5888 = vmatmul.mubr.msk.bf16.vlgmr.msra.gmra.mrb[96].mxu0 %vm127_vm0, %v6416_v28  ;;  %5912 = vmatmul.mubr.msk.bf16.vlgmr.msra.gmra.mrb[96].mxu1 %vm127_vm0, %v6416_v28 }
  0xd6   :  { %5928 = vmatpush3.bf16.msra.mxu0 %v5078_v50  ;;  %5952 = vmatpush3.bf16.msra.mxu1 %v5090_v52 }
  0xd7   :  { %5891 = vmatprep.mubr.msk.bf16.mxu0 %vm127_vm0, %v6433_v34  ;;  %5915 = vmatprep.mubr.msk.bf16.mxu1 %vm127_vm0, %v6433_v34 }
  0xd8   :  { %5929 = vmatprep.subr.bf16.mxu0 %v5079_v60  ;;  %5953 = vmatprep.subr.bf16.mxu1 %v5091_v63 }
  0xda   :  { %5930 = vmatpush3.bf16.msra.mxu0 %v5079_v60  ;;  %5954 = vmatpush3.bf16.msra.mxu1 %v5091_v63 }
  0xdb   :  { %5931 = vmatprep.subr.bf16.mxu0 %v5080_v2  ;;  %5955 = vmatprep.subr.bf16.mxu1 %v5092_v3 }
  0xdd   :  { %5892 = vmatmul.mubr.msk.bf16.gmra.mrb[100].mxu0 %vm127_vm0, %v6458_v43  ;;  %5916 = vmatmul.mubr.msk.bf16.gmra.mrb[100].mxu1 %vm127_vm0, %v6458_v43 }
  0xde   :  { %5895 = vmatprep.mubr.msk.bf16.mxu0 %vm127_vm0, %v6463_v44  ;;  %5919 = vmatprep.mubr.msk.bf16.mxu1 %vm127_vm0, %v6463_v44 }
  0xdf   :  { %5932 = vmatpush3.bf16.msra.mxu0 %v5080_v2  ;;  %5956 = vmatpush3.bf16.msra.mxu1 %v5092_v3 }
  0xe0   :  { %6069 = vmatprep.subr.msk.bf16.mxu0 %vm152_vm1, %v6096_v4  ;;  %6070 = vmatprep.subr.msk.bf16.mxu1 %vm152_vm1, %v6097_v5 }
  0xe3   :  { %5934 = vmatpush3.bf16.msra.mxu0 %v2842_v6  ;;  %5958 = vmatpush3.bf16.msra.mxu1 %v3034_v7 }
  0xe5   :  { %5896 = vmatmul.mubr.msk.bf16.gmra.mrb[104].mxu0 %vm127_vm0, %v6496_v53  ;;  %5920 = vmatmul.mubr.msk.bf16.gmra.mrb[104].mxu1 %vm127_vm0, %v6496_v53 }
  0xe6   :  { %5899 = vmatprep.mubr.msk.bf16.mxu0 %vm127_vm0, %v6503_v56  ;;  %5923 = vmatprep.mubr.msk.bf16.mxu1 %vm127_vm0, %v6503_v56 }
  0xe8   :  { %v5601_v9 = vpop.f32.mrb[0].mxu0  ;;  %v5625_v11 = vpop.f32.mrb[0].mxu1 }
  0xe9   :  { %v199_v10 = vadd.f32 %v5601_v9, %v6973_v8  ;;  %v190_v12 = vpop.f32.mrb[1].mxu0  ;;  %v391_v13 = vadd.f32 %v5625_v11, %v6973_v8  ;;  %v382_v15 = vpop.f32.mrb[1].mxu1 }
  0xea   :  { %v191_v14 = vadd.f32 %v6973_v8, %v190_v12  ;;  %v5602_v17 = vpop.f32.mrb[2].mxu0  ;;  %v383_v19 = vadd.f32 %v6973_v8, %v382_v15  ;;  %v5626_v21 = vpop.f32.mrb[2].mxu1 }
  0xeb   :  { %vm255_vm2 = vcmp.gt.f32.partialorder %v199_v10, 0.0  ;;  %v271_v18 = vmul.f32 0.01, %v199_v10  ;;  %v202_v20 = vadd.f32 %v5602_v17, %v6973_v8  ;;  %v193_v22 = vpop.f32.mrb[3].mxu0  ;;  %vm447_vm3 = vcmp.gt.f32.partialorder %v391_v13, 0.0  ;;  %v385_v27 = vpop.f32.mrb[3].mxu1 }
  0xec   :  { %v463_v23 = vmul.f32 0.01, %v391_v13  ;;  %vm253_vm4 = vcmp.gt.f32.partialorder %v191_v14, 0.0  ;;  %v269_v24 = vmul.f32 0.01, %v191_v14  ;;  %vm445_vm5 = vcmp.gt.f32.partialorder %v383_v19, 0.0 }
  0xed   :  { %v287_v25 = vsel %vm255_vm2, %v199_v10, %v271_v18  ;;  %v461_v26 = vmul.f32 0.01, %v383_v19  ;;  %vm256_vm6 = vcmp.gt.f32.partialorder %v202_v20, 0.0  ;;  %5900 = vmatmul.mubr.msk.bf16.gmra.mrb[108].mxu0 %vm127_vm0, %v6516_v57  ;;  %v272_v31 = vmul.f32 0.01, %v202_v20  ;;  %5924 = vmatmul.mubr.msk.bf16.gmra.mrb[108].mxu1 %vm127_vm0, %v6516_v57 }
  0xee   :  { %v479_v29 = vsel %vm447_vm3, %v391_v13, %v463_v23  ;;  %v285_v30 = vsel %vm253_vm4, %v191_v14, %v269_v24  ;;  %v394_v32 = vadd.f32 %v5626_v21, %v6973_v8  ;;  %5935 = vmatprep.mubr.msk.bf16.mxu0 %vm127_vm0, %v6385_v16  ;;  %v194_v36 = vadd.f32 %v6973_v8, %v193_v22 }
  0xef   :  { %v6991_v33 = vadd.f32 %v479_v29, %v287_v25  ;;  %v477_v35 = vsel %vm445_vm5, %v383_v19, %v461_v26  ;;  %v386_v37 = vadd.f32 %v6973_v8, %v385_v27  ;;  %5959 = vmatprep.mubr.msk.bf16.mxu1 %vm127_vm0, %v6385_v16  ;;  %v288_v39 = vsel %vm256_vm6, %v202_v20, %v272_v31 }
  0xf0   :  { %v6997_v38 = vadd.f32 %v477_v35, %v285_v30  ;;  %vm448_vm7 = vcmp.gt.f32.partialorder %v394_v32, 0.0  ;;  %v464_v40 = vmul.f32 0.01, %v394_v32  ;;  %v5605_v41 = vpop.f32.mrb[4].mxu0  ;;  %vm254_vm8 = vcmp.gt.f32.partialorder %v194_v36, 0.0  ;;  %v5629_v47 = vpop.f32.mrb[4].mxu1 }
  0xf1   :  { %v270_v57 = vmul.f32 0.01, %v194_v36  ;;  %vm446_vm9 = vcmp.gt.f32.partialorder %v386_v37, 0.0  ;;  %v462_v42 = vmul.f32 0.01, %v386_v37  ;;  %v215_v46 = vadd.f32 %v5605_v41, %v6973_v8  ;;  %v206_v48 = vpop.f32.mrb[5].mxu0 }
  0xf2   :  { %v480_v45 = vsel %vm448_vm7, %v394_v32, %v464_v40  ;;  %v407_v16 = vadd.f32 %v5629_v47, %v6973_v8  ;;  %v398_v52 = vpop.f32.mrb[5].mxu1  ;;  %v5606_v54 = vpop.f32.mrb[6].mxu0  ;;  %v207_v59 = vadd.f32 %v6973_v8, %v206_v48 }
  0xf3   :  { %v7000_v49 = vadd.f32 %v480_v45, %v288_v39  ;;  %v286_v50 = vsel %vm254_vm8, %v194_v36, %v270_v57  ;;  %v478_v51 = vsel %vm446_vm9, %v386_v37, %v462_v42  ;;  %vm259_vm10 = vcmp.gt.f32.partialorder %v215_v46, 0.0  ;;  %v5630_v60 = vpop.f32.mrb[6].mxu1  ;;  %v209_v61 = vpop.f32.mrb[7].mxu0 }
  0xf4   :  { %v7003_v55 = vadd.f32 %v478_v51, %v286_v50  ;;  %v275_v58 = vmul.f32 0.01, %v215_v46  ;;  %vm451_vm11 = vcmp.gt.f32.partialorder %v407_v16, 0.0  ;;  %v467_v62 = vmul.f32 0.01, %v407_v16  ;;  %v401_v1 = vpop.f32.mrb[7].mxu1 }
  0xf5   :  { %v399_v63 = vadd.f32 %v6973_v8, %v398_v52  ;;  %v218_v0 = vadd.f32 %v5606_v54, %v6973_v8  ;;  %5936 = vmatmul.mubr.msk.bf16.vlgmr.msra.gmra.mrb[112].mxu0 %vm127_vm0, %v6416_v28  ;;  %vm257_vm12 = vcmp.gt.f32.partialorder %v207_v59, 0.0  ;;  %v273_v3 = vmul.f32 0.01, %v207_v59  ;;  %5960 = vmatmul.mubr.msk.bf16.vlgmr.msra.gmra.mrb[112].mxu1 %vm127_vm0, %v6416_v28 }
  0xf6   :  { %v291_v2 = vsel %vm259_vm10, %v215_v46, %v275_v58  ;;  %v410_v4 = vadd.f32 %v5630_v60, %v6973_v8  ;;  %5939 = vmatprep.mubr.msk.bf16.mxu0 %vm127_vm0, %v6433_v34  ;;  %v483_v5 = vsel %vm451_vm11, %v407_v16, %v467_v62  ;;  %5963 = vmatprep.mubr.msk.bf16.mxu1 %vm127_vm0, %v6433_v34 }
  0xf7   :  { %vm449_vm13 = vcmp.gt.f32.partialorder %v399_v63, 0.0  ;;  %v465_v6 = vmul.f32 0.01, %v399_v63  ;;  %vm260_vm14 = vcmp.gt.f32.partialorder %v218_v0, 0.0  ;;  %v7017_v7 = vadd.f32 %v483_v5, %v291_v2 }
  0xf8   :  { %v289_v9 = vsel %vm257_vm12, %v207_v59, %v273_v3  ;;  %v276_v10 = vmul.f32 0.01, %v218_v0  ;;  %vm452_vm15 = vcmp.gt.f32.partialorder %v410_v4, 0.0  ;;  %v5609_v11 = vpop.f32.mrb[8].mxu0  ;;  %v468_v13 = vmul.f32 0.01, %v410_v4 }
  0xf9   :  { %v481_v12 = vsel %vm449_vm13, %v399_v63, %v465_v6  ;;  %v210_v28 = vadd.f32 %v6973_v8, %v209_v61  ;;  %v402_v14 = vadd.f32 %v6973_v8, %v401_v1  ;;  %v5633_v15 = vpop.f32.mrb[8].mxu1  ;;  %v222_v17 = vpop.f32.mrb[9].mxu0  ;;  %v231_v20 = vadd.f32 %v5609_v11, %v6973_v8 }
  0xfa   :  { %v7021_v18 = vadd.f32 %v481_v12, %v289_v9  ;;  %v292_v19 = vsel %vm260_vm14, %v218_v0, %v276_v10  ;;  %v423_v34 = vadd.f32 %v5633_v15, %v6973_v8  ;;  %v414_v21 = vpop.f32.mrb[9].mxu1  ;;  %v5610_v22 = vpop.f32.mrb[10].mxu0  ;;  %v484_v23 = vsel %vm452_vm15, %v410_v4, %v468_v13 }
  0xfb   :  { %vm258_vm1 = vcmp.gt.f32.partialorder %v210_v28, 0.0  ;;  %v274_v24 = vmul.f32 0.01, %v210_v28  ;;  %vm450_vm2 = vcmp.gt.f32.partialorder %v402_v14, 0.0  ;;  %v5634_v25 = vpop.f32.mrb[10].mxu1  ;;  %v225_v26 = vpop.f32.mrb[11].mxu0  ;;  %v7025_v27 = vadd.f32 %v484_v23, %v292_v19 }
  0xfc   :  { %v466_v29 = vmul.f32 0.01, %v402_v14  ;;  %vm263_vm3 = vcmp.gt.f32.partialorder %v231_v20, 0.0  ;;  %v279_v30 = vmul.f32 0.01, %v231_v20  ;;  %v417_v31 = vpop.f32.mrb[11].mxu1  ;;  %v223_v36 = vadd.f32 %v6973_v8, %v222_v17 }
  0xfd   :  { %v290_v32 = vsel %vm258_vm1, %v210_v28, %v274_v24  ;;  %vm455_vm4 = vcmp.gt.f32.partialorder %v423_v34, 0.0  ;;  %v471_v35 = vmul.f32 0.01, %v423_v34  ;;  %5940 = vmatmul.mubr.msk.bf16.gmra.mrb[116].mxu0 %vm127_vm0, %v6458_v43  ;;  %v415_v40 = vadd.f32 %v6973_v8, %v414_v21  ;;  %5964 = vmatmul.mubr.msk.bf16.gmra.mrb[116].mxu1 %vm127_vm0, %v6458_v43 }
  0xfe   :  { %v482_v37 = vsel %vm450_vm2, %v402_v14, %v466_v29  ;;  %v295_v39 = vsel %vm263_vm3, %v231_v20, %v279_v30  ;;  %v234_v41 = vadd.f32 %v5610_v22, %v6973_v8  ;;  %vm261_vm5 = vcmp.gt.f32.partialorder %v223_v36, 0.0  ;;  %5943 = vmatprep.mubr.msk.bf16.mxu0 %vm127_vm0, %v6463_v44  ;;  %5967 = vmatprep.mubr.msk.bf16.mxu1 %vm127_vm0, %v6463_v44 }
  0xff   :  { %v7034_v57 = vadd.f32 %v482_v37, %v290_v32  ;;  %v487_v42 = vsel %vm455_vm4, %v423_v34, %v471_v35  ;;  %v277_v45 = vmul.f32 0.01, %v223_v36  ;;  %vm453_vm6 = vcmp.gt.f32.partialorder %v415_v40, 0.0 }
 0x100   :  { %v7040_v46 = vadd.f32 %v487_v42, %v295_v39  ;;  %v469_v47 = vmul.f32 0.01, %v415_v40  ;;  %vm264_vm7 = vcmp.gt.f32.partialorder %v234_v41, 0.0  ;;  %v5613_v48 = vpop.f32.mrb[12].mxu0  ;;  %v280_v51 = vmul.f32 0.01, %v234_v41 }
 0x101   :  { %v293_v50 = vsel %vm261_vm5, %v223_v36, %v277_v45  ;;  %v426_v43 = vadd.f32 %v5634_v25, %v6973_v8  ;;  %v226_v16 = vadd.f32 %v6973_v8, %v225_v26  ;;  %v5637_v52 = vpop.f32.mrb[12].mxu1  ;;  %v238_v54 = vpop.f32.mrb[13].mxu0  ;;  %v418_v59 = vadd.f32 %v6973_v8, %v417_v31 }
 0x102   :  { %v485_v58 = vsel %vm453_vm6, %v415_v40, %v469_v47  ;;  %v247_v60 = vadd.f32 %v5613_v48, %v6973_v8  ;;  %v439_v44 = vadd.f32 %v5637_v52, %v6973_v8  ;;  %v430_v61 = vpop.f32.mrb[13].mxu1  ;;  %v5614_v62 = vpop.f32.mrb[14].mxu0  ;;  %v296_v0 = vsel %vm264_vm7, %v234_v41, %v280_v51 }
 0x103   :  { %v7047_v63 = vadd.f32 %v485_v58, %v293_v50  ;;  %vm456_vm8 = vcmp.gt.f32.partialorder %v426_v43, 0.0  ;;  %v472_v1 = vmul.f32 0.01, %v426_v43  ;;  %v5638_v2 = vpop.f32.mrb[14].mxu1  ;;  %v241_v3 = vpop.f32.mrb[15].mxu0  ;;  %vm262_vm9 = vcmp.gt.f32.partialorder %v226_v16, 0.0 }
 0x104   :  { %v278_v4 = vmul.f32 0.01, %v226_v16  ;;  %vm454_vm10 = vcmp.gt.f32.partialorder %v418_v59, 0.0  ;;  %v470_v5 = vmul.f32 0.01, %v418_v59  ;;  %vm267_vm11 = vcmp.gt.f32.partialorder %v247_v60, 0.0 }
 0x105   :  { %v488_v6 = vsel %vm456_vm8, %v426_v43, %v472_v1  ;;  %v283_v9 = vmul.f32 0.01, %v247_v60  ;;  %vm459_vm12 = vcmp.gt.f32.partialorder %v439_v44, 0.0  ;;  %v433_v10 = vpop.f32.mrb[15].mxu1  ;;  %5944 = vmatmul.mubr.msk.bf16.gmra.mrb[120].mxu0 %vm127_vm0, %v6496_v53  ;;  %v475_v28 = vmul.f32 0.01, %v439_v44  ;;  %5968 = vmatmul.mubr.msk.bf16.gmra.mrb[120].mxu1 %vm127_vm0, %v6496_v53 }
 0x106   :  { %v7051_v11 = vadd.f32 %v488_v6, %v296_v0  ;;  %v294_v12 = vsel %vm262_vm9, %v226_v16, %v278_v4  ;;  %v486_v13 = vsel %vm454_vm10, %v418_v59, %v470_v5  ;;  %5947 = vmatprep.mubr.msk.bf16.mxu0 %vm127_vm0, %v6503_v56  ;;  %v239_v17 = vadd.f32 %v6973_v8, %v238_v54  ;;  %v6284_v16 = vld [vmem:[%s8767_s0 + $0x38] sm:$0xff]  }
 0x107   :  { %v7057_v14 = vadd.f32 %v486_v13, %v294_v12  ;;  %v299_v15 = vsel %vm267_vm11, %v247_v60, %v283_v9  ;;  %v431_v19 = vadd.f32 %v6973_v8, %v430_v61  ;;  %5971 = vmatprep.mubr.msk.bf16.mxu1 %vm127_vm0, %v6503_v56  ;;  %v491_v20 = vsel %vm459_vm12, %v439_v44, %v475_v28 }
 0x108   :  { %v250_v34 = vadd.f32 %v5614_v62, %v6973_v8  ;;  %v442_v21 = vadd.f32 %v5638_v2, %v6973_v8  ;;  %v242_v53 = vadd.f32 %v6973_v8, %v241_v3  ;;  %v5649_v22 = vpop.f32.mrb[16].mxu0  ;;  %v7066_v23 = vadd.f32 %v491_v20, %v299_v15  ;;  %v5673_v25 = vpop.f32.mrb[16].mxu1 }
 0x109   :  { %vm265_vm13 = vcmp.gt.f32.partialorder %v239_v17, 0.0  ;;  %v281_v24 = vmul.f32 0.01, %v239_v17  ;;  %vm457_vm14 = vcmp.gt.f32.partialorder %v431_v19, 0.0  ;;  %v574_v26 = vpop.f32.mrb[17].mxu0  ;;  %v766_v35 = vpop.f32.mrb[17].mxu1  ;;  %v434_v39 = vadd.f32 %v6973_v8, %v433_v10 }
 0x10a   :  { %v473_v29 = vmul.f32 0.01, %v431_v19  ;;  %vm268_vm15 = vcmp.gt.f32.partialorder %v250_v34, 0.0  ;;  %v284_v30 = vmul.f32 0.01, %v250_v34  ;;  %vm460_vm1 = vcmp.gt.f32.partialorder %v442_v21, 0.0 }
 0x10b   :  { %v297_v56 = vsel %vm265_vm13, %v239_v17, %v281_v24  ;;  %v476_v31 = vmul.f32 0.01, %v442_v21  ;;  %vm266_vm2 = vcmp.gt.f32.partialorder %v242_v53, 0.0  ;;  %v282_v32 = vmul.f32 0.01, %v242_v53  ;;  %v5650_v41 = vpop.f32.mrb[18].mxu0 }
 0x10c   :  { %v489_v36 = vsel %vm457_vm14, %v431_v19, %v473_v29  ;;  %v300_v37 = vsel %vm268_vm15, %v250_v34, %v284_v30  ;;  %v583_v40 = vadd.f32 %v5649_v22, %v6973_v8  ;;  %v5674_v42 = vpop.f32.mrb[18].mxu1  ;;  %v775_v50 = vadd.f32 %v5673_v25, %v6973_v8  ;;  %v577_v51 = vpop.f32.mrb[19].mxu0 }
 0x10d   :  { %v7070_v45 = vadd.f32 %v489_v36, %v297_v56  ;;  %v492_v47 = vsel %vm460_vm1, %v442_v21, %v476_v31  ;;  %v298_v48 = vsel %vm266_vm2, %v242_v53, %v282_v32  ;;  %v769_v43 = vpop.f32.mrb[19].mxu1  ;;  %5948 = vmatmul.mubr.msk.bf16.gmra.mrb[124].mxu0 %vm127_vm0, %v6284_v16  ;;  %vm458_vm3 = vcmp.gt.f32.partialorder %v434_v39, 0.0  ;;  %5972 = vmatmul.mubr.msk.bf16.gmra.mrb[124].mxu1 %vm127_vm0, %v6284_v16 }
 0x10e   :  { %v7077_v52 = vadd.f32 %v492_v47, %v300_v37  ;;  %v474_v54 = vmul.f32 0.01, %v434_v39  ;;  %vm639_vm4 = vcmp.gt.f32.partialorder %v583_v40, 0.0  ;;  %v655_v58 = vmul.f32 0.01, %v583_v40 }
 0x10f   :  { %vm831_vm5 = vcmp.gt.f32.partialorder %v775_v50, 0.0  ;;  %v847_v59 = vmul.f32 0.01, %v775_v50  ;;  %v575_v60 = vadd.f32 %v6973_v8, %v574_v26  ;;  %v767_v61 = vadd.f32 %v6973_v8, %v766_v35 }
 0x110   :  { %v490_v44 = vsel %vm458_vm3, %v434_v39, %v474_v54  ;;  %v586_v62 = vadd.f32 %v5650_v41, %v6973_v8  ;;  %v778_v0 = vadd.f32 %v5674_v42, %v6973_v8  ;;  %v5653_v1 = vpop.f32.mrb[20].mxu0  ;;  %v671_v3 = vsel %vm639_vm4, %v583_v40, %v655_v58  ;;  %v5677_v5 = vpop.f32.mrb[20].mxu1 }
 0x111   :  { %v7084_v2 = vadd.f32 %v490_v44, %v298_v48  ;;  %v863_v4 = vsel %vm831_vm5, %v775_v50, %v847_v59  ;;  %vm637_vm6 = vcmp.gt.f32.partialorder %v575_v60, 0.0  ;;  %v590_v6 = vpop.f32.mrb[21].mxu0  ;;  %v687_v9 = vadd.f32 %v671_v3, %v6991_v33  ;;  %v782_v13 = vpop.f32.mrb[21].mxu1 }
 0x112   :  { %v653_v10 = vmul.f32 0.01, %v575_v60  ;;  %vm829_vm0 = vcmp.gt.f32.partialorder %v767_v61, 0.0  ;;  %v845_v12 = vmul.f32 0.01, %v767_v61  ;;  %vm640_vm7 = vcmp.gt.f32.partialorder %v586_v62, 0.0 }
 0x113   :  { %v656_v28 = vmul.f32 0.01, %v586_v62  ;;  %vm832_vm8 = vcmp.gt.f32.partialorder %v778_v0, 0.0  ;;  %v848_v15 = vmul.f32 0.01, %v778_v0  ;;  %v7087_v17 = vadd.f32 %v863_v4, %v687_v9  ;;  %v5654_v21 = vpop.f32.mrb[22].mxu0 }
 0x114   :  { %v669_v19 = vsel %vm637_vm6, %v575_v60, %v653_v10  ;;  %v861_v20 = vsel %vm829_vm0, %v767_v61, %v845_v12  ;;  %v578_v34 = vadd.f32 %v6973_v8, %v577_v51  ;;  %v5678_v53 = vpop.f32.mrb[22].mxu1  ;;  %v770_v25 = vadd.f32 %v6973_v8, %v769_v43  ;;  %v593_v26 = vpop.f32.mrb[23].mxu0 }
 0x115   :  { %v685_v22 = vadd.f32 %v669_v19, %v6997_v38  ;;  %v672_v24 = vsel %vm640_vm7, %v586_v62, %v656_v28  ;;  %v864_v33 = vsel %vm832_vm8, %v778_v0, %v848_v15  ;;  %v785_v29 = vpop.f32.mrb[23].mxu1  ;;  %v599_v31 = vadd.f32 %v5653_v1, %v6973_v8 }
 0x116   :  { %v688_v30 = vadd.f32 %v672_v24, %v7000_v49  ;;  %vm638_vm9 = vcmp.gt.f32.partialorder %v578_v34, 0.0  ;;  %v654_v56 = vmul.f32 0.01, %v578_v34  ;;  %vm830_vm10 = vcmp.gt.f32.partialorder %v770_v25, 0.0 }
 0x117   :  { %v7094_v32 = vadd.f32 %v861_v20, %v685_v22  ;;  %v846_v35 = vmul.f32 0.01, %v770_v25  ;;  %v791_v36 = vadd.f32 %v5677_v5, %v6973_v8  ;;  %vm643_vm11 = vcmp.gt.f32.partialorder %v599_v31, 0.0 }
 0x118   :  { %v7097_v37 = vadd.f32 %v864_v33, %v688_v30  ;;  %v670_v38 = vsel %vm638_vm9, %v578_v34, %v654_v56  ;;  %v659_v39 = vmul.f32 0.01, %v599_v31  ;;  %v5657_v40 = vpop.f32.mrb[24].mxu0  ;;  %v5681_v47 = vpop.f32.mrb[24].mxu1  ;;  %v591_v51 = vadd.f32 %v6973_v8, %v590_v6 }
 0x119   :  { %v686_v41 = vadd.f32 %v670_v38, %v7003_v55  ;;  %v862_v42 = vsel %vm830_vm10, %v770_v25, %v846_v35  ;;  %vm835_vm12 = vcmp.gt.f32.partialorder %v791_v36, 0.0  ;;  %v851_v49 = vmul.f32 0.01, %v791_v36  ;;  %v606_v48 = vpop.f32.mrb[25].mxu0  ;;  %v798_v54 = vpop.f32.mrb[25].mxu1 }
 0x11a   :  { %v675_v50 = vsel %vm643_vm11, %v599_v31, %v659_v39  ;;  %v783_v43 = vadd.f32 %v6973_v8, %v782_v13  ;;  %v602_v16 = vadd.f32 %v5654_v21, %v6973_v8  ;;  %v5658_v58 = vpop.f32.mrb[26].mxu0  ;;  %v794_v55 = vadd.f32 %v5678_v53, %v6973_v8  ;;  %v5682_v61 = vpop.f32.mrb[26].mxu1 }
 0x11b   :  { %v7103_v59 = vadd.f32 %v862_v42, %v686_v41  ;;  %v691_v60 = vadd.f32 %v675_v50, %v7017_v7  ;;  %v867_v44 = vsel %vm835_vm12, %v791_v36, %v851_v49  ;;  %v609_v62 = vpop.f32.mrb[27].mxu0  ;;  %vm641_vm13 = vcmp.gt.f32.partialorder %v591_v51, 0.0  ;;  %v801_v5 = vpop.f32.mrb[27].mxu1 }
 0x11c   :  { %v657_v0 = vmul.f32 0.01, %v591_v51  ;;  %vm833_vm14 = vcmp.gt.f32.partialorder %v783_v43, 0.0  ;;  %v849_v1 = vmul.f32 0.01, %v783_v43  ;;  %vm644_vm15 = vcmp.gt.f32.partialorder %v602_v16, 0.0 }
 0x11d   :  { %v7107_v3 = vadd.f32 %v867_v44, %v691_v60  ;;  %v660_v4 = vmul.f32 0.01, %v602_v16  ;;  %vm836_vm1 = vcmp.gt.f32.partialorder %v794_v55, 0.0  ;;  %v852_v10 = vmul.f32 0.01, %v794_v55 }
 0x11e   :  { %v673_v6 = vsel %vm641_vm13, %v591_v51, %v657_v0  ;;  %v865_v9 = vsel %vm833_vm14, %v783_v43, %v849_v1  ;;  %v594_v7 = vadd.f32 %v6973_v8, %v593_v26  ;;  %v786_v28 = vadd.f32 %v6973_v8, %v785_v29 }
 0x11f   :  { %v689_v12 = vadd.f32 %v673_v6, %v7021_v18  ;;  %v676_v13 = vsel %vm644_vm15, %v602_v16, %v660_v4  ;;  %v615_v15 = vadd.f32 %v5657_v40, %v6973_v8  ;;  %v868_v20 = vsel %vm836_vm1, %v794_v55, %v852_v10 }
 0x120   :  { %v692_v19 = vadd.f32 %v676_v13, %v7025_v27  ;;  %vm642_vm2 = vcmp.gt.f32.partialorder %v594_v7, 0.0  ;;  %v658_v34 = vmul.f32 0.01, %v594_v7  ;;  %v5661_v21 = vpop.f32.mrb[28].mxu0  ;;  %vm834_vm3 = vcmp.gt.f32.partialorder %v786_v28, 0.0  ;;  %v5685_v24 = vpop.f32.mrb[28].mxu1 }
 0x121   :  { %v7114_v53 = vadd.f32 %v865_v9, %v689_v12  ;;  %v850_v22 = vmul.f32 0.01, %v786_v28  ;;  %vm647_vm4 = vcmp.gt.f32.partialorder %v615_v15, 0.0  ;;  %v622_v33 = vpop.f32.mrb[29].mxu0  ;;  %v663_v26 = vmul.f32 0.01, %v615_v15 }
 0x122   :  { %v7116_v25 = vadd.f32 %v868_v20, %v692_v19  ;;  %v674_v18 = vsel %vm642_vm2, %v594_v7, %v658_v34  ;;  %v807_v29 = vadd.f32 %v5681_v47, %v6973_v8  ;;  %v814_v30 = vpop.f32.mrb[29].mxu1  ;;  %v5662_v56 = vpop.f32.mrb[30].mxu0  ;;  %v607_v35 = vadd.f32 %v6973_v8, %v606_v48 }
 0x123   :  { %v690_v27 = vadd.f32 %v674_v18, %v7034_v57  ;;  %v866_v31 = vsel %vm834_vm3, %v786_v28, %v850_v22  ;;  %v799_v36 = vadd.f32 %v6973_v8, %v798_v54  ;;  %v7122_v38 = vpop.f32.mrb[30].mxu1  ;;  %v7124_v39 = vpop.f32.mrb[31].mxu0  ;;  %v679_v40 = vsel %vm647_vm4, %v615_v15, %v663_v26 }
 0x124   :  { %vm839_vm5 = vcmp.gt.f32.partialorder %v807_v29, 0.0  ;;  %v855_v41 = vmul.f32 0.01, %v807_v29  ;;  %v618_v42 = vadd.f32 %v5658_v58, %v6973_v8  ;;  %v7127_v49 = vpop.f32.mrb[31].mxu1  ;;  %v695_v57 = vadd.f32 %v679_v40, %v7040_v46 }
 0x125   :  { %v7129_v47 = vadd.f32 %v866_v31, %v690_v27  ;;  %vm645_vm6 = vcmp.gt.f32.partialorder %v607_v35, 0.0  ;;  %v661_v50 = vmul.f32 0.01, %v607_v35  ;;  %vm837_vm0 = vcmp.gt.f32.partialorder %v799_v36, 0.0 }
 0x126   :  { %v871_v48 = vsel %vm839_vm5, %v807_v29, %v855_v41  ;;  %v853_v51 = vmul.f32 0.01, %v799_v36  ;;  %vm648_vm7 = vcmp.gt.f32.partialorder %v618_v42, 0.0  ;;  %v664_v54 = vmul.f32 0.01, %v618_v42 }
 0x127   :  { %v7132_v43 = vadd.f32 %v871_v48, %v695_v57  ;;  %v677_v16 = vsel %vm645_vm6, %v607_v35, %v661_v50  ;;  %v810_v60 = vadd.f32 %v5682_v61, %v6973_v8  ;;  %v610_v55 = vadd.f32 %v6973_v8, %v609_v62 }
 0x128   :  { %v693_v58 = vadd.f32 %v677_v16, %v7047_v63  ;;  %v869_v44 = vsel %vm837_vm0, %v799_v36, %v853_v51  ;;  %v802_v0 = vadd.f32 %v6973_v8, %v801_v5  ;;  %v5697_v46 = vpop.f32.mrb[32].mxu0  ;;  %v680_v1 = vsel %vm648_vm7, %v618_v42, %v664_v54  ;;  %v7139_v9 = vpop.f32.mrb[32].mxu1 }
 0x129   :  { %vm840_vm8 = vcmp.gt.f32.partialorder %v810_v60, 0.0  ;;  %v856_v4 = vmul.f32 0.01, %v810_v60  ;;  %v631_v6 = vadd.f32 %v5661_v21, %v6973_v8  ;;  %v7141_v10 = vpop.f32.mrb[33].mxu0  ;;  %v696_v61 = vadd.f32 %v680_v1, %v7051_v11  ;;  %v7146_v12 = vpop.f32.mrb[33].mxu1 }
 0x12a   :  { %v7143_v7 = vadd.f32 %v869_v44, %v693_v58  ;;  %vm646_vm9 = vcmp.gt.f32.partialorder %v610_v55, 0.0  ;;  %v662_v63 = vmul.f32 0.01, %v610_v55  ;;  %v7148_v62 = vpop.f32.mrb[34].mxu0  ;;  %vm838_vm10 = vcmp.gt.f32.partialorder %v802_v0, 0.0  ;;  %v7150_v28 = vpop.f32.mrb[34].mxu1 }
 0x12b   :  { %v872_v5 = vsel %vm840_vm8, %v810_v60, %v856_v4  ;;  %v854_v13 = vmul.f32 0.01, %v802_v0  ;;  %vm651_vm11 = vcmp.gt.f32.partialorder %v631_v6, 0.0  ;;  %v7152_v15 = vpop.f32.mrb[35].mxu0  ;;  %v667_v34 = vmul.f32 0.01, %v631_v6 }
 0x12c   :  { %v7154_v19 = vadd.f32 %v872_v5, %v696_v61  ;;  %v678_v20 = vsel %vm646_vm9, %v610_v55, %v662_v63  ;;  %v823_v11 = vadd.f32 %v5685_v24, %v6973_v8  ;;  %v7157_v21 = vpop.f32.mrb[35].mxu1  ;;  %v623_v26 = vadd.f32 %v6973_v8, %v622_v33 }
 0x12d   :  { %v694_v22 = vadd.f32 %v678_v20, %v7057_v14  ;;  %v870_v18 = vsel %vm838_vm10, %v802_v0, %v854_v13  ;;  %v815_v29 = vadd.f32 %v6973_v8, %v814_v30  ;;  %v683_v27 = vsel %vm651_vm11, %v631_v6, %v667_v34 }
 0x12e   :  { %vm843_vm12 = vcmp.gt.f32.partialorder %v823_v11, 0.0  ;;  %v859_v31 = vmul.f32 0.01, %v823_v11  ;;  %v634_v35 = vadd.f32 %v5662_v56, %v6973_v8  ;;  %v699_v40 = vadd.f32 %v683_v27, %v7066_v23 }
 0x12f   :  { %v7163_v36 = vadd.f32 %v870_v18, %v694_v22  ;;  %vm649_vm13 = vcmp.gt.f32.partialorder %v623_v26, 0.0  ;;  %v665_v24 = vmul.f32 0.01, %v623_v26  ;;  %vm841_vm14 = vcmp.gt.f32.partialorder %v815_v29, 0.0 }
 0x130   :  { %v875_v41 = vsel %vm843_vm12, %v823_v11, %v859_v31  ;;  %v857_v42 = vmul.f32 0.01, %v815_v29  ;;  %vm652_vm15 = vcmp.gt.f32.partialorder %v634_v35, 0.0  ;;  %v7166_v14 = vpop.f32.mrb[36].mxu0  ;;  %v668_v57 = vmul.f32 0.01, %v634_v35 }
 0x131   :  { %v7168_v33 = vadd.f32 %v875_v41, %v699_v40  ;;  %v681_v30 = vsel %vm649_vm13, %v623_v26, %v665_v24  ;;  %v826_v50 = vadd.f32 %v7122_v38, %v6973_v8  ;;  %v7172_v56 = vpop.f32.mrb[36].mxu1  ;;  %v7174_v48 = vpop.f32.mrb[37].mxu0  ;;  %v626_v16 = vadd.f32 %v6973_v8, %v7124_v39 }
 0x132   :  { %v697_v23 = vadd.f32 %v681_v30, %v7070_v45  ;;  %v873_v51 = vsel %vm841_vm14, %v815_v29, %v857_v42  ;;  %v818_v54 = vadd.f32 %v6973_v8, %v7127_v49  ;;  %v7181_v60 = vpop.f32.mrb[37].mxu1  ;;  %v7183_v58 = vpop.f32.mrb[38].mxu0  ;;  %v684_v44 = vsel %vm652_vm15, %v634_v35, %v668_v57 }
 0x133   :  { %vm844_vm1 = vcmp.gt.f32.partialorder %v826_v50, 0.0  ;;  %v860_v38 = vmul.f32 0.01, %v826_v50  ;;  %v967_v55 = vadd.f32 %v5697_v46, %v6973_v8  ;;  %v7186_v0 = vpop.f32.mrb[38].mxu1  ;;  %v7188_v1 = vpop.f32.mrb[39].mxu0  ;;  %v700_v39 = vadd.f32 %v684_v44, %v7077_v52 }
 0x134   :  { %v7190_v45 = vadd.f32 %v873_v51, %v697_v23  ;;  %vm650_vm2 = vcmp.gt.f32.partialorder %v626_v16, 0.0  ;;  %v666_v4 = vmul.f32 0.01, %v626_v16  ;;  %v7193_v49 = vpop.f32.mrb[39].mxu1  ;;  %vm842_vm3 = vcmp.gt.f32.partialorder %v818_v54, 0.0 }
 0x135   :  { %v876_v6 = vsel %vm844_vm1, %v826_v50, %v860_v38  ;;  %v858_v61 = vmul.f32 0.01, %v818_v54  ;;  %vm1023_vm4 = vcmp.gt.f32.partialorder %v967_v55, 0.0  ;;  %v1039_v46 = vmul.f32 0.01, %v967_v55 }
 0x136   :  { %v7195_v63 = vadd.f32 %v876_v6, %v700_v39  ;;  %v682_v5 = vsel %vm650_vm2, %v626_v16, %v666_v4  ;;  %v1159_v13 = vadd.f32 %v7139_v9, %v6973_v8  ;;  %v959_v52 = vadd.f32 %v6973_v8, %v7141_v10 }
 0x137   :  { %v698_v20 = vadd.f32 %v682_v5, %v7084_v2  ;;  %v874_v34 = vsel %vm842_vm3, %v818_v54, %v858_v61  ;;  %v1151_v11 = vadd.f32 %v6973_v8, %v7146_v12  ;;  %v1055_v22 = vsel %vm1023_vm4, %v967_v55, %v1039_v46 }
 0x138   :  { %vm1215_vm5 = vcmp.gt.f32.partialorder %v1159_v13, 0.0  ;;  %v1231_v18 = vmul.f32 0.01, %v1159_v13  ;;  %v970_v26 = vadd.f32 %v7148_v62, %v6973_v8  ;;  %v7206_v29 = vpop.f32.mrb[40].mxu0  ;;  %v1071_v9 = vadd.f32 %v1055_v22, %v7087_v17  ;;  %v7211_v31 = vpop.f32.mrb[40].mxu1 }
 0x139   :  { %v7208_v27 = vadd.f32 %v874_v34, %v698_v20  ;;  %vm1021_vm6 = vcmp.gt.f32.partialorder %v959_v52, 0.0  ;;  %v1037_v2 = vmul.f32 0.01, %v959_v52  ;;  %v7213_v10 = vpop.f32.mrb[41].mxu0  ;;  %vm1213_vm0 = vcmp.gt.f32.partialorder %v1151_v11, 0.0  ;;  %v7215_v40 = vpop.f32.mrb[41].mxu1 }
 0x13a   :  { %v1247_v35 = vsel %vm1215_vm5, %v1159_v13, %v1231_v18  ;;  %v1229_v12 = vmul.f32 0.01, %v1151_v11  ;;  %vm1024_vm7 = vcmp.gt.f32.partialorder %v970_v26, 0.0  ;;  %v7217_v24 = vpop.f32.mrb[42].mxu0  ;;  %v1040_v42 = vmul.f32 0.01, %v970_v26 }
 0x13b   :  { %v7219_v62 = vadd.f32 %v1247_v35, %v1071_v9  ;;  %v1053_v41 = vsel %vm1021_vm6, %v959_v52, %v1037_v2  ;;  %v1162_v17 = vadd.f32 %v7150_v28, %v6973_v8  ;;  %v7223_v30 = vpop.f32.mrb[42].mxu1  ;;  %v7225_v57 = vpop.f32.mrb[43].mxu0  ;;  %v962_v51 = vadd.f32 %v6973_v8, %v7152_v15 }
 0x13c   :  { %v1069_v50 = vadd.f32 %v1053_v41, %v7094_v32  ;;  %v1245_v23 = vsel %vm1213_vm0, %v1151_v11, %v1229_v12  ;;  %v1154_v16 = vadd.f32 %v6973_v8, %v7157_v21  ;;  %v7232_v54 = vpop.f32.mrb[43].mxu1  ;;  %v1056_v44 = vsel %vm1024_vm7, %v970_v26, %v1040_v42 }
 0x13d   :  { %vm1216_vm8 = vcmp.gt.f32.partialorder %v1162_v17, 0.0  ;;  %v1232_v38 = vmul.f32 0.01, %v1162_v17  ;;  %v983_v28 = vadd.f32 %v7166_v14, %v6973_v8  ;;  %v1072_v39 = vadd.f32 %v1056_v44, %v7097_v37 }
 0x13e   :  { %v7236_v55 = vadd.f32 %v1245_v23, %v1069_v50  ;;  %vm1022_vm9 = vcmp.gt.f32.partialorder %v962_v51, 0.0  ;;  %v1038_v32 = vmul.f32 0.01, %v962_v51  ;;  %vm1214_vm10 = vcmp.gt.f32.partialorder %v1154_v16, 0.0 }
 0x13f   :  { %v1248_v4 = vsel %vm1216_vm8, %v1162_v17, %v1232_v38  ;;  %v1230_v15 = vmul.f32 0.01, %v1154_v16  ;;  %vm1027_vm11 = vcmp.gt.f32.partialorder %v983_v28, 0.0  ;;  %v1043_v61 = vmul.f32 0.01, %v983_v28 }
 0x140   :  { %v7239_v6 = vadd.f32 %v1248_v4, %v1072_v39  ;;  %v1054_v21 = vsel %vm1022_vm9, %v962_v51, %v1038_v32  ;;  %v1175_v5 = vadd.f32 %v7172_v56, %v6973_v8  ;;  %v7243_v46 = vpop.f32.mrb[44].mxu0  ;;  %v975_v37 = vadd.f32 %v6973_v8, %v7174_v48  ;;  %v7250_v34 = vpop.f32.mrb[44].mxu1 }
 0x141   :  { %v1070_v14 = vadd.f32 %v1054_v21, %v7103_v59  ;;  %v1246_v13 = vsel %vm1214_vm10, %v1154_v16, %v1230_v15  ;;  %v1167_v20 = vadd.f32 %v6973_v8, %v7181_v60  ;;  %v7252_v52 = vpop.f32.mrb[45].mxu0  ;;  %v1059_v11 = vsel %vm1027_vm11, %v983_v28, %v1043_v61  ;;  %v7256_v18 = vpop.f32.mrb[45].mxu1 }
 0x142   :  { %vm1219_vm12 = vcmp.gt.f32.partialorder %v1175_v5, 0.0  ;;  %v1235_v22 = vmul.f32 0.01, %v1175_v5  ;;  %v986_v56 = vadd.f32 %v7183_v58, %v6973_v8  ;;  %v7258_v59 = vpop.f32.mrb[46].mxu0  ;;  %v1075_v48 = vadd.f32 %v1059_v11, %v7107_v3  ;;  %v7263_v9 = vpop.f32.mrb[46].mxu1 }
 0x143   :  { %v7260_v26 = vadd.f32 %v1246_v13, %v1070_v14  ;;  %vm1025_vm13 = vcmp.gt.f32.partialorder %v975_v37, 0.0  ;;  %v1041_v60 = vmul.f32 0.01, %v975_v37  ;;  %v7265_v2 = vpop.f32.mrb[47].mxu0  ;;  %vm1217_vm14 = vcmp.gt.f32.partialorder %v1167_v20, 0.0  ;;  %v7267_v41 = vpop.f32.mrb[47].mxu1 }
 0x144   :  { %v1251_v35 = vsel %vm1219_vm12, %v1175_v5, %v1235_v22  ;;  %v1233_v12 = vmul.f32 0.01, %v1167_v20  ;;  %vm1028_vm15 = vcmp.gt.f32.partialorder %v986_v56, 0.0  ;;  %v1044_v17 = vmul.f32 0.01, %v986_v56 }
 0x145   :  { %v7269_v58 = vadd.f32 %v1251_v35, %v1075_v48  ;;  %v1057_v42 = vsel %vm1025_vm13, %v975_v37, %v1041_v60  ;;  %v1178_v50 = vadd.f32 %v7186_v0, %v6973_v8  ;;  %v978_v51 = vadd.f32 %v6973_v8, %v7188_v1  ;;  %v7309_v60 = vld [vmem:[%s8768_s2] ss:$0 sm:$0xff] }
 0x146   :  { %v1073_v3 = vadd.f32 %v1057_v42, %v7114_v53  ;;  %v1249_v23 = vsel %vm1217_vm14, %v1167_v20, %v1233_v12  ;;  %v1170_v16 = vadd.f32 %v6973_v8, %v7193_v49  ;;  %v1060_v44 = vsel %vm1028_vm15, %v986_v56, %v1044_v17 }
 0x147   :  { %vm1220_vm1 = vcmp.gt.f32.partialorder %v1178_v50, 0.0  ;;  %v1236_v38 = vmul.f32 0.01, %v1178_v50  ;;  %v999_v28 = vadd.f32 %v7206_v29, %v6973_v8  ;;  %v1076_v32 = vadd.f32 %v1060_v44, %v7116_v25 }
 0x148   :  { %v7280_v39 = vadd.f32 %v1249_v23, %v1073_v3  ;;  %vm1026_vm2 = vcmp.gt.f32.partialorder %v978_v51, 0.0  ;;  %v1042_v0 = vmul.f32 0.01, %v978_v51  ;;  %v7283_v53 = vpop.f32.mrb[48].mxu0  ;;  %vm1218_vm3 = vcmp.gt.f32.partialorder %v1170_v16, 0.0  ;;  %v7285_v15 = vpop.f32.mrb[48].mxu1 }
 0x149   :  { %v1252_v4 = vsel %vm1220_vm1, %v1178_v50, %v1236_v38  ;;  %v1234_v1 = vmul.f32 0.01, %v1170_v16  ;;  %vm1031_vm4 = vcmp.gt.f32.partialorder %v999_v28, 0.0  ;;  %v7287_v49 = vpop.f32.mrb[49].mxu0  ;;  %v1047_v29 = vmul.f32 0.01, %v999_v28 }
 0x14a   :  { %v7289_v21 = vadd.f32 %v1252_v4, %v1076_v32  ;;  %v1058_v61 = vsel %vm1026_vm2, %v978_v51, %v1042_v0  ;;  %v1191_v5 = vadd.f32 %v7211_v31, %v6973_v8  ;;  %v7293_v25 = vpop.f32.mrb[49].mxu1  ;;  %v7295_v14 = vpop.f32.mrb[50].mxu0  ;;  %v991_v20 = vadd.f32 %v6973_v8, %v7213_v10 }
 0x14b   :  { %v1074_v13 = vadd.f32 %v1058_v61, %v7129_v47  ;;  %v1250_v37 = vsel %vm1218_vm3, %v1170_v16, %v1234_v1  ;;  %v1183_v11 = vadd.f32 %v6973_v8, %v7215_v40  ;;  %v7302_v22 = vpop.f32.mrb[50].mxu1  ;;  %v7304_v56 = vpop.f32.mrb[51].mxu0  ;;  %v1063_v48 = vsel %vm1031_vm4, %v999_v28, %v1047_v29 }
 0x14c   :  { %vm1223_vm5 = vcmp.gt.f32.partialorder %v1191_v5, 0.0  ;;  %v1239_v31 = vmul.f32 0.01, %v1191_v5  ;;  %v1002_v47 = vadd.f32 %v7309_v60, %v7217_v24  ;;  %v7313_v35 = vpop.f32.mrb[51].mxu1  ;;  %v1079_v8 = vadd.f32 %v1063_v48, %v7132_v43 }
 0x14d   :  { %v7315_v10 = vadd.f32 %v1250_v37, %v1074_v13  ;;  %vm1029_vm6 = vcmp.gt.f32.partialorder %v991_v20, 0.0  ;;  %v1045_v40 = vmul.f32 0.01, %v991_v20  ;;  %vm1221_vm0 = vcmp.gt.f32.partialorder %v1183_v11, 0.0 }
 0x14e   :  { %v1255_v12 = vsel %vm1223_vm5, %v1191_v5, %v1239_v31  ;;  %v1237_v42 = vmul.f32 0.01, %v1183_v11  ;;  %vm1032_vm7 = vcmp.gt.f32.partialorder %v1002_v47, 0.0  ;;  %v1048_v3 = vmul.f32 0.01, %v1002_v47 }
 0x14f   :  { %v7318_v17 = vadd.f32 %v1255_v12, %v1079_v8  ;;  %v1061_v50 = vsel %vm1029_vm6, %v991_v20, %v1045_v40  ;;  %v1194_v23 = vadd.f32 %v7309_v60, %v7223_v30  ;;  %v994_v16 = vadd.f32 %v7309_v60, %v7225_v57 }
 0x150   :  { %v1077_v24 = vadd.f32 %v1061_v50, %v7143_v7  ;;  %v1253_v51 = vsel %vm1221_vm0, %v1183_v11, %v1237_v42  ;;  %v1186_v43 = vadd.f32 %v7309_v60, %v7232_v54  ;;  %v7327_v44 = vpop.f32.mrb[52].mxu0  ;;  %v1064_v38 = vsel %vm1032_vm7, %v1002_v47, %v1048_v3  ;;  %v7331_v0 = vpop.f32.mrb[52].mxu1 }
 0x151   :  { %vm1224_vm8 = vcmp.gt.f32.partialorder %v1194_v23, 0.0  ;;  %v1240_v28 = vmul.f32 0.01, %v1194_v23  ;;  %v1015_v32 = vadd.f32 %v7309_v60, %v7243_v46  ;;  %v7333_v30 = vpop.f32.mrb[53].mxu0  ;;  %v1080_v4 = vadd.f32 %v1064_v38, %v7154_v19  ;;  %v7338_v1 = vpop.f32.mrb[53].mxu1 }
 0x152   :  { %v7335_v7 = vadd.f32 %v1253_v51, %v1077_v24  ;;  %vm1030_vm9 = vcmp.gt.f32.partialorder %v994_v16, 0.0  ;;  %v1046_v57 = vmul.f32 0.01, %v994_v16  ;;  %v7340_v54 = vpop.f32.mrb[54].mxu0  ;;  %vm1222_vm10 = vcmp.gt.f32.partialorder %v1186_v43, 0.0  ;;  %v7342_v5 = vpop.f32.mrb[54].mxu1 }
 0x153   :  { %v1256_v61 = vsel %vm1224_vm8, %v1194_v23, %v1240_v28  ;;  %v1238_v29 = vmul.f32 0.01, %v1186_v43  ;;  %vm1035_vm11 = vcmp.gt.f32.partialorder %v1015_v32, 0.0  ;;  %v7344_v46 = vpop.f32.mrb[55].mxu0  ;;  %v1051_v20 = vmul.f32 0.01, %v1015_v32 }
 0x154   :  { %v7346_v13 = vadd.f32 %v1256_v61, %v1080_v4  ;;  %v1062_v37 = vsel %vm1030_vm9, %v994_v16, %v1046_v57  ;;  %v1207_v19 = vadd.f32 %v7309_v60, %v7250_v34  ;;  %v7350_v11 = vpop.f32.mrb[55].mxu1  ;;  %v1007_v47 = vadd.f32 %v7309_v60, %v7252_v52 }
 0x155   :  { %v1078_v48 = vadd.f32 %v1062_v37, %v7163_v36  ;;  %v1254_v31 = vsel %vm1222_vm10, %v1186_v43, %v1238_v29  ;;  %v1199_v8 = vadd.f32 %v7309_v60, %v7256_v18  ;;  %v1067_v40 = vsel %vm1035_vm11, %v1015_v32, %v1051_v20 }
 0x156   :  { %vm1227_vm12 = vcmp.gt.f32.partialorder %v1207_v19, 0.0  ;;  %v1243_v12 = vmul.f32 0.01, %v1207_v19  ;;  %v1018_v42 = vadd.f32 %v7309_v60, %v7258_v59  ;;  %v1083_v34 = vadd.f32 %v1067_v40, %v7168_v33 }
 0x157   :  { %v7359_v50 = vadd.f32 %v1254_v31, %v1078_v48  ;;  %vm1033_vm13 = vcmp.gt.f32.partialorder %v1007_v47, 0.0  ;;  %v1049_v3 = vmul.f32 0.01, %v1007_v47  ;;  %vm1225_vm14 = vcmp.gt.f32.partialorder %v1199_v8, 0.0 }
 0x158   :  { %v1259_v36 = vsel %vm1227_vm12, %v1207_v19, %v1243_v12  ;;  %v1241_v23 = vmul.f32 0.01, %v1199_v8  ;;  %vm1036_vm15 = vcmp.gt.f32.partialorder %v1018_v42, 0.0  ;;  %v7362_v52 = vpop.f32.mrb[56].mxu0  ;;  %v1052_v51 = vmul.f32 0.01, %v1018_v42 }
 0x159   :  { %v7364_v24 = vadd.f32 %v1259_v36, %v1083_v34  ;;  %v1065_v18 = vsel %vm1033_vm13, %v1007_v47, %v1049_v3  ;;  %v1210_v16 = vadd.f32 %v7309_v60, %v7263_v9  ;;  %v7368_v59 = vpop.f32.mrb[56].mxu1  ;;  %v7370_v43 = vpop.f32.mrb[57].mxu0  ;;  %v1010_v28 = vadd.f32 %v7309_v60, %v7265_v2 }
 0x15a   :  { %v1081_v33 = vadd.f32 %v1065_v18, %v7190_v45  ;;  %v1257_v38 = vsel %vm1225_vm14, %v1199_v8, %v1241_v23  ;;  %v1202_v32 = vadd.f32 %v7309_v60, %v7267_v41  ;;  %v7377_v4 = vpop.f32.mrb[57].mxu1  ;;  %v7379_v57 = vpop.f32.mrb[58].mxu0  ;;  %v1068_v61 = vsel %vm1036_vm15, %v1018_v42, %v1052_v51 }
 0x15b   :  { %vm1228_vm1 = vcmp.gt.f32.partialorder %v1210_v16, 0.0  ;;  %v1244_v9 = vmul.f32 0.01, %v1210_v16  ;;  %v1351_v29 = vadd.f32 %v7309_v60, %v7283_v53  ;;  %v7383_v37 = vpop.f32.mrb[58].mxu1  ;;  %v7385_v45 = vpop.f32.mrb[59].mxu0  ;;  %v1084_v2 = vadd.f32 %v1068_v61, %v7195_v63 }
 0x15c   :  { %v7387_v20 = vadd.f32 %v1257_v38, %v1081_v33  ;;  %vm1034_vm2 = vcmp.gt.f32.partialorder %v1010_v28, 0.0  ;;  %v1050_v41 = vmul.f32 0.01, %v1010_v28  ;;  %v7390_v19 = vpop.f32.mrb[59].mxu1  ;;  %vm1226_vm3 = vcmp.gt.f32.partialorder %v1202_v32, 0.0 }
 0x15d   :  { %v1260_v48 = vsel %vm1228_vm1, %v1210_v16, %v1244_v9  ;;  %v1242_v31 = vmul.f32 0.01, %v1202_v32  ;;  %vm1407_vm4 = vcmp.gt.f32.partialorder %v1351_v29, 0.0  ;;  %v1423_v53 = vmul.f32 0.01, %v1351_v29 }
 0x15e   :  { %v7392_v47 = vadd.f32 %v1260_v48, %v1084_v2  ;;  %v1066_v8 = vsel %vm1034_vm2, %v1010_v28, %v1050_v41  ;;  %v1543_v40 = vadd.f32 %v7309_v60, %v7285_v15  ;;  %v1343_v63 = vadd.f32 %v7309_v60, %v7287_v49 }
 0x15f   :  { %v1082_v12 = vadd.f32 %v1066_v8, %v7208_v27  ;;  %v1258_v42 = vsel %vm1226_vm3, %v1202_v32, %v1242_v31  ;;  %v1535_v34 = vadd.f32 %v7309_v60, %v7293_v25  ;;  %v1439_v3 = vsel %vm1407_vm4, %v1351_v29, %v1423_v53 }
 0x160   :  { %vm1599_vm5 = vcmp.gt.f32.partialorder %v1543_v40, 0.0  ;;  %v1615_v36 = vmul.f32 0.01, %v1543_v40  ;;  %v1354_v23 = vadd.f32 %v7309_v60, %v7295_v14  ;;  %v7403_v18 = vpop.f32.mrb[60].mxu0  ;;  %v1455_v15 = vadd.f32 %v1439_v3, %v7219_v62  ;;  %v7408_v16 = vpop.f32.mrb[60].mxu1 }
 0x161   :  { %v7405_v51 = vadd.f32 %v1258_v42, %v1082_v12  ;;  %vm1405_vm6 = vcmp.gt.f32.partialorder %v1343_v63, 0.0  ;;  %v1421_v27 = vmul.f32 0.01, %v1343_v63  ;;  %v7410_v49 = vpop.f32.mrb[61].mxu0  ;;  %vm1597_vm0 = vcmp.gt.f32.partialorder %v1535_v34, 0.0  ;;  %v7412_v38 = vpop.f32.mrb[61].mxu1 }
 0x162   :  { %v1631_v33 = vsel %vm1599_vm5, %v1543_v40, %v1615_v36  ;;  %v1613_v25 = vmul.f32 0.01, %v1535_v34  ;;  %vm1408_vm7 = vcmp.gt.f32.partialorder %v1354_v23, 0.0  ;;  %v7414_v28 = vpop.f32.mrb[62].mxu0  ;;  %v1424_v61 = vmul.f32 0.01, %v1354_v23 }
 0x163   :  { %v7416_v14 = vadd.f32 %v1631_v33, %v1455_v15  ;;  %v1437_v32 = vsel %vm1405_vm6, %v1343_v63, %v1421_v27  ;;  %v1546_v62 = vadd.f32 %v7309_v60, %v7302_v22  ;;  %v7420_v9 = vpop.f32.mrb[62].mxu1  ;;  %v7422_v29 = vpop.f32.mrb[63].mxu0  ;;  %v1346_v48 = vadd.f32 %v7309_v60, %v7304_v56 }
 0x164   :  { %v1453_v2 = vadd.f32 %v1437_v32, %v7236_v55  ;;  %v1629_v41 = vsel %vm1597_vm0, %v1535_v34, %v1613_v25  ;;  %v1538_v31 = vadd.f32 %v7309_v60, %v7313_v35  ;;  %v7429_v8 = vpop.f32.mrb[63].mxu1  ;;  %v1440_v53 = vsel %vm1408_vm7, %v1354_v23, %v1424_v61 }
 0x165   :  { %vm1600_vm8 = vcmp.gt.f32.partialorder %v1546_v62, 0.0  ;;  %v1616_v40 = vmul.f32 0.01, %v1546_v62  ;;  %v1367_v22 = vadd.f32 %v7309_v60, %v7327_v44  ;;  %v1456_v42 = vadd.f32 %v1440_v53, %v7239_v6 }
 0x166   :  { %v7433_v12 = vadd.f32 %v1629_v41, %v1453_v2  ;;  %vm1406_vm9 = vcmp.gt.f32.partialorder %v1346_v48, 0.0  ;;  %v1422_v55 = vmul.f32 0.01, %v1346_v48  ;;  %vm1598_vm10 = vcmp.gt.f32.partialorder %v1538_v31, 0.0 }
 0x167   :  { %v1632_v63 = vsel %vm1600_vm8, %v1546_v62, %v1616_v40  ;;  %v1614_v56 = vmul.f32 0.01, %v1538_v31  ;;  %vm1411_vm11 = vcmp.gt.f32.partialorder %v1367_v22, 0.0  ;;  %v1427_v3 = vmul.f32 0.01, %v1367_v22 }
 0x168   :  { %v7436_v34 = vadd.f32 %v1632_v63, %v1456_v42  ;;  %v1438_v35 = vsel %vm1406_vm9, %v1346_v48, %v1422_v55  ;;  %v1559_v36 = vadd.f32 %v7309_v60, %v7331_v0  ;;  %v7440_v23 = vpop.f32.mrb[64].mxu0  ;;  %v1359_v6 = vadd.f32 %v7309_v60, %v7333_v30  ;;  %v7447_v33 = vpop.f32.mrb[64].mxu1 }
 0x169   :  { %v1454_v44 = vadd.f32 %v1438_v35, %v7260_v26  ;;  %v1630_v15 = vsel %vm1598_vm10, %v1538_v31, %v1614_v56  ;;  %v1551_v27 = vadd.f32 %v7309_v60, %v7338_v1  ;;  %v7449_v25 = vpop.f32.mrb[65].mxu0  ;;  %v1443_v32 = vsel %vm1411_vm11, %v1367_v22, %v1427_v3  ;;  %v7453_v62 = vpop.f32.mrb[65].mxu1 }
 0x16a   :  { %vm1603_vm12 = vcmp.gt.f32.partialorder %v1559_v36, 0.0  ;;  %v1619_v61 = vmul.f32 0.01, %v1559_v36  ;;  %v1370_v0 = vadd.f32 %v7309_v60, %v7340_v54  ;;  %v7455_v26 = vpop.f32.mrb[66].mxu0  ;;  %v1459_v30 = vadd.f32 %v1443_v32, %v7269_v58  ;;  %v7460_v41 = vpop.f32.mrb[66].mxu1 }
 0x16b   :  { %v7457_v2 = vadd.f32 %v1630_v15, %v1454_v44  ;;  %vm1409_vm13 = vcmp.gt.f32.partialorder %v1359_v6, 0.0  ;;  %v1425_v1 = vmul.f32 0.01, %v1359_v6  ;;  %v7462_v48 = vpop.f32.mrb[67].mxu0  ;;  %vm1601_vm14 = vcmp.gt.f32.partialorder %v1551_v27, 0.0  ;;  %v7464_v40 = vpop.f32.mrb[67].mxu1 }
 0x16c   :  { %v1635_v31 = vsel %vm1603_vm12, %v1559_v36, %v1619_v61  ;;  %v1617_v53 = vmul.f32 0.01, %v1551_v27  ;;  %vm1412_vm15 = vcmp.gt.f32.partialorder %v1370_v0, 0.0  ;;  %v1428_v42 = vmul.f32 0.01, %v1370_v0 }
 0x16d   :  { %v7466_v54 = vadd.f32 %v1635_v31, %v1459_v30  ;;  %v1441_v22 = vsel %vm1409_vm13, %v1359_v6, %v1425_v1  ;;  %v1562_v55 = vadd.f32 %v7309_v60, %v7342_v5  ;;  %v1362_v56 = vadd.f32 %v7309_v60, %v7344_v46 }
 0x16e   :  { %v1457_v58 = vadd.f32 %v1441_v22, %v7280_v39  ;;  %v1633_v63 = vsel %vm1601_vm14, %v1551_v27, %v1617_v53  ;;  %v1554_v35 = vadd.f32 %v7309_v60, %v7350_v11  ;;  %v1444_v3 = vsel %vm1412_vm15, %v1370_v0, %v1428_v42 }
 0x16f   :  { %vm1604_vm1 = vcmp.gt.f32.partialorder %v1562_v55, 0.0  ;;  %v1620_v36 = vmul.f32 0.01, %v1562_v55  ;;  %v1383_v44 = vadd.f32 %v7309_v60, %v7362_v52  ;;  %v1460_v6 = vadd.f32 %v1444_v3, %v7289_v21 }
 0x170   :  { %v7477_v15 = vadd.f32 %v1633_v63, %v1457_v58  ;;  %vm1410_vm2 = vcmp.gt.f32.partialorder %v1362_v56, 0.0  ;;  %v1426_v5 = vmul.f32 0.01, %v1362_v56  ;;  %v7480_v39 = vpop.f32.mrb[68].mxu0  ;;  %vm1602_vm3 = vcmp.gt.f32.partialorder %v1554_v35, 0.0  ;;  %v7482_v32 = vpop.f32.mrb[68].mxu1 }
 0x171   :  { %v1636_v27 = vsel %vm1604_vm1, %v1562_v55, %v1620_v36  ;;  %v1618_v46 = vmul.f32 0.01, %v1554_v35  ;;  %vm1415_vm4 = vcmp.gt.f32.partialorder %v1383_v44, 0.0  ;;  %v7484_v11 = vpop.f32.mrb[69].mxu0  ;;  %v1431_v52 = vmul.f32 0.01, %v1383_v44 }
 0x172   :  { %v7486_v61 = vadd.f32 %v1636_v27, %v1460_v6  ;;  %v1442_v0 = vsel %vm1410_vm2, %v1362_v56, %v1426_v5  ;;  %v1575_v30 = vadd.f32 %v7309_v60, %v7368_v59  ;;  %v7490_v21 = vpop.f32.mrb[69].mxu1  ;;  %v7492_v1 = vpop.f32.mrb[70].mxu0  ;;  %v1375_v22 = vadd.f32 %v7309_v60, %v7370_v43 }
 0x173   :  { %v1458_v31 = vadd.f32 %v1442_v0, %v7315_v10  ;;  %v1634_v53 = vsel %vm1602_vm3, %v1554_v35, %v1618_v46  ;;  %v1567_v42 = vadd.f32 %v7309_v60, %v7377_v4  ;;  %v7499_v55 = vpop.f32.mrb[70].mxu1  ;;  %v7501_v58 = vpop.f32.mrb[71].mxu0  ;;  %v1447_v63 = vsel %vm1415_vm4, %v1383_v44, %v1431_v52 }
 0x174   :  { %vm1607_vm5 = vcmp.gt.f32.partialorder %v1575_v30, 0.0  ;;  %v1623_v59 = vmul.f32 0.01, %v1575_v30  ;;  %v1386_v56 = vadd.f32 %v7309_v60, %v7379_v57  ;;  %v7505_v3 = vpop.f32.mrb[71].mxu1  ;;  %v1463_v35 = vadd.f32 %v1447_v63, %v7318_v17 }
 0x175   :  { %v7507_v10 = vadd.f32 %v1634_v53, %v1458_v31  ;;  %vm1413_vm6 = vcmp.gt.f32.partialorder %v1375_v22, 0.0  ;;  %v1429_v43 = vmul.f32 0.01, %v1375_v22  ;;  %vm1605_vm0 = vcmp.gt.f32.partialorder %v1567_v42, 0.0 }
 0x176   :  { %v1639_v36 = vsel %vm1607_vm5, %v1575_v30, %v1623_v59  ;;  %v1621_v4 = vmul.f32 0.01, %v1567_v42  ;;  %vm1416_vm7 = vcmp.gt.f32.partialorder %v1386_v56, 0.0  ;;  %v1432_v5 = vmul.f32 0.01, %v1386_v56 }
 0x177   :  { %v7510_v6 = vadd.f32 %v1639_v36, %v1463_v35  ;;  %v1445_v44 = vsel %vm1413_vm6, %v1375_v22, %v1429_v43  ;;  %v1578_v27 = vadd.f32 %v7309_v60, %v7383_v37  ;;  %v1378_v0 = vadd.f32 %v7309_v60, %v7385_v45 }
 0x178   :  { %v1461_v57 = vadd.f32 %v1445_v44, %v7335_v7  ;;  %v1637_v46 = vsel %vm1605_vm0, %v1567_v42, %v1621_v4  ;;  %v1570_v17 = vadd.f32 %v7309_v60, %v7390_v19  ;;  %v7519_v52 = vpop.f32.mrb[72].mxu0  ;;  %v1448_v30 = vsel %vm1416_vm7, %v1386_v56, %v1432_v5  ;;  %v7523_v22 = vpop.f32.mrb[72].mxu1 }
 0x179   :  { %vm1608_vm8 = vcmp.gt.f32.partialorder %v1578_v27, 0.0  ;;  %v1624_v31 = vmul.f32 0.01, %v1578_v27  ;;  %v1399_v53 = vadd.f32 %v7309_v60, %v7403_v18  ;;  %v7525_v37 = vpop.f32.mrb[73].mxu0  ;;  %v1464_v42 = vadd.f32 %v1448_v30, %v7346_v13  ;;  %v7530_v63 = vpop.f32.mrb[73].mxu1 }
 0x17a   :  { %v7527_v7 = vadd.f32 %v1637_v46, %v1461_v57  ;;  %vm1414_vm9 = vcmp.gt.f32.partialorder %v1378_v0, 0.0  ;;  %v1430_v45 = vmul.f32 0.01, %v1378_v0  ;;  %v7532_v19 = vpop.f32.mrb[74].mxu0  ;;  %vm1606_vm10 = vcmp.gt.f32.partialorder %v1570_v17, 0.0  ;;  %v7534_v35 = vpop.f32.mrb[74].mxu1 }
 0x17b   :  { %v1640_v59 = vsel %vm1608_vm8, %v1578_v27, %v1624_v31  ;;  %v1622_v56 = vmul.f32 0.01, %v1570_v17  ;;  %vm1419_vm11 = vcmp.gt.f32.partialorder %v1399_v53, 0.0  ;;  %v7536_v18 = vpop.f32.mrb[75].mxu0  ;;  %v1435_v4 = vmul.f32 0.01, %v1399_v53 }
 0x17c   :  { %v7538_v43 = vadd.f32 %v1640_v59, %v1464_v42  ;;  %v1446_v36 = vsel %vm1414_vm9, %v1378_v0, %v1430_v45  ;;  %v1591_v13 = vadd.f32 %v7309_v60, %v7408_v16  ;;  %v7542_v44 = vpop.f32.mrb[75].mxu1  ;;  %v1391_v27 = vadd.f32 %v7309_v60, %v7410_v49 }
 0x17d   :  { %v1462_v5 = vadd.f32 %v1446_v36, %v7359_v50  ;;  %v1638_v57 = vsel %vm1606_vm10, %v1570_v17, %v1622_v56  ;;  %v1583_v46 = vadd.f32 %v7309_v60, %v7412_v38  ;;  %v1451_v30 = vsel %vm1419_vm11, %v1399_v53, %v1435_v4 }
 0x17e   :  { %vm1611_vm12 = vcmp.gt.f32.partialorder %v1591_v13, 0.0  ;;  %v1627_v31 = vmul.f32 0.01, %v1591_v13  ;;  %v1402_v0 = vadd.f32 %v7309_v60, %v7414_v28  ;;  %v1467_v16 = vadd.f32 %v1451_v30, %v7364_v24 }
 0x17f   :  { %v7551_v42 = vadd.f32 %v1638_v57, %v1462_v5  ;;  %vm1417_vm13 = vcmp.gt.f32.partialorder %v1391_v27, 0.0  ;;  %v1433_v45 = vmul.f32 0.01, %v1391_v27  ;;  %vm1609_vm14 = vcmp.gt.f32.partialorder %v1583_v46, 0.0 }
 0x180   :  { %v1643_v50 = vsel %vm1611_vm12, %v1591_v13, %v1627_v31  ;;  %v1625_v17 = vmul.f32 0.01, %v1583_v46  ;;  %vm1420_vm15 = vcmp.gt.f32.partialorder %v1402_v0, 0.0  ;;  %v7554_v49 = vpop.f32.mrb[76].mxu0  ;;  %v1436_v53 = vmul.f32 0.01, %v1402_v0 }
 0x181   :  { %v7556_v59 = vadd.f32 %v1643_v50, %v1467_v16  ;;  %v1449_v38 = vsel %vm1417_vm13, %v1391_v27, %v1433_v45  ;;  %v1594_v56 = vadd.f32 %v7309_v60, %v7420_v9  ;;  %v7560_v28 = vpop.f32.mrb[76].mxu1  ;;  %v7562_v36 = vpop.f32.mrb[77].mxu0  ;;  %v1394_v13 = vadd.f32 %v7309_v60, %v7422_v29 }
 0x182   :  { %v1465_v24 = vadd.f32 %v1449_v38, %v7387_v20  ;;  %v1641_v4 = vsel %vm1609_vm14, %v1583_v46, %v1625_v17  ;;  %v1586_v5 = vadd.f32 %v7309_v60, %v7429_v8  ;;  %v7569_v57 = vpop.f32.mrb[77].mxu1  ;;  %v7571_v27 = vpop.f32.mrb[78].mxu0  ;;  %v1452_v30 = vsel %vm1420_vm15, %v1402_v0, %v1436_v53 }
 0x183   :  { %vm1612_vm1 = vcmp.gt.f32.partialorder %v1594_v56, 0.0  ;;  %v1628_v9 = vmul.f32 0.01, %v1594_v56  ;;  %v1735_v31 = vadd.f32 %v7309_v60, %v7440_v23  ;;  %v7575_v16 = vpop.f32.mrb[78].mxu1  ;;  %v7577_v20 = vpop.f32.mrb[79].mxu0  ;;  %v1468_v29 = vadd.f32 %v1452_v30, %v7392_v47 }
 0x184   :  { %v7579_v46 = vadd.f32 %v1641_v4, %v1465_v24  ;;  %vm1418_vm2 = vcmp.gt.f32.partialorder %v1394_v13, 0.0  ;;  %v1434_v8 = vmul.f32 0.01, %v1394_v13  ;;  %v7582_v45 = vpop.f32.mrb[79].mxu1  ;;  %vm1610_vm3 = vcmp.gt.f32.partialorder %v1586_v5, 0.0 }
 0x185   :  { %v1644_v50 = vsel %vm1612_vm1, %v1594_v56, %v1628_v9  ;;  %v1626_v0 = vmul.f32 0.01, %v1586_v5  ;;  %vm1791_vm4 = vcmp.gt.f32.partialorder %v1735_v31, 0.0  ;;  %v1807_v23 = vmul.f32 0.01, %v1735_v31 }
 0x186   :  { %v7584_v17 = vadd.f32 %v1644_v50, %v1468_v29  ;;  %v1450_v38 = vsel %vm1418_vm2, %v1394_v13, %v1434_v8  ;;  %v1927_v53 = vadd.f32 %v7309_v60, %v7447_v33  ;;  %v1727_v47 = vadd.f32 %v7309_v60, %v7449_v25 }
 0x187   :  { %v1466_v24 = vadd.f32 %v1450_v38, %v7405_v51  ;;  %v1642_v4 = vsel %vm1610_vm3, %v1586_v5, %v1626_v0  ;;  %v1919_v30 = vadd.f32 %v7309_v60, %v7453_v62  ;;  %v1823_v56 = vsel %vm1791_vm4, %v1735_v31, %v1807_v23 }
 0x188   :  { %vm1983_vm5 = vcmp.gt.f32.partialorder %v1927_v53, 0.0  ;;  %v1999_v9 = vmul.f32 0.01, %v1927_v53  ;;  %v1738_v29 = vadd.f32 %v7309_v60, %v7455_v26  ;;  %v7595_v13 = vpop.f32.mrb[80].mxu0  ;;  %v1839_v33 = vadd.f32 %v1823_v56, %v7416_v14  ;;  %v7600_v5 = vpop.f32.mrb[80].mxu1 }
 0x189   :  { %v7597_v8 = vadd.f32 %v1642_v4, %v1466_v24  ;;  %vm1789_vm6 = vcmp.gt.f32.partialorder %v1727_v47, 0.0  ;;  %v1805_v51 = vmul.f32 0.01, %v1727_v47  ;;  %v7602_v25 = vpop.f32.mrb[81].mxu0  ;;  %vm1981_vm0 = vcmp.gt.f32.partialorder %v1919_v30, 0.0  ;;  %v7604_v31 = vpop.f32.mrb[81].mxu1 }
 0x18a   :  { %v2015_v50 = vsel %vm1983_vm5, %v1927_v53, %v1999_v9  ;;  %v1997_v62 = vmul.f32 0.01, %v1919_v30  ;;  %vm1792_vm7 = vcmp.gt.f32.partialorder %v1738_v29, 0.0  ;;  %v7606_v0 = vpop.f32.mrb[82].mxu0  ;;  %v1808_v23 = vmul.f32 0.01, %v1738_v29 }
 0x18b   :  { %8777 = vst [vmem:[#allocation2_spill] sm:$0xff] %v7606_v0  ;;  %v7608_v26 = vadd.f32 %v2015_v50, %v1839_v33  ;;  %v1821_v38 = vsel %vm1789_vm6, %v1727_v47, %v1805_v51  ;;  %v1930_v14 = vadd.f32 %v7309_v60, %v7460_v41  ;;  %v7612_v24 = vpop.f32.mrb[82].mxu1  ;;  %v7614_v4 = vpop.f32.mrb[83].mxu0  ;;  %v1730_v9 = vadd.f32 %v7309_v60, %v7462_v48 }
 0x18c   :  { %8778 = vst [vmem:[#allocation3_spill] sm:$0xff] %v7614_v4  ;;  %v1837_v53 = vadd.f32 %v1821_v38, %v7433_v12  ;;  %v2013_v56 = vsel %vm1981_vm0, %v1919_v30, %v1997_v62  ;;  %v1922_v0 = vadd.f32 %v7309_v60, %v7464_v40  ;;  %v7621_v33 = vpop.f32.mrb[83].mxu1  ;;  %v1824_v47 = vsel %vm1792_vm7, %v1738_v29, %v1808_v23 }
 0x18d   :  { %vm1984_vm8 = vcmp.gt.f32.partialorder %v1930_v14, 0.0  ;;  %v2000_v51 = vmul.f32 0.01, %v1930_v14  ;;  %v1751_v41 = vadd.f32 %v7309_v60, %v7480_v39  ;;  %v1840_v4 = vadd.f32 %v1824_v47, %v7436_v34 }
 0x18e   :  { %v7625_v50 = vadd.f32 %v2013_v56, %v1837_v53  ;;  %vm1790_vm9 = vcmp.gt.f32.partialorder %v1730_v9, 0.0  ;;  %v1806_v12 = vmul.f32 0.01, %v1730_v9  ;;  %vm1982_vm10 = vcmp.gt.f32.partialorder %v1922_v0, 0.0 }
 0x18f   :  { %v2016_v30 = vsel %vm1984_vm8, %v1930_v14, %v2000_v51  ;;  %v1998_v48 = vmul.f32 0.01, %v1922_v0  ;;  %vm1795_vm11 = vcmp.gt.f32.partialorder %v1751_v41, 0.0  ;;  %v1811_v38 = vmul.f32 0.01, %v1751_v41 }
 0x190   :  { %v7628_v62 = vadd.f32 %v2016_v30, %v1840_v4  ;;  %v1822_v40 = vsel %vm1790_vm9, %v1730_v9, %v1806_v12  ;;  %v1943_v29 = vadd.f32 %v7309_v60, %v7482_v32  ;;  %v7632_v23 = vpop.f32.mrb[84].mxu0  ;;  %v1743_v34 = vadd.f32 %v7309_v60, %v7484_v11  ;;  %v7639_v56 = vpop.f32.mrb[84].mxu1 }
 0x191   :  { %v1838_v39 = vadd.f32 %v1822_v40, %v7457_v2  ;;  %v2014_v53 = vsel %vm1982_vm10, %v1922_v0, %v1998_v48  ;;  %v1935_v14 = vadd.f32 %v7309_v60, %v7490_v21  ;;  %v7641_v4 = vpop.f32.mrb[85].mxu0  ;;  %v1827_v9 = vsel %vm1795_vm11, %v1751_v41, %v1811_v38  ;;  %v7645_v51 = vpop.f32.mrb[85].mxu1 }
 0x192   :  { %vm1987_vm12 = vcmp.gt.f32.partialorder %v1943_v29, 0.0  ;;  %v2003_v47 = vmul.f32 0.01, %v1943_v29  ;;  %v1754_v32 = vadd.f32 %v7309_v60, %v7492_v1  ;;  %v7647_v2 = vpop.f32.mrb[86].mxu0  ;;  %v1843_v11 = vadd.f32 %v1827_v9, %v7466_v54  ;;  %v7652_v12 = vpop.f32.mrb[86].mxu1 }
 0x193   :  { %8779 = vst [vmem:[#allocation4_spill] sm:$0xff] %v7647_v2  ;;  %v7649_v0 = vadd.f32 %v2014_v53, %v1838_v39  ;;  %vm1793_vm13 = vcmp.gt.f32.partialorder %v1743_v34, 0.0  ;;  %v1809_v21 = vmul.f32 0.01, %v1743_v34  ;;  %v7654_v30 = vpop.f32.mrb[87].mxu0  ;;  %vm1985_vm14 = vcmp.gt.f32.partialorder %v1935_v14, 0.0 }
 0x194   :  { %8780 = vst [vmem:[#allocation5_spill] sm:$0xff] %v7654_v30  ;;  %v2019_v41 = vsel %vm1987_vm12, %v1943_v29, %v2003_v47  ;;  %v2001_v48 = vmul.f32 0.01, %v1935_v14  ;;  %vm1796_vm15 = vcmp.gt.f32.partialorder %v1754_v32, 0.0  ;;  %v7656_v40 = vpop.f32.mrb[87].mxu1  ;;  %v1946_v39 = vadd.f32 %v7309_v60, %v7499_v55 }
 0x195   :  { %v7658_v1 = vadd.f32 %v2019_v41, %v1843_v11  ;;  %v1825_v38 = vsel %vm1793_vm13, %v1743_v34, %v1809_v21  ;;  %v1812_v2 = vmul.f32 0.01, %v1754_v32  ;;  %v1746_v9 = vadd.f32 %v7309_v60, %v7501_v58 }
 0x196   :  { %v1841_v54 = vadd.f32 %v1825_v38, %v7477_v15  ;;  %v2017_v53 = vsel %vm1985_vm14, %v1935_v14, %v2001_v48  ;;  %v1938_v29 = vadd.f32 %v7309_v60, %v7505_v3  ;;  %vm1988_vm1 = vcmp.gt.f32.partialorder %v1946_v39, 0.0 }
 0x197   :  { %v1828_v47 = vsel %vm1796_vm15, %v1754_v32, %v1812_v2  ;;  %v2004_v30 = vmul.f32 0.01, %v1946_v39  ;;  %v1767_v11 = vadd.f32 %v7309_v60, %v7519_v52  ;;  %vm1794_vm2 = vcmp.gt.f32.partialorder %v1746_v9, 0.0 }
 0x198   :  { %v7669_v34 = vadd.f32 %v2017_v53, %v1841_v54  ;;  %v1844_v21 = vadd.f32 %v1828_v47, %v7486_v61  ;;  %v1810_v55 = vmul.f32 0.01, %v1746_v9  ;;  %v7672_v15 = vpop.f32.mrb[88].mxu0  ;;  %vm1986_vm3 = vcmp.gt.f32.partialorder %v1938_v29, 0.0  ;;  %v7674_v41 = vpop.f32.mrb[88].mxu1 }
 0x199   :  { %v2020_v14 = vsel %vm1988_vm1, %v1946_v39, %v2004_v30  ;;  %v2002_v58 = vmul.f32 0.01, %v1938_v29  ;;  %vm1799_vm4 = vcmp.gt.f32.partialorder %v1767_v11, 0.0  ;;  %v7676_v3 = vpop.f32.mrb[89].mxu0  ;;  %v1815_v52 = vmul.f32 0.01, %v1767_v11 }
 0x19a   :  { %v7678_v32 = vadd.f32 %v2020_v14, %v1844_v21  ;;  %v1826_v2 = vsel %vm1794_vm2, %v1746_v9, %v1810_v55  ;;  %v1959_v48 = vadd.f32 %v7309_v60, %v7523_v22  ;;  %v7682_v61 = vpop.f32.mrb[89].mxu1  ;;  %v7684_v38 = vpop.f32.mrb[90].mxu0  ;;  %v1759_v54 = vadd.f32 %v7309_v60, %v7525_v37 }
 0x19b   :  { %v1842_v30 = vadd.f32 %v1826_v2, %v7507_v10  ;;  %v2018_v39 = vsel %vm1986_vm3, %v1938_v29, %v2002_v58  ;;  %v1951_v53 = vadd.f32 %v7309_v60, %v7530_v63  ;;  %v7691_v47 = vpop.f32.mrb[90].mxu1  ;;  %v7693_v9 = vpop.f32.mrb[91].mxu0  ;;  %v1831_v21 = vsel %vm1799_vm4, %v1767_v11, %v1815_v52 }
 0x19c   :  { %8781 = vst [vmem:[#allocation6_spill] sm:$0xff] %v7693_v9  ;;  %vm1991_vm5 = vcmp.gt.f32.partialorder %v1959_v48, 0.0  ;;  %v2007_v22 = vmul.f32 0.01, %v1959_v48  ;;  %v1770_v55 = vadd.f32 %v7309_v60, %v7532_v19  ;;  %v7697_v14 = vpop.f32.mrb[91].mxu1  ;;  %v1847_v29 = vadd.f32 %v1831_v21, %v7510_v6 }
 0x19d   :  { %8782 = vst [vmem:[#allocation7_spill] sm:$0xff] %v7697_v14  ;;  %v7699_v10 = vadd.f32 %v2018_v39, %v1842_v30  ;;  %vm1797_vm6 = vcmp.gt.f32.partialorder %v1759_v54, 0.0  ;;  %v1813_v37 = vmul.f32 0.01, %v1759_v54  ;;  %vm1989_vm0 = vcmp.gt.f32.partialorder %v1951_v53, 0.0 }
 0x19e   :  { %v2023_v58 = vsel %vm1991_vm5, %v1959_v48, %v2007_v22  ;;  %v2005_v63 = vmul.f32 0.01, %v1951_v53  ;;  %vm1800_vm7 = vcmp.gt.f32.partialorder %v1770_v55, 0.0  ;;  %v1816_v52 = vmul.f32 0.01, %v1770_v55 }
 0x19f   :  { %v7702_v2 = vadd.f32 %v2023_v58, %v1847_v29  ;;  %v1829_v11 = vsel %vm1797_vm6, %v1759_v54, %v1813_v37  ;;  %v1962_v9 = vadd.f32 %v7309_v60, %v7534_v35  ;;  %v1762_v30 = vadd.f32 %v7309_v60, %v7536_v18 }
 0x1a0   :  { %v1845_v19 = vadd.f32 %v1829_v11, %v7527_v7  ;;  %v2021_v14 = vsel %vm1989_vm0, %v1951_v53, %v2005_v63  ;;  %v1954_v6 = vadd.f32 %v7309_v60, %v7542_v44  ;;  %v7711_v48 = vpop.f32.mrb[92].mxu0  ;;  %v1832_v39 = vsel %vm1800_vm7, %v1770_v55, %v1816_v52  ;;  %v7715_v22 = vpop.f32.mrb[92].mxu1 }
 0x1a1   :  { %vm1992_vm8 = vcmp.gt.f32.partialorder %v1962_v9, 0.0  ;;  %v2008_v21 = vmul.f32 0.01, %v1962_v9  ;;  %v1783_v54 = vadd.f32 %v7309_v60, %v7554_v49  ;;  %v7717_v35 = vpop.f32.mrb[93].mxu0  ;;  %v1848_v53 = vadd.f32 %v1832_v39, %v7538_v43  ;;  %v7722_v29 = vpop.f32.mrb[93].mxu1 }
 0x1a2   :  { %v7719_v7 = vadd.f32 %v2021_v14, %v1845_v19  ;;  %vm1798_vm9 = vcmp.gt.f32.partialorder %v1762_v30, 0.0  ;;  %v1814_v18 = vmul.f32 0.01, %v1762_v30  ;;  %v7724_v44 = vpop.f32.mrb[94].mxu0  ;;  %vm1990_vm10 = vcmp.gt.f32.partialorder %v1954_v6, 0.0  ;;  %v7726_v58 = vpop.f32.mrb[94].mxu1 }
 0x1a3   :  { %v2024_v55 = vsel %vm1992_vm8, %v1962_v9, %v2008_v21  ;;  %v2006_v37 = vmul.f32 0.01, %v1954_v6  ;;  %vm1803_vm11 = vcmp.gt.f32.partialorder %v1783_v54, 0.0  ;;  %8783 = vst [vmem:[#allocation8_spill] sm:$0xff] %v7726_v58  ;;  %v7728_v49 = vpop.f32.mrb[95].mxu0  ;;  %v1975_v43 = vadd.f32 %v7309_v60, %v7560_v28  ;;  %v7734_v52 = vpop.f32.mrb[95].mxu1 }
 0x1a4   :  { %v7730_v63 = vadd.f32 %v2024_v55, %v1848_v53  ;;  %v1830_v14 = vsel %vm1798_vm9, %v1762_v30, %v1814_v18  ;;  %v1819_v11 = vmul.f32 0.01, %v1783_v54  ;;  %v1775_v9 = vadd.f32 %v7309_v60, %v7562_v36 }
 0x1a5   :  { %v1846_v19 = vadd.f32 %v1830_v14, %v7551_v42  ;;  %v2022_v39 = vsel %vm1990_vm10, %v1954_v6, %v2006_v37  ;;  %v1967_v21 = vadd.f32 %v7309_v60, %v7569_v57  ;;  %vm1995_vm12 = vcmp.gt.f32.partialorder %v1975_v43, 0.0 }
 0x1a6   :  { %v1835_v58 = vsel %vm1803_vm11, %v1783_v54, %v1819_v11  ;;  %v2011_v53 = vmul.f32 0.01, %v1975_v43  ;;  %v1786_v30 = vadd.f32 %v7309_v60, %v7571_v27  ;;  %vm1801_vm13 = vcmp.gt.f32.partialorder %v1775_v9, 0.0 }
 0x1a7   :  { %v7743_v18 = vadd.f32 %v2022_v39, %v1846_v19  ;;  %v1851_v28 = vadd.f32 %v1835_v58, %v7556_v59  ;;  %v1817_v55 = vmul.f32 0.01, %v1775_v9  ;;  %vm1993_vm14 = vcmp.gt.f32.partialorder %v1967_v21, 0.0 }
 0x1a8   :  { %v2027_v42 = vsel %vm1995_vm12, %v1975_v43, %v2011_v53  ;;  %v2009_v6 = vmul.f32 0.01, %v1967_v21  ;;  %vm1804_vm15 = vcmp.gt.f32.partialorder %v1786_v30, 0.0  ;;  %v7746_v36 = vpop.f32.mrb[96].mxu0  ;;  %v1820_v54 = vmul.f32 0.01, %v1786_v30 }
 0x1a9   :  { %v7748_v37 = vadd.f32 %v2027_v42, %v1851_v28  ;;  %v1833_v57 = vsel %vm1801_vm13, %v1775_v9, %v1817_v55  ;;  %v1978_v14 = vadd.f32 %v7309_v60, %v7575_v16  ;;  %v7752_v27 = vpop.f32.mrb[96].mxu1  ;;  %v7754_v11 = vpop.f32.mrb[97].mxu0  ;;  %v1778_v43 = vadd.f32 %v7309_v60, %v7577_v20 }
 0x1aa   :  { %v1849_v59 = vadd.f32 %v1833_v57, %v7579_v46  ;;  %v2025_v58 = vsel %vm1993_vm14, %v1967_v21, %v2009_v6  ;;  %v1970_v19 = vadd.f32 %v7309_v60, %v7582_v45  ;;  %v7761_v39 = vpop.f32.mrb[97].mxu1  ;;  %v7763_v9 = vpop.f32.mrb[98].mxu0  ;;  %v1836_v53 = vsel %vm1804_vm15, %v1786_v30, %v1820_v54 }
 0x1ab   :  { %vm1996_vm1 = vcmp.gt.f32.partialorder %v1978_v14, 0.0  ;;  %v2012_v16 = vmul.f32 0.01, %v1978_v14  ;;  %v2119_v28 = vadd.f32 %v7309_v60, %v7595_v13  ;;  %v7767_v55 = vpop.f32.mrb[98].mxu1  ;;  %v7769_v46 = vpop.f32.mrb[99].mxu0  ;;  %v1852_v20 = vadd.f32 %v1836_v53, %v7584_v17 }
 0x1ac   :  { %8784 = vst [vmem:[#allocation9_spill] sm:$0xff] %v7767_v55  ;;  %v7771_v21 = vadd.f32 %v2025_v58, %v1849_v59  ;;  %vm1802_vm2 = vcmp.gt.f32.partialorder %v1778_v43, 0.0  ;;  %v1818_v45 = vmul.f32 0.01, %v1778_v43  ;;  %v7774_v42 = vpop.f32.mrb[99].mxu1  ;;  %vm1994_vm3 = vcmp.gt.f32.partialorder %v1970_v19, 0.0 }
 0x1ad   :  { %8785 = vst [vmem:[#allocation10_spill] sm:$0xff] %v7774_v42  ;;  %v2028_v6 = vsel %vm1996_vm1, %v1978_v14, %v2012_v16  ;;  %v2010_v30 = vmul.f32 0.01, %v1970_v19  ;;  %vm2175_vm4 = vcmp.gt.f32.partialorder %v2119_v28, 0.0  ;;  %v2191_v13 = vmul.f32 0.01, %v2119_v28 }
 0x1ae   :  { %v7776_v57 = vadd.f32 %v2028_v6, %v1852_v20  ;;  %v1834_v54 = vsel %vm1802_vm2, %v1778_v43, %v1818_v45  ;;  %v2311_v55 = vadd.f32 %v7309_v60, %v7600_v5  ;;  %v2111_v17 = vadd.f32 %v7309_v60, %v7602_v25  ;;  %v8786_v42 = vld [vmem:[#allocation2_spill] sm:$0xff] }
 0x1af   :  { %v1850_v59 = vadd.f32 %v1834_v54, %v7597_v8  ;;  %v2026_v58 = vsel %vm1994_vm3, %v1970_v19, %v2010_v30  ;;  %v2303_v53 = vadd.f32 %v7309_v60, %v7604_v31  ;;  %v2207_v14 = vsel %vm2175_vm4, %v2119_v28, %v2191_v13 }
 0x1b0   :  { %vm2367_vm5 = vcmp.gt.f32.partialorder %v2311_v55, 0.0  ;;  %v2383_v16 = vmul.f32 0.01, %v2311_v55  ;;  %v2122_v20 = vadd.f32 %v7309_v60, %v8786_v42  ;;  %v7787_v43 = vpop.f32.mrb[100].mxu0  ;;  %v2223_v5 = vadd.f32 %v2207_v14, %v7608_v26  ;;  %v7792_v19 = vpop.f32.mrb[100].mxu1 }
 0x1b1   :  { %v7789_v45 = vadd.f32 %v2026_v58, %v1850_v59  ;;  %vm2173_vm6 = vcmp.gt.f32.partialorder %v2111_v17, 0.0  ;;  %v2189_v8 = vmul.f32 0.01, %v2111_v17  ;;  %v7794_v25 = vpop.f32.mrb[101].mxu0  ;;  %vm2365_vm0 = vcmp.gt.f32.partialorder %v2303_v53, 0.0  ;;  %v7796_v28 = vpop.f32.mrb[101].mxu1 }
 0x1b2   :  { %v2399_v6 = vsel %vm2367_vm5, %v2311_v55, %v2383_v16  ;;  %v2381_v31 = vmul.f32 0.01, %v2303_v53  ;;  %vm2176_vm7 = vcmp.gt.f32.partialorder %v2122_v20, 0.0  ;;  %v7798_v30 = vpop.f32.mrb[102].mxu0  ;;  %v2192_v54 = vmul.f32 0.01, %v2122_v20 }
 0x1b3   :  { %8787 = vst [vmem:[#allocation2_spill] sm:$0xff] %v7798_v30  ;;  %v7800_v60 = vadd.f32 %v2399_v6, %v2223_v5  ;;  %v2205_v42 = vsel %vm2173_vm6, %v2111_v17, %v2189_v8  ;;  %v7805_v26 = vld [vmem:[%s8768_s2] ss:$0 sm:$0xff]  ;;  %v7809_v55 = vpop.f32.mrb[102].mxu1  ;;  %v7811_v59 = vpop.f32.mrb[103].mxu0  ;;  %v8790_v16 = vld [vmem:[#allocation3_spill] sm:$0xff] }
 0x1b4   :  { %v2314_v13 = vadd.f32 %v7805_v26, %v7612_v24  ;;  %8788 = vst [vmem:[#allocation11_spill] sm:$0xff] %v7809_v55  ;;  %8789 = vst [vmem:[#allocation12_spill] sm:$0xff] %v7811_v59  ;;  %v2221_v58 = vadd.f32 %v2205_v42, %v7625_v50  ;;  %v2397_v14 = vsel %vm2365_vm0, %v2303_v53, %v2381_v31  ;;  %v7818_v8 = vpop.f32.mrb[103].mxu1 }
 0x1b5   :  { %v2114_v5 = vadd.f32 %v7805_v26, %v8790_v16  ;;  %v2306_v17 = vadd.f32 %v7805_v26, %v7621_v33  ;;  %v2208_v6 = vsel %vm2176_vm7, %v2122_v20, %v2192_v54  ;;  %v2135_v24 = vadd.f32 %v7805_v26, %v7632_v23 }
 0x1b6   :  { %vm2368_vm8 = vcmp.gt.f32.partialorder %v2314_v13, 0.0  ;;  %v2384_v30 = vmul.f32 0.01, %v2314_v13  ;;  %v7822_v55 = vadd.f32 %v2397_v14, %v2221_v58  ;;  %v2224_v59 = vadd.f32 %v2208_v6, %v7628_v62  ;;  %v8791_v6 = vld [vmem:[#allocation4_spill] sm:$0xff] }
 0x1b7   :  { %vm2174_vm9 = vcmp.gt.f32.partialorder %v2114_v5, 0.0  ;;  %v2190_v50 = vmul.f32 0.01, %v2114_v5  ;;  %vm2366_vm10 = vcmp.gt.f32.partialorder %v2306_v17, 0.0  ;;  %v2382_v31 = vmul.f32 0.01, %v2306_v17 }
 0x1b8   :  { %v2400_v53 = vsel %vm2368_vm8, %v2314_v13, %v2384_v30  ;;  %vm2179_vm11 = vcmp.gt.f32.partialorder %v2135_v24, 0.0  ;;  %v2195_v16 = vmul.f32 0.01, %v2135_v24  ;;  %v2327_v20 = vadd.f32 %v7805_v26, %v7639_v56  ;;  %v7829_v54 = vpop.f32.mrb[104].mxu0  ;;  %v7836_v13 = vpop.f32.mrb[104].mxu1 }
 0x1b9   :  { %v7825_v42 = vadd.f32 %v2400_v53, %v2224_v59  ;;  %v2206_v33 = vsel %vm2174_vm9, %v2114_v5, %v2190_v50  ;;  %v2398_v58 = vsel %vm2366_vm10, %v2306_v17, %v2382_v31  ;;  %v2127_v62 = vadd.f32 %v7805_v26, %v7641_v4  ;;  %v7838_v59 = vpop.f32.mrb[105].mxu0  ;;  %v7842_v50 = vpop.f32.mrb[105].mxu1 }
 0x1ba   :  { %v2222_v23 = vadd.f32 %v2206_v33, %v7649_v0  ;;  %v2319_v30 = vadd.f32 %v7805_v26, %v7645_v51  ;;  %v2211_v14 = vsel %vm2179_vm11, %v2135_v24, %v2195_v16  ;;  %vm2371_vm12 = vcmp.gt.f32.partialorder %v2327_v20, 0.0  ;;  %8792 = vst [vmem:[#allocation3_spill] sm:$0xff] %v7842_v50  ;;  %v7844_v0 = vpop.f32.mrb[106].mxu0  ;;  %v7849_v53 = vpop.f32.mrb[106].mxu1 }
 0x1bb   :  { %v2387_v5 = vmul.f32 0.01, %v2327_v20  ;;  %v2138_v56 = vadd.f32 %v7805_v26, %v8791_v6  ;;  %8793 = vst [vmem:[#allocation4_spill] sm:$0xff] %v7844_v0  ;;  %v2227_v4 = vadd.f32 %v2211_v14, %v7658_v1  ;;  %vm2177_vm13 = vcmp.gt.f32.partialorder %v2127_v62, 0.0  ;;  %8794 = vst [vmem:[#allocation13_spill] sm:$0xff] %v7849_v53  ;;  %v7851_v31 = vpop.f32.mrb[107].mxu0 }
 0x1bc   :  { %v7846_v17 = vadd.f32 %v2398_v58, %v2222_v23  ;;  %v2193_v51 = vmul.f32 0.01, %v2127_v62  ;;  %8795 = vst [vmem:[#allocation14_spill] sm:$0xff] %v7851_v31  ;;  %vm2369_vm14 = vcmp.gt.f32.partialorder %v2319_v30, 0.0  ;;  %v2385_v33 = vmul.f32 0.01, %v2319_v30 }
 0x1bd   :  { %v2403_v24 = vsel %vm2371_vm12, %v2327_v20, %v2387_v5  ;;  %vm2180_vm15 = vcmp.gt.f32.partialorder %v2138_v56, 0.0  ;;  %v7853_v16 = vpop.f32.mrb[107].mxu1  ;;  %v2196_v0 = vmul.f32 0.01, %v2138_v56  ;;  %v2330_v23 = vadd.f32 %v7805_v26, %v7652_v12  ;;  %v8796_v14 = vld [vmem:[#allocation5_spill] sm:$0xff] }
 0x1be   :  { %v7855_v6 = vadd.f32 %v2403_v24, %v2227_v4  ;;  %v2209_v50 = vsel %vm2177_vm13, %v2127_v62, %v2193_v51  ;;  %v2401_v58 = vsel %vm2369_vm14, %v2319_v30, %v2385_v33  ;;  %v2130_v53 = vadd.f32 %v7805_v26, %v8796_v14 }
 0x1bf   :  { %v2225_v1 = vadd.f32 %v2209_v50, %v7669_v34  ;;  %v2322_v20 = vadd.f32 %v7805_v26, %v7656_v40  ;;  %v2212_v5 = vsel %vm2180_vm15, %v2138_v56, %v2196_v0  ;;  %vm2372_vm1 = vcmp.gt.f32.partialorder %v2330_v23, 0.0 }
 0x1c0   :  { %v2388_v31 = vmul.f32 0.01, %v2330_v23  ;;  %v2151_v4 = vadd.f32 %v7805_v26, %v7672_v15  ;;  %v2228_v51 = vadd.f32 %v2212_v5, %v7678_v32  ;;  %vm2178_vm2 = vcmp.gt.f32.partialorder %v2130_v53, 0.0  ;;  %v7869_v34 = vpop.f32.mrb[108].mxu0  ;;  %v7871_v24 = vpop.f32.mrb[108].mxu1 }
 0x1c1   :  { %v7866_v62 = vadd.f32 %v2401_v58, %v2225_v1  ;;  %v2194_v12 = vmul.f32 0.01, %v2130_v53  ;;  %vm2370_vm3 = vcmp.gt.f32.partialorder %v2322_v20, 0.0  ;;  %v2386_v50 = vmul.f32 0.01, %v2322_v20  ;;  %v7873_v40 = vpop.f32.mrb[109].mxu0 }
 0x1c2   :  { %v2404_v30 = vsel %vm2372_vm1, %v2330_v23, %v2388_v31  ;;  %vm2183_vm4 = vcmp.gt.f32.partialorder %v2151_v4, 0.0  ;;  %v2199_v15 = vmul.f32 0.01, %v2151_v4  ;;  %v2343_v33 = vadd.f32 %v7805_v26, %v7674_v41  ;;  %v7879_v32 = vpop.f32.mrb[109].mxu1  ;;  %v7881_v1 = vpop.f32.mrb[110].mxu0 }
 0x1c3   :  { %v7875_v56 = vadd.f32 %v2404_v30, %v2228_v51  ;;  %v2210_v0 = vsel %vm2178_vm2, %v2130_v53, %v2194_v12  ;;  %v2402_v23 = vsel %vm2370_vm3, %v2322_v20, %v2386_v50  ;;  %v2143_v58 = vadd.f32 %v7805_v26, %v7676_v3  ;;  %v7888_v5 = vpop.f32.mrb[110].mxu1  ;;  %v7890_v53 = vpop.f32.mrb[111].mxu0 }
 0x1c4   :  { %v2226_v31 = vadd.f32 %v2210_v0, %v7699_v10  ;;  %v2335_v14 = vadd.f32 %v7805_v26, %v7682_v61  ;;  %8797 = vst [vmem:[#allocation5_spill] sm:$0xff] %v7890_v53  ;;  %v2215_v51 = vsel %vm2183_vm4, %v2151_v4, %v2199_v15  ;;  %vm2375_vm5 = vcmp.gt.f32.partialorder %v2343_v33, 0.0  ;;  %v7894_v30 = vpop.f32.mrb[111].mxu1 }
 0x1c5   :  { %v2391_v41 = vmul.f32 0.01, %v2343_v33  ;;  %v2154_v12 = vadd.f32 %v7805_v26, %v7684_v38  ;;  %8798 = vst [vmem:[#allocation15_spill] sm:$0xff] %v7894_v30  ;;  %v2231_v20 = vadd.f32 %v2215_v51, %v7702_v2  ;;  %vm2181_vm6 = vcmp.gt.f32.partialorder %v2143_v58, 0.0  ;;  %v8800_v2 = vld [vmem:[#allocation7_spill] sm:$0xff] }
 0x1c6   :  { %v7896_v10 = vadd.f32 %v2402_v23, %v2226_v31  ;;  %v2197_v3 = vmul.f32 0.01, %v2143_v58  ;;  %vm2373_vm0 = vcmp.gt.f32.partialorder %v2335_v14, 0.0  ;;  %v2389_v61 = vmul.f32 0.01, %v2335_v14  ;;  %v8799_v31 = vld [vmem:[#allocation6_spill] sm:$0xff] }
 0x1c7   :  { %v2407_v50 = vsel %vm2375_vm5, %v2343_v33, %v2391_v41  ;;  %vm2184_vm7 = vcmp.gt.f32.partialorder %v2154_v12, 0.0  ;;  %v2200_v15 = vmul.f32 0.01, %v2154_v12  ;;  %v2346_v53 = vadd.f32 %v7805_v26, %v7691_v47 }
 0x1c8   :  { %v7899_v0 = vadd.f32 %v2407_v50, %v2231_v20  ;;  %v2213_v4 = vsel %vm2181_vm6, %v2143_v58, %v2197_v3  ;;  %v2405_v30 = vsel %vm2373_vm0, %v2335_v14, %v2389_v61  ;;  %v2146_v23 = vadd.f32 %v7805_v26, %v8799_v31  ;;  %v7908_v33 = vpop.f32.mrb[112].mxu0  ;;  %v7912_v3 = vpop.f32.mrb[112].mxu1 }
 0x1c9   :  { %v2229_v38 = vadd.f32 %v2213_v4, %v7719_v7  ;;  %v2338_v51 = vadd.f32 %v7805_v26, %v8800_v2  ;;  %v2216_v41 = vsel %vm2184_vm7, %v2154_v12, %v2200_v15  ;;  %vm2376_vm8 = vcmp.gt.f32.partialorder %v2346_v53, 0.0  ;;  %v7914_v47 = vpop.f32.mrb[113].mxu0  ;;  %v7919_v61 = vpop.f32.mrb[113].mxu1 }
 0x1ca   :  { %v2392_v20 = vmul.f32 0.01, %v2346_v53  ;;  %v2167_v58 = vadd.f32 %v7805_v26, %v7711_v48  ;;  %v2232_v14 = vadd.f32 %v2216_v41, %v7730_v63  ;;  %vm2182_vm9 = vcmp.gt.f32.partialorder %v2146_v23, 0.0  ;;  %8801 = vst [vmem:[#allocation6_spill] sm:$0xff] %v7919_v61  ;;  %v7921_v4 = vpop.f32.mrb[114].mxu0  ;;  %v7923_v31 = vpop.f32.mrb[114].mxu1 }
 0x1cb   :  { %v7916_v7 = vadd.f32 %v2405_v30, %v2229_v38  ;;  %v2198_v50 = vmul.f32 0.01, %v2146_v23  ;;  %8802 = vst [vmem:[#allocation7_spill] sm:$0xff] %v7921_v4  ;;  %vm2374_vm10 = vcmp.gt.f32.partialorder %v2338_v51, 0.0  ;;  %v2390_v15 = vmul.f32 0.01, %v2338_v51 }
 0x1cc   :  { %v2408_v12 = vsel %vm2376_vm8, %v2346_v53, %v2392_v20  ;;  %vm2187_vm11 = vcmp.gt.f32.partialorder %v2167_v58, 0.0  ;;  %8803 = vst [vmem:[#allocation16_spill] sm:$0xff] %v7923_v31  ;;  %v7925_v48 = vpop.f32.mrb[115].mxu0  ;;  %v2203_v38 = vmul.f32 0.01, %v2167_v58  ;;  %v2359_v63 = vadd.f32 %v7805_v26, %v7715_v22  ;;  %v7931_v41 = vpop.f32.mrb[115].mxu1 }
 0x1cd   :  { %v7927_v2 = vadd.f32 %v2408_v12, %v2232_v14  ;;  %v2214_v30 = vsel %vm2182_vm9, %v2146_v23, %v2198_v50  ;;  %v2406_v4 = vsel %vm2374_vm10, %v2338_v51, %v2390_v15  ;;  %v2159_v53 = vadd.f32 %v7805_v26, %v7717_v35 }
 0x1ce   :  { %v2230_v61 = vadd.f32 %v2214_v30, %v7743_v18  ;;  %v2351_v20 = vadd.f32 %v7805_v26, %v7722_v29  ;;  %v2219_v31 = vsel %vm2187_vm11, %v2167_v58, %v2203_v38  ;;  %vm2379_vm12 = vcmp.gt.f32.partialorder %v2359_v63, 0.0  ;;  %v8804_v30 = vld [vmem:[#allocation8_spill] sm:$0xff] }
 0x1cf   :  { %v2395_v14 = vmul.f32 0.01, %v2359_v63  ;;  %v2170_v23 = vadd.f32 %v7805_v26, %v7724_v44  ;;  %v2235_v22 = vadd.f32 %v2219_v31, %v7748_v37  ;;  %vm2185_vm13 = vcmp.gt.f32.partialorder %v2159_v53, 0.0 }
 0x1d0   :  { %v7940_v50 = vadd.f32 %v2406_v4, %v2230_v61  ;;  %v2201_v12 = vmul.f32 0.01, %v2159_v53  ;;  %vm2377_vm14 = vcmp.gt.f32.partialorder %v2351_v20, 0.0  ;;  %v2393_v51 = vmul.f32 0.01, %v2351_v20  ;;  %v7943_v35 = vpop.f32.mrb[116].mxu0 }
 0x1d1   :  { %v2411_v18 = vsel %vm2379_vm12, %v2359_v63, %v2395_v14  ;;  %vm2188_vm15 = vcmp.gt.f32.partialorder %v2170_v23, 0.0  ;;  %v2204_v58 = vmul.f32 0.01, %v2170_v23  ;;  %v2362_v38 = vadd.f32 %v7805_v26, %v8804_v30  ;;  %v7949_v44 = vpop.f32.mrb[116].mxu1  ;;  %v7951_v61 = vpop.f32.mrb[117].mxu0 }
 0x1d2   :  { %v7945_v15 = vadd.f32 %v2411_v18, %v2235_v22  ;;  %v2217_v29 = vsel %vm2185_vm13, %v2159_v53, %v2201_v12  ;;  %v2409_v4 = vsel %vm2377_vm14, %v2351_v20, %v2393_v51  ;;  %v2162_v31 = vadd.f32 %v7805_v26, %v7728_v49  ;;  %v7958_v14 = vpop.f32.mrb[117].mxu1  ;;  %v7960_v53 = vpop.f32.mrb[118].mxu0 }
 0x1d3   :  { %v2233_v37 = vadd.f32 %v2217_v29, %v7771_v21  ;;  %v2354_v63 = vadd.f32 %v7805_v26, %v7734_v52  ;;  %8805 = vst [vmem:[#allocation8_spill] sm:$0xff] %v7960_v53  ;;  %v2220_v22 = vsel %vm2188_vm15, %v2170_v23, %v2204_v58  ;;  %vm2380_vm1 = vcmp.gt.f32.partialorder %v2362_v38, 0.0  ;;  %v7964_v30 = vpop.f32.mrb[118].mxu1  ;;  %v7966_v21 = vpop.f32.mrb[119].mxu0 }
 0x1d4   :  { %v2396_v12 = vmul.f32 0.01, %v2362_v38  ;;  %v2503_v18 = vadd.f32 %v7805_v26, %v7746_v36  ;;  %8806 = vst [vmem:[#allocation17_spill] sm:$0xff] %v7964_v30  ;;  %v2236_v49 = vadd.f32 %v2220_v22, %v7776_v57  ;;  %vm2186_vm2 = vcmp.gt.f32.partialorder %v2162_v31, 0.0  ;;  %v7971_v51 = vpop.f32.mrb[119].mxu1 }
 0x1d5   :  { %v7968_v20 = vadd.f32 %v2409_v4, %v2233_v37  ;;  %v2202_v52 = vmul.f32 0.01, %v2162_v31  ;;  %vm2378_vm3 = vcmp.gt.f32.partialorder %v2354_v63, 0.0  ;;  %v2394_v23 = vmul.f32 0.01, %v2354_v63 }
 0x1d6   :  { %v2412_v29 = vsel %vm2380_vm1, %v2362_v38, %v2396_v12  ;;  %vm2559_vm4 = vcmp.gt.f32.partialorder %v2503_v18, 0.0  ;;  %v2575_v36 = vmul.f32 0.01, %v2503_v18  ;;  %v2695_v30 = vadd.f32 %v7805_v26, %v7752_v27 }
 0x1d7   :  { %v7973_v58 = vadd.f32 %v2412_v29, %v2236_v49  ;;  %v2218_v53 = vsel %vm2186_vm2, %v2162_v31, %v2202_v52  ;;  %v2410_v4 = vsel %vm2378_vm3, %v2354_v63, %v2394_v23  ;;  %v2495_v57 = vadd.f32 %v7805_v26, %v7754_v11 }
 0x1d8   :  { %v2234_v37 = vadd.f32 %v2218_v53, %v7789_v45  ;;  %v2687_v22 = vadd.f32 %v7805_v26, %v7761_v39  ;;  %v2591_v38 = vsel %vm2559_vm4, %v2503_v18, %v2575_v36  ;;  %vm2751_vm5 = vcmp.gt.f32.partialorder %v2695_v30, 0.0  ;;  %v7984_v31 = vpop.f32.mrb[120].mxu0  ;;  %v7989_v63 = vpop.f32.mrb[120].mxu1 }
 0x1d9   :  { %v2767_v12 = vmul.f32 0.01, %v2695_v30  ;;  %v2506_v49 = vadd.f32 %v7805_v26, %v7763_v9  ;;  %v2607_v27 = vadd.f32 %v2591_v38, %v7800_v60  ;;  %vm2557_vm6 = vcmp.gt.f32.partialorder %v2495_v57, 0.0  ;;  %v7991_v11 = vpop.f32.mrb[121].mxu0  ;;  %v7993_v18 = vpop.f32.mrb[121].mxu1 }
 0x1da   :  { %v7986_v52 = vadd.f32 %v2410_v4, %v2234_v37  ;;  %v2573_v45 = vmul.f32 0.01, %v2495_v57  ;;  %8807 = vst [vmem:[#allocation18_spill] sm:$0xff] %v7991_v11  ;;  %vm2749_vm0 = vcmp.gt.f32.partialorder %v2687_v22, 0.0  ;;  %v2765_v39 = vmul.f32 0.01, %v2687_v22 }
 0x1db   :  { %v2783_v53 = vsel %vm2751_vm5, %v2695_v30, %v2767_v12  ;;  %vm2560_vm7 = vcmp.gt.f32.partialorder %v2506_v49, 0.0  ;;  %8808 = vst [vmem:[#allocation19_spill] sm:$0xff] %v7993_v18  ;;  %v7995_v29 = vpop.f32.mrb[122].mxu0  ;;  %v2576_v36 = vmul.f32 0.01, %v2506_v49  ;;  %v8810_v37 = vld [vmem:[#allocation9_spill] sm:$0xff]  ;;  %v2498_v11 = vadd.f32 %v7805_v26, %v7769_v46 }
 0x1dc   :  { %8809 = vst [vmem:[#allocation20_spill] sm:$0xff] %v7995_v29  ;;  %v7997_v9 = vadd.f32 %v2783_v53, %v2607_v27  ;;  %v2589_v23 = vsel %vm2557_vm6, %v2495_v57, %v2573_v45  ;;  %v2698_v60 = vadd.f32 %v7805_v26, %v8810_v37  ;;  %v8001_v4 = vpop.f32.mrb[122].mxu1  ;;  %v8003_v38 = vpop.f32.mrb[123].mxu0  ;;  %v2781_v12 = vsel %vm2749_vm0, %v2687_v22, %v2765_v39  ;;  %v8812_v18 = vld [vmem:[#allocation10_spill] sm:$0xff] }
 0x1dd   :  { %8811 = vst [vmem:[#allocation9_spill] sm:$0xff] %v8003_v38  ;;  %v2605_v30 = vadd.f32 %v2589_v23, %v7822_v55  ;;  %v2690_v29 = vadd.f32 %v7805_v26, %v8812_v18  ;;  %v8010_v27 = vpop.f32.mrb[123].mxu1  ;;  %v2592_v57 = vsel %vm2560_vm7, %v2506_v49, %v2576_v36  ;;  %v2519_v53 = vadd.f32 %v7805_v26, %v7787_v43 }
 0x1de   :  { %vm2752_vm8 = vcmp.gt.f32.partialorder %v2698_v60, 0.0  ;;  %v2768_v45 = vmul.f32 0.01, %v2698_v60  ;;  %v2608_v38 = vadd.f32 %v2592_v57, %v7825_v42  ;;  %vm2558_vm9 = vcmp.gt.f32.partialorder %v2498_v11, 0.0 }
 0x1df   :  { %v8014_v37 = vadd.f32 %v2781_v12, %v2605_v30  ;;  %v2574_v55 = vmul.f32 0.01, %v2498_v11  ;;  %vm2750_vm10 = vcmp.gt.f32.partialorder %v2690_v29, 0.0  ;;  %v2766_v46 = vmul.f32 0.01, %v2690_v29 }
 0x1e0   :  { %v2784_v22 = vsel %vm2752_vm8, %v2698_v60, %v2768_v45  ;;  %vm2563_vm11 = vcmp.gt.f32.partialorder %v2519_v53, 0.0  ;;  %v2579_v23 = vmul.f32 0.01, %v2519_v53  ;;  %v2711_v49 = vadd.f32 %v7805_v26, %v7792_v19  ;;  %v8021_v36 = vpop.f32.mrb[124].mxu0  ;;  %v8028_v12 = vpop.f32.mrb[124].mxu1  ;;  %v8814_v45 = vld [vmem:[#allocation2_spill] sm:$0xff] }
 0x1e1   :  { %v8017_v39 = vadd.f32 %v2784_v22, %v2608_v38  ;;  %v2590_v18 = vsel %vm2558_vm9, %v2498_v11, %v2574_v55  ;;  %v2782_v30 = vsel %vm2750_vm10, %v2690_v29, %v2766_v46  ;;  %v2511_v42 = vadd.f32 %v7805_v26, %v7794_v25  ;;  %v8030_v38 = vpop.f32.mrb[125].mxu0  ;;  %v8034_v55 = vpop.f32.mrb[125].mxu1 }
 0x1e2   :  { %v2606_v43 = vadd.f32 %v2590_v18, %v7846_v17  ;;  %v2703_v60 = vadd.f32 %v7805_v26, %v7796_v28  ;;  %8813 = vst [vmem:[#allocation10_spill] sm:$0xff] %v8030_v38  ;;  %v2595_v11 = vsel %vm2563_vm11, %v2519_v53, %v2579_v23  ;;  %vm2755_vm12 = vcmp.gt.f32.partialorder %v2711_v49, 0.0  ;;  %8815 = vst [vmem:[#allocation2_spill] sm:$0xff] %v8034_v55  ;;  %v8036_v17 = vpop.f32.mrb[126].mxu0  ;;  %v8041_v22 = vpop.f32.mrb[126].mxu1  ;;  %v8820_v38 = vld [vmem:[#allocation12_spill] sm:$0xff] }
 0x1e3   :  { %v2771_v57 = vmul.f32 0.01, %v2711_v49  ;;  %v2522_v19 = vadd.f32 %v7805_v26, %v8814_v45  ;;  %8816 = vst [vmem:[#allocation21_spill] sm:$0xff] %v8036_v17  ;;  %v2611_v25 = vadd.f32 %v2595_v11, %v7855_v6  ;;  %vm2561_vm13 = vcmp.gt.f32.partialorder %v2511_v42, 0.0  ;;  %8817 = vst [vmem:[#allocation22_spill] sm:$0xff] %v8041_v22  ;;  %v8043_v46 = vpop.f32.mrb[127].mxu0 }
 0x1e4   :  { %v8038_v29 = vadd.f32 %v2782_v30, %v2606_v43  ;;  %v2577_v28 = vmul.f32 0.01, %v2511_v42  ;;  %8818 = vst [vmem:[#allocation23_spill] sm:$0xff] %v8043_v46  ;;  %vm2753_vm14 = vcmp.gt.f32.partialorder %v2703_v60, 0.0  ;;  %v2769_v18 = vmul.f32 0.01, %v2703_v60 }
 0x1e5   :  { %v2787_v53 = vsel %vm2755_vm12, %v2711_v49, %v2771_v57  ;;  %vm2564_vm15 = vcmp.gt.f32.partialorder %v2522_v19, 0.0  ;;  %v8045_v23 = vpop.f32.mrb[127].mxu1  ;;  %v2580_v17 = vmul.f32 0.01, %v2522_v19  ;;  %v8819_v43 = vld [vmem:[#allocation11_spill] sm:$0xff]  ;;  %v2514_v22 = vadd.f32 %v7805_v26, %v8820_v38 }
 0x1e6   :  { %v8047_v45 = vadd.f32 %v2787_v53, %v2611_v25  ;;  %v2593_v55 = vsel %vm2561_vm13, %v2511_v42, %v2577_v28  ;;  %v2714_v30 = vadd.f32 %v7805_v26, %v8819_v43  ;;  %v2785_v11 = vsel %vm2753_vm14, %v2703_v60, %v2769_v18 }
 0x1e7   :  { %v2609_v6 = vadd.f32 %v2593_v55, %v7866_v62  ;;  %v2706_v49 = vadd.f32 %v7805_v26, %v7818_v8  ;;  %v2596_v57 = vsel %vm2564_vm15, %v2522_v19, %v2580_v17  ;;  %v2535_v25 = vadd.f32 %v7805_v26, %v7829_v54 }
 0x1e8   :  { %vm2756_vm1 = vcmp.gt.f32.partialorder %v2714_v30, 0.0  ;;  %v2772_v46 = vmul.f32 0.01, %v2714_v30  ;;  %v2612_v28 = vadd.f32 %v2596_v57, %v7875_v56  ;;  %vm2562_vm2 = vcmp.gt.f32.partialorder %v2514_v22, 0.0  ;;  %v8821_v56 = vld [vmem:[#allocation3_spill] sm:$0xff] }
 0x1e9   :  { %v8058_v42 = vadd.f32 %v2785_v11, %v2609_v6  ;;  %v2578_v53 = vmul.f32 0.01, %v2514_v22  ;;  %vm2754_vm3 = vcmp.gt.f32.partialorder %v2706_v49, 0.0  ;;  %v2770_v60 = vmul.f32 0.01, %v2706_v49  ;;  %v8822_v6 = vld [vmem:[#allocation4_spill] sm:$0xff] }
 0x1ea   :  { %v2788_v62 = vsel %vm2756_vm1, %v2714_v30, %v2772_v46  ;;  %vm2567_vm4 = vcmp.gt.f32.partialorder %v2535_v25, 0.0  ;;  %v2583_v8 = vmul.f32 0.01, %v2535_v25  ;;  %v2727_v19 = vadd.f32 %v7805_v26, %v7836_v13 }
 0x1eb   :  { %v8061_v38 = vadd.f32 %v2788_v62, %v2612_v28  ;;  %v2594_v55 = vsel %vm2562_vm2, %v2514_v22, %v2578_v53  ;;  %v2786_v54 = vsel %vm2754_vm3, %v2706_v49, %v2770_v60  ;;  %v2527_v18 = vadd.f32 %v7805_v26, %v7838_v59 }
 0x1ec   :  { %v2610_v17 = vadd.f32 %v2594_v55, %v7896_v10  ;;  %v2719_v43 = vadd.f32 %v7805_v26, %v8821_v56  ;;  %v2599_v46 = vsel %vm2567_vm4, %v2535_v25, %v2583_v8  ;;  %vm2759_vm5 = vcmp.gt.f32.partialorder %v2727_v19, 0.0  ;;  %v8823_v25 = vld [vmem:[#allocation13_spill] sm:$0xff]  ;;  %v8824_v8 = vld [vmem:[#allocation14_spill] sm:$0xff] }
 0x1ed   :  { %v2775_v30 = vmul.f32 0.01, %v2727_v19  ;;  %v2538_v11 = vadd.f32 %v7805_v26, %v8822_v6  ;;  %v2615_v57 = vadd.f32 %v2599_v46, %v7899_v0  ;;  %vm2565_vm6 = vcmp.gt.f32.partialorder %v2527_v18, 0.0 }
 0x1ee   :  { %v8072_v22 = vadd.f32 %v2786_v54, %v2610_v17  ;;  %v2581_v13 = vmul.f32 0.01, %v2527_v18  ;;  %vm2757_vm0 = vcmp.gt.f32.partialorder %v2719_v43, 0.0  ;;  %v2773_v49 = vmul.f32 0.01, %v2719_v43 }
 0x1ef   :  { %v2791_v10 = vsel %vm2759_vm5, %v2727_v19, %v2775_v30  ;;  %vm2568_vm7 = vcmp.gt.f32.partialorder %v2538_v11, 0.0  ;;  %v2584_v53 = vmul.f32 0.01, %v2538_v11  ;;  %v2730_v62 = vadd.f32 %v7805_v26, %v8823_v25 }
 0x1f0   :  { %v8075_v59 = vadd.f32 %v2791_v10, %v2615_v57  ;;  %v2597_v28 = vsel %vm2565_vm6, %v2527_v18, %v2581_v13  ;;  %v2789_v55 = vsel %vm2757_vm0, %v2719_v43, %v2773_v49  ;;  %v2530_v17 = vadd.f32 %v7805_v26, %v8824_v8 }
 0x1f1   :  { %v2613_v60 = vadd.f32 %v2597_v28, %v7916_v7  ;;  %v2722_v0 = vadd.f32 %v7805_v26, %v7853_v16  ;;  %v2600_v19 = vsel %vm2568_vm7, %v2538_v11, %v2584_v53  ;;  %vm2760_vm8 = vcmp.gt.f32.partialorder %v2730_v62, 0.0 }
 0x1f2   :  { %v2776_v54 = vmul.f32 0.01, %v2730_v62  ;;  %v2551_v56 = vadd.f32 %v7805_v26, %v7869_v34  ;;  %v2616_v46 = vadd.f32 %v2600_v19, %v7927_v2  ;;  %vm2566_vm9 = vcmp.gt.f32.partialorder %v2530_v17, 0.0 }
 0x1f3   :  { %v8086_v18 = vadd.f32 %v2789_v55, %v2613_v60  ;;  %v2582_v30 = vmul.f32 0.01, %v2530_v17  ;;  %vm2758_vm10 = vcmp.gt.f32.partialorder %v2722_v0, 0.0  ;;  %v2774_v43 = vmul.f32 0.01, %v2722_v0 }
 0x1f4   :  { %v2792_v7 = vsel %vm2760_vm8, %v2730_v62, %v2776_v54  ;;  %vm2571_vm11 = vcmp.gt.f32.partialorder %v2551_v56, 0.0  ;;  %v2587_v16 = vmul.f32 0.01, %v2551_v56  ;;  %v2743_v11 = vadd.f32 %v7805_v26, %v7871_v24 }
 0x1f5   :  { %v8089_v6 = vadd.f32 %v2792_v7, %v2616_v46  ;;  %v2598_v57 = vsel %vm2566_vm9, %v2530_v17, %v2582_v30  ;;  %v2790_v34 = vsel %vm2758_vm10, %v2722_v0, %v2774_v43  ;;  %v2543_v10 = vadd.f32 %v7805_v26, %v7873_v40  ;;  %v8825_v0 = vld [vmem:[#allocation5_spill] sm:$0xff] }
 0x1f6   :  { %v2614_v13 = vadd.f32 %v2598_v57, %v7940_v50  ;;  %v2735_v2 = vadd.f32 %v7805_v26, %v7879_v32  ;;  %v2603_v49 = vsel %vm2571_vm11, %v2551_v56, %v2587_v16  ;;  %vm2763_vm12 = vcmp.gt.f32.partialorder %v2743_v11, 0.0 }
 0x1f7   :  { %v2779_v28 = vmul.f32 0.01, %v2743_v11  ;;  %v2554_v53 = vadd.f32 %v7805_v26, %v7881_v1  ;;  %v2619_v62 = vadd.f32 %v2603_v49, %v7945_v15  ;;  %vm2569_vm13 = vcmp.gt.f32.partialorder %v2543_v10, 0.0  ;;  %v8826_v15 = vld [vmem:[#allocation15_spill] sm:$0xff] }
 0x1f8   :  { %v8100_v25 = vadd.f32 %v2790_v34, %v2614_v13  ;;  %v2585_v24 = vmul.f32 0.01, %v2543_v10  ;;  %vm2761_vm14 = vcmp.gt.f32.partialorder %v2735_v2, 0.0  ;;  %v2777_v60 = vmul.f32 0.01, %v2735_v2 }
 0x1f9   :  { %v2795_v50 = vsel %vm2763_vm12, %v2743_v11, %v2779_v28  ;;  %vm2572_vm15 = vcmp.gt.f32.partialorder %v2554_v53, 0.0  ;;  %v2588_v32 = vmul.f32 0.01, %v2554_v53  ;;  %v2746_v8 = vadd.f32 %v7805_v26, %v7888_v5 }
 0x1fa   :  { %v8103_v40 = vadd.f32 %v2795_v50, %v2619_v62  ;;  %v2601_v55 = vsel %vm2569_vm13, %v2543_v10, %v2585_v24  ;;  %v2793_v1 = vsel %vm2761_vm14, %v2735_v2, %v2777_v60  ;;  %v2546_v19 = vadd.f32 %v7805_v26, %v8825_v0  ;;  %v8828_v62 = vld [vmem:[#allocation7_spill] sm:$0xff] }
 0x1fb   :  { %v2617_v17 = vadd.f32 %v2601_v55, %v7968_v20  ;;  %v2738_v54 = vadd.f32 %v7805_v26, %v8826_v15  ;;  %v2604_v56 = vsel %vm2572_vm15, %v2554_v53, %v2588_v32  ;;  %vm2764_vm1 = vcmp.gt.f32.partialorder %v2746_v8, 0.0 }
 0x1fc   :  { %v2780_v46 = vmul.f32 0.01, %v2746_v8  ;;  %v2887_v30 = vadd.f32 %v7805_v26, %v7908_v33  ;;  %v2620_v43 = vadd.f32 %v2604_v56, %v7973_v58  ;;  %vm2570_vm2 = vcmp.gt.f32.partialorder %v2546_v19, 0.0  ;;  %v8827_v58 = vld [vmem:[#allocation6_spill] sm:$0xff] }
 0x1fd   :  { %v8114_v7 = vadd.f32 %v2793_v1, %v2617_v17  ;;  %v2586_v5 = vmul.f32 0.01, %v2546_v19  ;;  %vm2762_vm3 = vcmp.gt.f32.partialorder %v2738_v54, 0.0  ;;  %v2778_v57 = vmul.f32 0.01, %v2738_v54  ;;  %v8829_v17 = vld [vmem:[#allocation16_spill] sm:$0xff] }
 0x1fe   :  { %v2796_v20 = vsel %vm2764_vm1, %v2746_v8, %v2780_v46  ;;  %vm2943_vm4 = vcmp.gt.f32.partialorder %v2887_v30, 0.0  ;;  %v2959_v13 = vmul.f32 0.01, %v2887_v30  ;;  %v3079_v34 = vadd.f32 %v7805_v26, %v7912_v3 }
 0x1ff   :  { %v8117_v16 = vadd.f32 %v2796_v20, %v2620_v43  ;;  %v2602_v11 = vsel %vm2570_vm2, %v2546_v19, %v2586_v5  ;;  %v2794_v33 = vsel %vm2762_vm3, %v2738_v54, %v2778_v57  ;;  %v2879_v2 = vadd.f32 %v7805_v26, %v7914_v47 }
 0x200   :  { %v2618_v10 = vadd.f32 %v2602_v11, %v7986_v52  ;;  %v3071_v49 = vadd.f32 %v7805_v26, %v8827_v58  ;;  %v2975_v28 = vsel %vm2943_vm4, %v2887_v30, %v2959_v13  ;;  %vm3135_vm5 = vcmp.gt.f32.partialorder %v3079_v34, 0.0 }
 0x201   :  { %v3151_v53 = vmul.f32 0.01, %v3079_v34  ;;  %v2890_v24 = vadd.f32 %v7805_v26, %v8828_v62  ;;  %v2991_v60 = vadd.f32 %v2975_v28, %v7997_v9  ;;  %vm2941_vm6 = vcmp.gt.f32.partialorder %v2879_v2, 0.0 }
 0x202   :  { %v8128_v50 = vadd.f32 %v2794_v33, %v2618_v10  ;;  %v2957_v3 = vmul.f32 0.01, %v2879_v2  ;;  %vm3133_vm0 = vcmp.gt.f32.partialorder %v3071_v49, 0.0  ;;  %v3149_v55 = vmul.f32 0.01, %v3071_v49 }
 0x203   :  { %v3167_v52 = vsel %vm3135_vm5, %v3079_v34, %v3151_v53  ;;  %vm2944_vm7 = vcmp.gt.f32.partialorder %v2890_v24, 0.0  ;;  %v2960_v8 = vmul.f32 0.01, %v2890_v24  ;;  %v3082_v1 = vadd.f32 %v7805_v26, %v8829_v17 }
 0x204   :  { %v8131_v47 = vadd.f32 %v3167_v52, %v2991_v60  ;;  %v2973_v32 = vsel %vm2941_vm6, %v2879_v2, %v2957_v3  ;;  %v3165_v19 = vsel %vm3133_vm0, %v3071_v49, %v3149_v55  ;;  %v2882_v15 = vadd.f32 %v7805_v26, %v7925_v48  ;;  %v8830_v2 = vld [vmem:[#allocation8_spill] sm:$0xff]  ;;  %v6098_v3 = vld [vmem:[%s8769_s4] sm:$0xff]  }
 0x205   :  { %v2989_v0 = vadd.f32 %v2973_v32, %v8014_v37  ;;  %v3074_v9 = vadd.f32 %v7805_v26, %v7931_v41  ;;  %v2976_v54 = vsel %vm2944_vm7, %v2890_v24, %v2960_v8  ;;  %vm3136_vm8 = vcmp.gt.f32.partialorder %v3082_v1, 0.0 }
 0x206   :  { %v3152_v56 = vmul.f32 0.01, %v3082_v1  ;;  %v2903_v46 = vadd.f32 %v7805_v26, %v7943_v35  ;;  %v2992_v43 = vadd.f32 %v2976_v54, %v8017_v39  ;;  %vm2942_vm9 = vcmp.gt.f32.partialorder %v2882_v15, 0.0 }
 0x207   :  { %v3181_v30 = vadd.f32 %v3165_v19, %v2989_v0  ;;  %v2958_v5 = vmul.f32 0.01, %v2882_v15  ;;  %vm3134_vm10 = vcmp.gt.f32.partialorder %v3074_v9, 0.0  ;;  %v3150_v37 = vmul.f32 0.01, %v3074_v9 }
 0x208   :  { %v3168_v20 = vsel %vm3136_vm8, %v3082_v1, %v3152_v56  ;;  %vm2947_vm11 = vcmp.gt.f32.partialorder %v2903_v46, 0.0  ;;  %v2963_v11 = vmul.f32 0.01, %v2903_v46  ;;  %v3095_v41 = vadd.f32 %v7805_v26, %v7949_v44 }
 0x209   :  { %v8143_v57 = vadd.f32 %v3168_v20, %v2992_v43  ;;  %v2974_v48 = vsel %vm2942_vm9, %v2882_v15, %v2958_v5  ;;  %v3166_v34 = vsel %vm3134_vm10, %v3074_v9, %v3150_v37  ;;  %v2895_v35 = vadd.f32 %v7805_v26, %v7951_v61  ;;  %v8833_v37 = vld [vmem:[#allocation19_spill] sm:$0xff] }
 0x20a   :  { %v2990_v13 = vadd.f32 %v2974_v48, %v8038_v29  ;;  %v3087_v39 = vadd.f32 %v7805_v26, %v7958_v14  ;;  %v2979_v10 = vsel %vm2947_vm11, %v2903_v46, %v2963_v11  ;;  %vm3139_vm12 = vcmp.gt.f32.partialorder %v3095_v41, 0.0  ;;  %v8831_v14 = vld [vmem:[#allocation17_spill] sm:$0xff] }
 0x20b   :  { %v3155_v33 = vmul.f32 0.01, %v3095_v41  ;;  %v2906_v58 = vadd.f32 %v7805_v26, %v8830_v2  ;;  %v2995_v28 = vadd.f32 %v2979_v10, %v8047_v45  ;;  %vm2945_vm13 = vcmp.gt.f32.partialorder %v2895_v35, 0.0 }
 0x20c   :  { %v3182_v49 = vadd.f32 %v3166_v34, %v2990_v13  ;;  %v2961_v44 = vmul.f32 0.01, %v2895_v35  ;;  %vm3137_vm14 = vcmp.gt.f32.partialorder %v3087_v39, 0.0  ;;  %v3153_v29 = vmul.f32 0.01, %v3087_v39 }
 0x20d   :  { %v3171_v53 = vsel %vm3139_vm12, %v3095_v41, %v3155_v33  ;;  %vm2948_vm15 = vcmp.gt.f32.partialorder %v2906_v58, 0.0  ;;  %v2964_v24 = vmul.f32 0.01, %v2906_v58  ;;  %v3098_v60 = vadd.f32 %v7805_v26, %v8831_v14 }
 0x20e   :  { %v8155_v62 = vadd.f32 %v3171_v53, %v2995_v28  ;;  %v2977_v61 = vsel %vm2945_vm13, %v2895_v35, %v2961_v44  ;;  %v3169_v45 = vsel %vm3137_vm14, %v3087_v39, %v3153_v29  ;;  %v2898_v55 = vadd.f32 %v7805_v26, %v7966_v21  ;;  %v8834_v39 = vld [vmem:[#allocation20_spill] sm:$0xff] }
 0x20f   :  { %v2993_v52 = vadd.f32 %v2977_v61, %v8058_v42  ;;  %v3090_v32 = vadd.f32 %v7805_v26, %v7971_v51  ;;  %v2980_v8 = vsel %vm2948_vm15, %v2906_v58, %v2964_v24  ;;  %vm3140_vm1 = vcmp.gt.f32.partialorder %v3098_v60, 0.0  ;;  %v6099_v51 = vld [vmem:[%s8769_s4 + $0x8] sm:$0xff]  }
 0x210   :  { %v3156_v17 = vmul.f32 0.01, %v3098_v60  ;;  %v2996_v0 = vadd.f32 %v2980_v8, %v8061_v38  ;;  %vm2946_vm2 = vcmp.gt.f32.partialorder %v2898_v55, 0.0  ;;  %v2962_v19 = vmul.f32 0.01, %v2898_v55 }
 0x211   :  { %v8167_v1 = vadd.f32 %v3169_v45, %v2993_v52  ;;  %v6288_v15 = vmov 0.0   ;;  %vm3138_vm3 = vcmp.gt.f32.partialorder %v3090_v32, 0.0  ;;  %v3154_v21 = vmul.f32 0.01, %v3090_v32 }
 0x212   :  { %5975 = vmatprep.subr.bf16.mxu0 %v6288_v15  ;;  %5995 = vmatprep.subr.bf16.mxu1 %v6288_v15  ;;  %v3172_v42 = vsel %vm3140_vm1, %v3098_v60, %v3156_v17  ;;  %v3198_v9 = vpack.c.bf16 %v3182_v49, %v3181_v30  ;;  %v2978_v56 = vsel %vm2946_vm2, %v2898_v55, %v2962_v19  ;;  %v8832_v30 = vld [vmem:[#allocation18_spill] sm:$0xff]  ;;  %v8835_v49 = vld [vmem:[#allocation9_spill] sm:$0xff] }
 0x213   :  { %5996 = vmatpush3.bf16.msra.mxu1 %v6098_v3  ;;  %v8175_v54 = vadd.f32 %v3172_v42, %v2996_v0  ;;  %v2919_v38 = vadd.f32 %v7805_v26, %v7984_v31  ;;  %v3111_v46 = vadd.f32 %v7805_v26, %v7989_v63  ;;  %v2994_v43 = vadd.f32 %v2978_v56, %v8072_v22  ;;  %v6100_v22 = vld [vmem:[%s8769_s4 + $0x10] sm:$0xff]   ;;  %v8836_v19 = vld [vmem:[#allocation10_spill] sm:$0xff] }
 0x214   :  { %5997 = vmatprep.subr.bf16.mxu1 %v6288_v15  ;;  %v3170_v5 = vsel %vm3138_vm3, %v3090_v32, %v3154_v21  ;;  %5976 = vmatpush3.bf16.msra.mxu0 %v3198_v9  ;;  %v2911_v20 = vadd.f32 %v7805_v26, %v8832_v30  ;;  %v3103_v48 = vadd.f32 %v7805_v26, %v8833_v37  ;;  %v8837_v42 = vld [vmem:[#allocation2_spill] sm:$0xff] }
 0x215   :  { %vm2951_vm4 = vcmp.gt.f32.partialorder %v2919_v38, 0.0  ;;  %v2967_v11 = vmul.f32 0.01, %v2919_v38  ;;  %vm3143_vm5 = vcmp.gt.f32.partialorder %v3111_v46, 0.0  ;;  %v3159_v41 = vmul.f32 0.01, %v3111_v46  ;;  %5977 = vmatprep.subr.bf16.mxu0 %v6288_v15 }
 0x216   :  { %v3186_v31 = vadd.f32 %v3170_v5, %v2994_v43  ;;  %vm2949_vm6 = vcmp.gt.f32.partialorder %v2911_v20, 0.0  ;;  %v2965_v63 = vmul.f32 0.01, %v2911_v20  ;;  %vm3141_vm0 = vcmp.gt.f32.partialorder %v3103_v48, 0.0  ;;  %v8838_v43 = vld [vmem:[#allocation21_spill] sm:$0xff]  ;;  %v8839_v30 = vld [vmem:[#allocation22_spill] sm:$0xff] }
 0x217   :  { %5998 = vmatpush3.bf16.msra.mxu1 %v6099_v51  ;;  %v2983_v13 = vsel %vm2951_vm4, %v2919_v38, %v2967_v11  ;;  %v3175_v34 = vsel %vm3143_vm5, %v3111_v46, %v3159_v41  ;;  %v3157_v35 = vmul.f32 0.01, %v3103_v48  ;;  %v2922_v10 = vadd.f32 %v7805_v26, %v8834_v39  ;;  %v8840_v11 = vld [vmem:[#allocation23_spill] sm:$0xff] }
 0x218   :  { %5999 = vmatprep.subr.bf16.mxu1 %v6288_v15  ;;  %v2999_v33 = vadd.f32 %v2983_v13, %v8075_v59  ;;  %v2981_v2 = vsel %vm2949_vm6, %v2911_v20, %v2965_v63  ;;  %v3114_v58 = vadd.f32 %v7805_v26, %v8001_v4  ;;  %v2914_v28 = vadd.f32 %v7805_v26, %v8835_v49 }
 0x219   :  { %v2997_v44 = vadd.f32 %v2981_v2, %v8086_v18  ;;  %v3173_v53 = vsel %vm3141_vm0, %v3103_v48, %v3157_v35  ;;  %vm2952_vm7 = vcmp.gt.f32.partialorder %v2922_v10, 0.0  ;;  %v2968_v29 = vmul.f32 0.01, %v2922_v10  ;;  %v6101_v18 = vld [vmem:[%s8769_s4 + $0x18] sm:$0xff]  }
 0x21a   :  { %v8200_v61 = vadd.f32 %v3175_v34, %v2999_v33  ;;  %vm3144_vm8 = vcmp.gt.f32.partialorder %v3114_v58, 0.0  ;;  %v3160_v24 = vmul.f32 0.01, %v3114_v58  ;;  %vm2950_vm9 = vcmp.gt.f32.partialorder %v2914_v28, 0.0 }
 0x21b   :  { %6000 = vmatpush3.bf16.msra.mxu1 %v6100_v22  ;;  %v8202_v14 = vadd.f32 %v3173_v53, %v2997_v44  ;;  %v2984_v59 = vsel %vm2952_vm7, %v2922_v10, %v2968_v29  ;;  %v2966_v60 = vmul.f32 0.01, %v2914_v28  ;;  %v3106_v4 = vadd.f32 %v7805_v26, %v8010_v27  ;;  %v6287_v26 = vld [vmem:[%s8768_s2] ss:$0 sm:$0xff]  ;;  %v6104_v53 = vld [vmem:[%s8769_s4 + $0x30] sm:$0xff]  }
 0x21c   :  { %6001 = vmatprep.subr.bf16.mxu1 %v6288_v15  ;;  %v3000_v3 = vadd.f32 %v2984_v59, %v8089_v6  ;;  %v3176_v52 = vsel %vm3144_vm8, %v3114_v58, %v3160_v24  ;;  %v3199_v45 = vpack.c.bf16 %v8143_v57, %v8131_v47  ;;  %v3200_v55 = vpack.c.bf16 %v3186_v31, %v8167_v1  ;;  %v6107_v59 = vld [vmem:[%s8769_s4 + $0x48] sm:$0xff]  }
 0x21d   :  { %v2982_v32 = vsel %vm2950_vm9, %v2914_v28, %v2966_v60  ;;  %vm3142_vm10 = vcmp.gt.f32.partialorder %v3106_v4, 0.0  ;;  %v3158_v8 = vmul.f32 0.01, %v3106_v4  ;;  %v2935_v27 = vadd.f32 %v6287_v26, %v8021_v36  ;;  %v6108_v60 = vld [vmem:[%s8769_s4 + $0x50] sm:$0xff]  }
 0x21e   :  { %v8218_v17 = vadd.f32 %v3176_v52, %v3000_v3  ;;  %v2998_v0 = vadd.f32 %v2982_v32, %v8100_v25  ;;  %5978 = vmatpush3.bf16.msra.mxu0 %v3199_v45  ;;  %v3127_v6 = vadd.f32 %v6287_v26, %v8028_v12  ;;  %v2927_v47 = vadd.f32 %v6287_v26, %v8836_v19  ;;  %v6102_v12 = vld [vmem:[%s8769_s4 + $0x20] sm:$0xff]   ;;  %v6111_v3 = vld [vmem:[%s8769_s4 + $0x68] sm:$0xff]  }
 0x21f   :  { %v3174_v57 = vsel %vm3142_vm10, %v3106_v4, %v3158_v8  ;;  %5979 = vmatprep.subr.bf16.mxu0 %v6288_v15  ;;  %vm2955_vm11 = vcmp.gt.f32.partialorder %v2935_v27, 0.0  ;;  %v2971_v1 = vmul.f32 0.01, %v2935_v27  ;;  %v3119_v21 = vadd.f32 %v6287_v26, %v8837_v42  ;;  %6002 = vmatpush3.bf16.msra.mxu1 %v6101_v18  ;;  %v6109_v4 = vld [vmem:[%s8769_s4 + $0x58] sm:$0xff]   ;;  %v6110_v18 = vld [vmem:[%s8769_s4 + $0x60] sm:$0xff]  }
 0x220   :  { %v3190_v9 = vadd.f32 %v3174_v57, %v2998_v0  ;;  %vm3147_vm12 = vcmp.gt.f32.partialorder %v3127_v6, 0.0  ;;  %v3163_v36 = vmul.f32 0.01, %v3127_v6  ;;  %vm2953_vm13 = vcmp.gt.f32.partialorder %v2927_v47, 0.0  ;;  %6003 = vmatprep.subr.bf16.mxu1 %v6288_v15  ;;  %v6114_v0 = vld [vmem:[%s8771_s6] ss:$36 sps:$4 sm:$0xff]  }
 0x221   :  { %v2987_v25 = vsel %vm2955_vm11, %v2935_v27, %v2971_v1  ;;  %v2969_v51 = vmul.f32 0.01, %v2927_v47  ;;  %vm3145_vm14 = vcmp.gt.f32.partialorder %v3119_v21, 0.0  ;;  %v3161_v56 = vmul.f32 0.01, %v3119_v21  ;;  %v6112_v27 = vld [vmem:[%s8769_s4 + $0x70] sm:$0xff]  }
 0x222   :  { %5980 = vmatpush3.bf16.msra.mxu0 %v3200_v55  ;;  %v3003_v38 = vadd.f32 %v2987_v25, %v8103_v40  ;;  %v3179_v46 = vsel %vm3147_vm12, %v3127_v6, %v3163_v36  ;;  %v2938_v5 = vadd.f32 %v6287_v26, %v8838_v43  ;;  %v3130_v20 = vadd.f32 %v6287_v26, %v8839_v30  ;;  %v6103_v40 = vld [vmem:[%s8769_s4 + $0x28] sm:$0xff]   ;;  %v6128_v1 = vld [vmem:[%s8771_s6 + $0x94] ss:$36 sps:$4 sm:$0xff]  }
 0x223   :  { %v2985_v37 = vsel %vm2953_vm13, %v2927_v47, %v2969_v51  ;;  %v3177_v48 = vsel %vm3145_vm14, %v3119_v21, %v3161_v56  ;;  %5981 = vmatprep.subr.bf16.mxu0 %v6288_v15  ;;  %v2930_v41 = vadd.f32 %v6287_v26, %v8840_v11  ;;  %v3122_v31 = vadd.f32 %v6287_v26, %v8045_v23  ;;  %v6116_v6 = vld [vmem:[%s8771_s6 + $0x4] ss:$36 sps:$4 sm:$0xff]   ;;  %v6119_v19 = vld [vmem:[%s8771_s6 + $0xc] ss:$36 sps:$4 sm:$0xff]   ;;  %v6134_v21 = vld [vmem:[%s8771_s6 + $0xdc] ss:$36 sps:$4 sm:$0xff]  }
 0x224   :  { %v3195_v63 = vadd.f32 %v3179_v46, %v3003_v38  ;;  %v3001_v22 = vadd.f32 %v2985_v37, %v8114_v7  ;;  %vm2956_vm15 = vcmp.gt.f32.partialorder %v2938_v5, 0.0  ;;  %v2972_v13 = vmul.f32 0.01, %v2938_v5  ;;  %6004 = vmatpush3.bf16.msra.mxu1 %v6102_v12  ;;  %v6122_v47 = vld [vmem:[%s8771_s6 + $0x4c] ss:$36 sps:$4 sm:$0xff]  }
 0x225   :  { %vm3148_vm1 = vcmp.gt.f32.partialorder %v3130_v20, 0.0  ;;  %v3164_v34 = vmul.f32 0.01, %v3130_v20  ;;  %vm2954_vm2 = vcmp.gt.f32.partialorder %v2930_v41, 0.0  ;;  %v2970_v35 = vmul.f32 0.01, %v2930_v41  ;;  %6005 = vmatprep.subr.bf16.mxu1 %v6288_v15 }
 0x226   :  { %v3193_v39 = vadd.f32 %v3177_v48, %v3001_v22  ;;  %v2988_v10 = vsel %vm2956_vm15, %v2938_v5, %v2972_v13  ;;  %vm3146_vm3 = vcmp.gt.f32.partialorder %v3122_v31, 0.0  ;;  %v3162_v23 = vmul.f32 0.01, %v3122_v31  ;;  %v6120_v57 = vld [vmem:[%s8771_s6 + $0x48] ss:$36 sps:$4 sm:$0xff]  }
 0x227   :  { %v3004_v33 = vadd.f32 %v2988_v10, %v8117_v16  ;;  %v2986_v7 = vsel %vm2954_vm2, %v2930_v41, %v2970_v35  ;;  %v3201_v2 = vpack.c.bf16 %v8175_v54, %v8155_v62  ;;  %v3180_v58 = vsel %vm3148_vm1, %v3130_v20, %v3164_v34  ;;  %v3197_v54 = vld [vmem:[%s8770_s3] sm:$0xf]  ;;  %v6126_v42 = vld [vmem:[%s8771_s6 + $0x90] ss:$36 sps:$4 sm:$0xff]   ;;  %v6140_v36 = vld [vmem:[%s8771_s6 + $0x124] ss:$36 sps:$4 sm:$0xff]  }
 0x228   :  { %v3002_v49 = vadd.f32 %v2986_v7, %v8128_v50  ;;  %v3202_v28 = vpack.c.bf16 %v3190_v9, %v8202_v14  ;;  %v3203_v44 = vpack.c.bf16 %v8218_v17, %v8200_v61  ;;  %6006 = vmatpush3.bf16.msra.mxu1 %v6103_v40  ;;  %v3178_v24 = vsel %vm3146_vm3, %v3122_v31, %v3162_v23  ;;  %v6105_v61 = vld [vmem:[%s8769_s4 + $0x38] sm:$0xff]   ;;  %v6106_v14 = vld [vmem:[%s8769_s4 + $0x40] sm:$0xff]   ;;  %v6146_v25 = vld [vmem:[%s8771_s6 + $0x16c] ss:$36 sps:$4 sm:$0xff]  }
 0x229   :  { %v3196_v29 = vadd.f32 %v3180_v58, %v3004_v33  ;;  %5982 = vmatpush3.bf16.msra.mxu0 %v3201_v2  ;;  %6007 = vmatprep.subr.bf16.mxu1 %v6288_v15  ;;  %vm6289_vm4 = vmmov 0   ;;  %v6113_v17 = vld [vmem:[%s8769_s4 + $0x78] sm:$0xff]   ;;  %v6138_v12 = vld [vmem:[%s8771_s6 + $0x120] ss:$36 sps:$4 sm:$0xff]   ;;  %v6144_v51 = vld [vmem:[%s8771_s6 + $0x168] ss:$36 sps:$4 sm:$0xff]  }
 0x22a   :  { %v3194_v16 = vadd.f32 %v3178_v24, %v3002_v49  ;;  %5983 = vmatprep.subr.bf16.mxu0 %v6288_v15  ;;  %5991 = vmatprep.mubr.msk.bf16.mxu0 %vm6289_vm4, %v6288_v15  ;;  %v6132_v9 = vld [vmem:[%s8771_s6 + $0xd8] ss:$36 sps:$4 sm:$0xff]   ;;  %v5102_v56 = vld [vmem:[%s8772_s5] ss:$0 sm:$0xff]  ;;  %v6117_v11 = vld [vmem:[%s8771_s6 + $0x8] ss:$36 sps:$4 sm:$0xff]  }
 0x22b   :  { %v3205_v50 = vpack.c.bf16 %v3196_v29, %v3195_v63  ;;  %6011 = vmatprep.mubr.msk.bf16.mxu1 %vm6289_vm4, %v6288_v15  ;;  %v6125_v31 = vld [vmem:[%s8771_s6 + $0x54] ss:$36 sps:$4 sm:$0xff]   ;;  %v6131_v22 = vld [vmem:[%s8771_s6 + $0x9c] ss:$36 sps:$4 sm:$0xff]   ;;  %v6137_v40 = vld [vmem:[%s8771_s6 + $0xe4] ss:$36 sps:$4 sm:$0xff]  }
 0x22c   :  { %v3204_v62 = vpack.c.bf16 %v3194_v16, %v3193_v39  ;;  %6008 = vmatpush3.bf16.msra.mxu1 %v6104_v53  ;;  %v6123_v63 = vld [vmem:[%s8771_s6 + $0x50] ss:$36 sps:$4 sm:$0xff]   ;;  %v6129_v13 = vld [vmem:[%s8771_s6 + $0x98] ss:$36 sps:$4 sm:$0xff]   ;;  %v6135_v34 = vld [vmem:[%s8771_s6 + $0xe0] ss:$36 sps:$4 sm:$0xff]  }
 0x22d   :  { %5984 = vmatpush3.bf16.msra.mxu0 %v3202_v28  ;;  %6009 = vmatprep.subr.bf16.mxu1 %v6288_v15  ;;  %v6143_v35 = vld [vmem:[%s8771_s6 + $0x12c] ss:$36 sps:$4 sm:$0xff]   ;;  %v6149_v10 = vld [vmem:[%s8771_s6 + $0x174] ss:$36 sps:$4 sm:$0xff]   ;;  %v6155_v7 = vld [vmem:[%s8771_s6 + $0x1bc] ss:$36 sps:$4 sm:$0xff]  }
 0x22e   :  { %5985 = vmatprep.subr.bf16.mxu0 %v6288_v15  ;;  %v6141_v39 = vld [vmem:[%s8771_s6 + $0x128] ss:$36 sps:$4 sm:$0xff]   ;;  %v6147_v23 = vld [vmem:[%s8771_s6 + $0x170] ss:$36 sps:$4 sm:$0xff]   ;;  %v6153_v58 = vld [vmem:[%s8771_s6 + $0x1b8] ss:$36 sps:$4 sm:$0xff]  }
 0x22f   :  { %v6152_v33 = vld [vmem:[%s8771_s6 + $0x1b4] ss:$36 sps:$4 sm:$0xff]   ;;  %v6158_v28 = vld [vmem:[%s8771_s6 + $0x1fc] ss:$36 sps:$4 sm:$0xff]   ;;  %v6161_v53 = vld [vmem:[%s8771_s6 + $0x204] ss:$36 sps:$4 sm:$0xff]  }
 0x230   :  { %6010 = vmatpush3.bf16.msra.mxu1 %v6105_v61  ;;  %v6150_v2 = vld [vmem:[%s8771_s6 + $0x1b0] ss:$36 sps:$4 sm:$0xff]   ;;  %v6156_v49 = vld [vmem:[%s8771_s6 + $0x1f8] ss:$36 sps:$4 sm:$0xff]   ;;  %v6290_v29 = vmov 0  }
 0x231   :  { %5986 = vmatpush3.bf16.msra.mxu0 %v3203_v44  ;;  %3979 = vmatprep.subr.bf16.mxu1 %v6116_v6  ;;  %v6159_v44 = vld [vmem:[%s8771_s6 + $0x200] ss:$36 sps:$4 sm:$0xff]   ;;  %v6164_v24 = vld [vmem:[%s8771_s6 + $0x14] ss:$36 sps:$4 sm:$0xff]   ;;  %v6177_v6 = vld [vmem:[%s8771_s6 + $0xa8] ss:$36 sps:$4 sm:$0xff]  }
 0x232   :  { %5987 = vmatprep.subr.bf16.mxu0 %v6288_v15  ;;  %v6167_v16 = vld [vmem:[%s8771_s6 + $0x1c] ss:$36 sps:$4 sm:$0xff]  }
 0x235   :  { %5988 = vmatpush3.bf16.msra.mxu0 %v3204_v62 }
 0x236   :  { %5989 = vmatprep.subr.bf16.mxu0 %v6288_v15 }
 0x239   :  { %5990 = vmatpush3.bf16.msra.mxu0 %v3205_v50  ;;  %v5128_v50 = vld [vmem:[%s8772_s5 + $0x1] ss:$0 sm:$0xff] }
 0x23a   :  { %6015 = vmatprep.subr.bf16.mxu0 %v6288_v15 }
 0x23c   :  { %5992 = vmatmul.mubr.bf16.vlgmr.msra.gmra.mrb[128].mxu0 %v3197_v54 }
 0x23d   :  { %6031 = vmatprep.mubr.msk.bf16.mxu0 %vm6289_vm4, %v6288_v15  ;;  %6016 = vmatpush3.bf16.msra.mxu0 %v6106_v14 }
 0x23e   :  { %6017 = vmatprep.subr.bf16.mxu0 %v6288_v15 }
 0x241   :  { %6018 = vmatpush3.bf16.msra.mxu0 %v6107_v59 }
 0x242   :  { %6019 = vmatprep.subr.bf16.mxu0 %v6288_v15 }
 0x245   :  { %6020 = vmatpush3.bf16.msra.mxu0 %v6108_v60 }
 0x246   :  { %6021 = vmatprep.subr.bf16.mxu0 %v6288_v15 }
 0x249   :  { %6022 = vmatpush3.bf16.msra.mxu0 %v6109_v4 }
 0x24a   :  { %6023 = vmatprep.subr.bf16.mxu0 %v6288_v15 }
 0x24d   :  { %6024 = vmatpush3.bf16.msra.mxu0 %v6110_v18 }
 0x24e   :  { %6025 = vmatprep.subr.bf16.mxu0 %v6288_v15 }
 0x251   :  { %6026 = vmatpush3.bf16.msra.mxu0 %v6111_v3  ;;  %v6162_v3 = vld [vmem:[%s8771_s6 + $0x10] ss:$36 sps:$4 sm:$0xff]  }
 0x252   :  { %6027 = vmatprep.subr.bf16.mxu0 %v6288_v15 }
 0x255   :  { %6028 = vmatpush3.bf16.msra.mxu0 %v6112_v27  ;;  %v6176_v27 = vld [vmem:[%s8771_s6 + $0xa4] ss:$36 sps:$4 sm:$0xff]  }
 0x256   :  { %6029 = vmatprep.subr.bf16.mxu0 %v6288_v15 }
 0x259   :  { %6030 = vmatpush3.bf16.msra.mxu0 %v6113_v17  ;;  %v6179_v17 = vld [vmem:[%s8771_s6 + $0xac] ss:$36 sps:$4 sm:$0xff]  }
 0x25a   :  { %4020 = vmatprep.subr.bf16.mxu0 %v6119_v19  ;;  %v6182_v19 = vld [vmem:[%s8771_s6 + $0xec] ss:$36 sps:$4 sm:$0xff]  }
 0x30f   :  { %v3240_v52 = vpop.f32.mrb[128].mxu0 }
 0x310   :  { %v3246_v45 = vmul.f32 0.00390625, %v3240_v52  ;;  %v5993_v55 = vpop.f32.mrb[129].mxu0  ;;  %v6165_v52 = vld [vmem:[%s8771_s6 + $0x18] ss:$36 sps:$4 sm:$0xff]  }
 0x311   :  { %v3243_v32 = vpop.f32.mrb[130].mxu0  ;;  %v6170_v55 = vld [vmem:[%s8771_s6 + $0x5c] ss:$36 sps:$4 sm:$0xff]  }
 0x312   :  { %v3247_v8 = vpack.c.bf16 %v3246_v45, %v3246_v45  ;;  %v5994_v26 = vpop.f32.mrb[131].mxu0  ;;  %v6173_v32 = vld [vmem:[%s8771_s6 + $0x64] ss:$36 sps:$4 sm:$0xff]  }
 0x313   :  { %v6171_v26 = vld [vmem:[%s8771_s6 + $0x60] ss:$36 sps:$4 sm:$0xff]  }
 0x314   :  { %6012 = vmatmul.mubr.bf16.vlgmr.msra.gmra.mrb[128].mxu1 %v3247_v8  ;;  %v6168_v8 = vld [vmem:[%s8771_s6 + $0x58] ss:$36 sps:$4 sm:$0xff]  }
 0x315   :  { %3980 = vmatpush1.bf16.msra.mxu1 %v6114_v0  ;;  %4011 = vmatprep.mubr.bf16.mxu1 %v6290_v29  ;;  %v6174_v0 = vld [vmem:[%s8771_s6 + $0xa0] ss:$36 sps:$4 sm:$0xff]  }
 0x316   :  { %3981 = vmatprep.subr.bf16.mxu1 %v6122_v47  ;;  %v6185_v47 = vld [vmem:[%s8771_s6 + $0xf4] ss:$36 sps:$4 sm:$0xff]  }
 0x319   :  { %3982 = vmatpush1.bf16.msra.mxu1 %v6120_v57  ;;  %v6180_v57 = vld [vmem:[%s8771_s6 + $0xe8] ss:$36 sps:$4 sm:$0xff]  }
 0x31a   :  { %3983 = vmatprep.subr.bf16.mxu1 %v6128_v1  ;;  %v6183_v1 = vld [vmem:[%s8771_s6 + $0xf0] ss:$36 sps:$4 sm:$0xff]  }
 0x31d   :  { %3984 = vmatpush1.bf16.msra.mxu1 %v6126_v42  ;;  %v6188_v42 = vld [vmem:[%s8771_s6 + $0x134] ss:$36 sps:$4 sm:$0xff]  }
 0x31e   :  { %3985 = vmatprep.subr.bf16.mxu1 %v6134_v21  ;;  %v6191_v21 = vld [vmem:[%s8771_s6 + $0x13c] ss:$36 sps:$4 sm:$0xff]  }
 0x321   :  { %3986 = vmatpush1.bf16.msra.mxu1 %v6132_v9  ;;  %v6186_v9 = vld [vmem:[%s8771_s6 + $0x130] ss:$36 sps:$4 sm:$0xff]  }
 0x322   :  { %3987 = vmatprep.subr.bf16.mxu1 %v6140_v36  ;;  %v6189_v36 = vld [vmem:[%s8771_s6 + $0x138] ss:$36 sps:$4 sm:$0xff]  }
 0x325   :  { %3988 = vmatpush1.bf16.msra.mxu1 %v6138_v12  ;;  %v6194_v12 = vld [vmem:[%s8771_s6 + $0x17c] ss:$36 sps:$4 sm:$0xff]  }
 0x326   :  { %3989 = vmatprep.subr.bf16.mxu1 %v6146_v25  ;;  %v6197_v25 = vld [vmem:[%s8771_s6 + $0x184] ss:$36 sps:$4 sm:$0xff]  }
 0x329   :  { %3990 = vmatpush1.bf16.msra.mxu1 %v6144_v51  ;;  %v6192_v51 = vld [vmem:[%s8771_s6 + $0x178] ss:$36 sps:$4 sm:$0xff]  }
 0x32a   :  { %3991 = vmatprep.subr.bf16.mxu1 %v6152_v33  ;;  %v6226_v33 = vld [vmem:[%s8773_s8 + $0x60] sm:$0xff]  }
 0x32d   :  { %3992 = vmatpush1.bf16.msra.mxu1 %v6150_v2  ;;  %v6227_v2 = vld [vmem:[%s8773_s8 + $0x20] sm:$0xff]  }
 0x32e   :  { %3993 = vmatprep.subr.bf16.mxu1 %v6158_v28  ;;  %v6229_v28 = vld [vmem:[%s8773_s8 + $0x28] sm:$0xff]  }
 0x331   :  { %3994 = vmatpush1.bf16.msra.mxu1 %v6156_v49  ;;  %v6215_v49 = vld [vmem:[%s8771_s6 + $0x188] ss:$36 sps:$4 sm:$0xff]  }
 0x332   :  { %4061 = vmatprep.subr.bf16.mxu1 %v6164_v24  ;;  %v6231_v24 = vld [vmem:[%s8773_s8 + $0x30] sm:$0xff]  }
 0x3e7   :  { %v3353_v38 = vpop.f32.mrb[128].mxu1 }
 0x3e8   :  { %v3354_v46 = vadd.f32 %v5102_v56, %v3353_v38  ;;  %v6013_v43 = vpop.f32.mrb[129].mxu1  ;;  %v6195_v56 = vld [vmem:[%s8771_s6 + $0x180] ss:$36 sps:$4 sm:$0xff]  }
 0x3e9   :  { %v3356_v5 = vpop.f32.mrb[130].mxu1  ;;  %v6200_v38 = vld [vmem:[%s8771_s6 + $0x1c4] ss:$36 sps:$4 sm:$0xff]  }
 0x3ea   :  { %vm3359_vm5 = vcmp.gt.f32.partialorder %v3354_v46, 0.0  ;;  %v3360_v30 = vmul.f32 0.01, %v3354_v46  ;;  %v6014_v20 = vpop.f32.mrb[131].mxu1  ;;  %v6198_v43 = vld [vmem:[%s8771_s6 + $0x1c0] ss:$36 sps:$4 sm:$0xff]  }
 0x3eb   :  { %v6201_v5 = vld [vmem:[%s8771_s6 + $0x1c8] ss:$36 sps:$4 sm:$0xff]   ;;  %v6209_v20 = vld [vmem:[%s8771_s6 + $0x214] ss:$36 sps:$4 sm:$0xff]  }
 0x3ec   :  { %v3361_v37 = vsel %vm3359_vm5, %v3354_v46, %v3360_v30  ;;  %v6203_v46 = vld [vmem:[%s8771_s6 + $0x1cc] ss:$36 sps:$4 sm:$0xff]  }
 0x3ed   :  { %v3362_v48 = vadd.f32 %v3361_v37, %v3246_v45  ;;  %v6206_v30 = vld [vmem:[%s8771_s6 + $0x20c] ss:$36 sps:$4 sm:$0xff]  }
 0x3ee   :  { %v6204_v37 = vld [vmem:[%s8771_s6 + $0x208] ss:$36 sps:$4 sm:$0xff]  }
 0x3ef   :  { %v3363_v41 = vpack.c.bf16 %v3362_v48, %v3362_v48 }
 0x3f1   :  { %6032 = vmatmul.mubr.bf16.vlgmr.msra.gmra.mrb[132].mxu0 %v3363_v41  ;;  %v6210_v41 = vld [vmem:[%s8771_s6 + $0x20] ss:$36 sps:$4 sm:$0xff]  }
 0x3f2   :  { %4021 = vmatpush1.bf16.msra.mxu0 %v6117_v11  ;;  %4052 = vmatprep.mubr.bf16.mxu0 %v6290_v29  ;;  %v6218_v11 = vld [vmem:[%s8773_s8 + $0x40] sm:$0xff]  }
 0x3f3   :  { %4022 = vmatprep.subr.bf16.mxu0 %v6125_v31  ;;  %v6219_v31 = vld [vmem:[%s8773_s8] sm:$0xff]  }
 0x3f6   :  { %4023 = vmatpush1.bf16.msra.mxu0 %v6123_v63  ;;  %v6220_v63 = vld [vmem:[%s8773_s8 + $0x48] sm:$0xff]  }
 0x3f7   :  { %4024 = vmatprep.subr.bf16.mxu0 %v6131_v22  ;;  %v6211_v22 = vld [vmem:[%s8771_s6 + $0x68] ss:$36 sps:$4 sm:$0xff]  }
 0x3fa   :  { %4025 = vmatpush1.bf16.msra.mxu0 %v6129_v13  ;;  %v6221_v13 = vld [vmem:[%s8773_s8 + $0x8] sm:$0xff]  }
 0x3fb   :  { %4026 = vmatprep.subr.bf16.mxu0 %v6137_v40  ;;  %v6222_v40 = vld [vmem:[%s8773_s8 + $0x50] sm:$0xff]  }
 0x3fe   :  { %4027 = vmatpush1.bf16.msra.mxu0 %v6135_v34  ;;  %v6212_v34 = vld [vmem:[%s8771_s6 + $0xb0] ss:$36 sps:$4 sm:$0xff]  }
 0x3ff   :  { %4028 = vmatprep.subr.bf16.mxu0 %v6143_v35  ;;  %v6223_v35 = vld [vmem:[%s8773_s8 + $0x10] sm:$0xff]  }
 0x402   :  { %4029 = vmatpush1.bf16.msra.mxu0 %v6141_v39  ;;  %v6224_v39 = vld [vmem:[%s8773_s8 + $0x58] sm:$0xff]  }
 0x403   :  { %4030 = vmatprep.subr.bf16.mxu0 %v6149_v10  ;;  %v6213_v10 = vld [vmem:[%s8771_s6 + $0xf8] ss:$36 sps:$4 sm:$0xff]  }
 0x406   :  { %4031 = vmatpush1.bf16.msra.mxu0 %v6147_v23  ;;  %v6225_v23 = vld [vmem:[%s8773_s8 + $0x18] sm:$0xff]  }
 0x407   :  { %4032 = vmatprep.subr.bf16.mxu0 %v6155_v7  ;;  %v6214_v7 = vld [vmem:[%s8771_s6 + $0x140] ss:$36 sps:$4 sm:$0xff]  }
 0x40a   :  { %4033 = vmatpush1.bf16.msra.mxu0 %v6153_v58  ;;  %v6228_v58 = vld [vmem:[%s8773_s8 + $0x68] sm:$0xff]  }
 0x40b   :  { %4034 = vmatprep.subr.bf16.mxu0 %v6161_v53  ;;  %v6217_v53 = vld [vmem:[%s8771_s6 + $0x218] ss:$36 sps:$4 sm:$0xff]  }
 0x40e   :  { %4035 = vmatpush1.bf16.msra.mxu0 %v6159_v44  ;;  %v6216_v44 = vld [vmem:[%s8771_s6 + $0x1d0] ss:$36 sps:$4 sm:$0xff]  }
 0x40f   :  { %4102 = vmatprep.subr.bf16.mxu0 %v6167_v16  ;;  %v6232_v16 = vld [vmem:[%s8773_s8 + $0x78] sm:$0xff]  }
 0x4c4   :  { %v3471_v62 = vpop.f32.mrb[132].mxu0 }
 0x4c5   :  { %v3472_v54 = vadd.f32 %v5128_v50, %v3471_v62  ;;  %v6033_v61 = vpop.f32.mrb[133].mxu0  ;;  %v6234_v50 = vld [vmem:[%s8773_s8 + $0xc0] sm:$0xff]  }
 0x4c6   :  { %v3474_v14 = vpop.f32.mrb[134].mxu0  ;;  %v6235_v62 = vld [vmem:[%s8773_s8 + $0x140] sm:$0xff]   ;;  %v6238_v61 = vld [vmem:[%s8773_s8 + $0xc8] sm:$0xff]  }
 0x4c7   :  { %vm3477_vm6 = vcmp.gt.f32.partialorder %v3472_v54, 0.0  ;;  %v3478_v59 = vmul.f32 0.01, %v3472_v54  ;;  %v6034_v60 = vpop.f32.mrb[135].mxu0  ;;  %v6240_v14 = vld [vmem:[%s8773_s8 + $0x88] sm:$0xff]  }
 0x4c8   :  { %v6244_v60 = vld [vmem:[%s8773_s8 + $0x90] sm:$0xff]  }
 0x4c9   :  { %v3479_v4 = vsel %vm3477_vm6, %v3472_v54, %v3478_v59  ;;  %v6236_v54 = vld [vmem:[%s8773_s8 + $0x80] sm:$0xff]   ;;  %v6242_v59 = vld [vmem:[%s8773_s8 + $0xd0] sm:$0xff]  }
 0x4ca   :  { %v3480_v18 = vadd.f32 %v3479_v4, %v3362_v48  ;;  %v6207_v48 = vld [vmem:[%s8771_s6 + $0x210] ss:$36 sps:$4 sm:$0xff]   ;;  %v6246_v4 = vld [vmem:[%s8773_s8 + $0xd8] sm:$0xff]  }
 0x4cc   :  { %v8414_v45 = vpack.c.bf16 %v3480_v18, %v3480_v18  ;;  %v6248_v18 = vld [vmem:[%s8773_s8 + $0x98] sm:$0xff]  }
 0x4ce   :  { %4012 = vmatmul.mubr.bf16.vlgmr.msra.gmra.mrb[132].mxu1 %v8414_v45  ;;  %4053 = vmatmul.mubr.bf16.vlgmr.msra.gmra.mrb[136].mxu0 %v8414_v45 }
 0x4cf   :  { %4062 = vmatpush1.bf16.msra.mxu1 %v6162_v3  ;;  %4103 = vmatpush1.bf16.msra.mxu0 %v6165_v52  ;;  %v6250_v3 = vld [vmem:[%s8773_s8 + $0xe0] sm:$0xff]  }
 0x4d0   :  { %4063 = vmatprep.subr.bf16.mxu1 %v6170_v55  ;;  %4104 = vmatprep.subr.bf16.mxu0 %v6173_v32  ;;  %v6252_v52 = vld [vmem:[%s8773_s8 + $0xa0] sm:$0xff]   ;;  %v6256_v55 = vld [vmem:[%s8773_s8 + $0xa8] sm:$0xff]   ;;  %v6258_v32 = vld [vmem:[%s8773_s8 + $0xf0] sm:$0xff]  }
 0x4d1   :  { %4093 = vmatprep.mubr.bf16.mxu1 %v6290_v29  ;;  %4134 = vmatprep.mubr.bf16.mxu0 %v6290_v29  ;;  %v6230_v29 = vld [vmem:[%s8773_s8 + $0x70] sm:$0xff]  }
 0x4d3   :  { %4064 = vmatpush1.bf16.msra.mxu1 %v6168_v8  ;;  %4105 = vmatpush1.bf16.msra.mxu0 %v6171_v26  ;;  %v6260_v8 = vld [vmem:[%s8773_s8 + $0xb0] sm:$0xff]   ;;  %v6262_v26 = vld [vmem:[%s8773_s8 + $0xf8] sm:$0xff]  }
 0x4d4   :  { %4065 = vmatprep.subr.bf16.mxu1 %v6176_v27  ;;  %4106 = vmatprep.subr.bf16.mxu0 %v6179_v17  ;;  %v6264_v27 = vld [vmem:[%s8773_s8 + $0xb8] sm:$0xff]   ;;  %v6266_v17 = vld [vmem:[%s8773_s8 + $0x1c0] sm:$0xff]  }
 0x4d7   :  { %4066 = vmatpush1.bf16.msra.mxu1 %v6174_v0  ;;  %4107 = vmatpush1.bf16.msra.mxu0 %v6177_v6  ;;  %v3566_v0 = vlaneseq }
 0x4d8   :  { %4067 = vmatprep.subr.bf16.mxu1 %v6182_v19  ;;  %4108 = vmatprep.subr.bf16.mxu0 %v6185_v47 }
 0x4d9   :  { %v8641_v6 = vshrl.u32 %v3566_v0, 7 }
 0x4db   :  { %4068 = vmatpush1.bf16.msra.mxu1 %v6180_v57  ;;  %4109 = vmatpush1.bf16.msra.mxu0 %v6183_v1  ;;  %v3568_v19 = vsub.s32 0, %v8641_v6  ;;  %v3576_v47 = vsub.s32 2, %v8641_v6  ;;  %v8648_v57 = vld [vmem:[%s8774_s7] sm:$0xff]  ;;  %v3572_v1 = vsub.s32 1, %v8641_v6 }
 0x4dc   :  { %4069 = vmatprep.subr.bf16.mxu1 %v6188_v42  ;;  %4110 = vmatprep.subr.bf16.mxu0 %v6191_v21 }
 0x4dd   :  { %v3569_v42 = vrot.slane %v8648_v57, %v3568_v19  ;;  %v3577_v21 = vrot.slane %v8648_v57, %v3576_v47 }
 0x4df   :  { %4070 = vmatpush1.bf16.msra.mxu1 %v6186_v9  ;;  %4111 = vmatpush1.bf16.msra.mxu0 %v6189_v36  ;;  %v3573_v9 = vrot.slane %v8648_v57, %v3572_v1 }
 0x4e0   :  { %4071 = vmatprep.subr.bf16.mxu1 %v6194_v12  ;;  %4112 = vmatprep.subr.bf16.mxu0 %v6197_v25 }
 0x4e3   :  { %4072 = vmatpush1.bf16.msra.mxu1 %v6192_v51  ;;  %4113 = vmatpush1.bf16.msra.mxu0 %v6195_v56 }
 0x4e4   :  { %4073 = vmatprep.subr.bf16.mxu1 %v6200_v38  ;;  %4114 = vmatprep.subr.bf16.mxu0 %v6203_v46 }
 0x4e7   :  { %4074 = vmatpush1.bf16.msra.mxu1 %v6198_v43  ;;  %4115 = vmatpush1.bf16.msra.mxu0 %v6201_v5 }
 0x4e8   :  { %4075 = vmatprep.subr.bf16.mxu1 %v6206_v30  ;;  %4116 = vmatprep.subr.bf16.mxu0 %v6209_v20 }
 0x4eb   :  { %4076 = vmatpush1.bf16.msra.mxu1 %v6204_v37  ;;  %4117 = vmatpush1.bf16.msra.mxu0 %v6207_v48 }
 0x4ec   :  { %6035 = vmatprep.subr.bf16.mxu1 %v6288_v15  ;;  %5503 = vmatprep.subr.bf16.mxu0 %v6218_v11 }
 0x4ee   :  { %4094 = vmatmul.mubr.bf16.vlgmr.msra.gmra.mrb[136].mxu1 %v8414_v45  ;;  %4135 = vmatmul.mubr.bf16.vlgmr.msra.gmra.mrb[140].mxu0 %v8414_v45 }
 0x4ef   :  { %6036 = vmatpush3.bf16.msra.mxu1 %v6210_v41  ;;  %6051 = vmatprep.mubr.msk.bf16.mxu1 %vm6289_vm4, %v6288_v15 }
 0x4f0   :  { %6037 = vmatprep.subr.bf16.mxu1 %v6288_v15  ;;  %5504 = vmatpush3.bf16.msra.mxu0 %v6219_v31 }
 0x4f1   :  { %5505 = vmatprep.subr.bf16.mxu0 %v6220_v63  ;;  %v6237_v63 = vld [vmem:[%s8773_s8 + $0x100] sm:$0xff]  }
 0x4f3   :  { %6038 = vmatpush3.bf16.msra.mxu1 %v6211_v22 }
 0x4f4   :  { %6039 = vmatprep.subr.bf16.mxu1 %v6288_v15  ;;  %5506 = vmatpush3.bf16.msra.mxu0 %v6221_v13  ;;  %v6239_v13 = vld [vmem:[%s8773_s8 + $0x148] sm:$0xff]  }
 0x4f5   :  { %5507 = vmatprep.subr.bf16.mxu0 %v6222_v40  ;;  %v6241_v40 = vld [vmem:[%s8773_s8 + $0x108] sm:$0xff]  }
 0x4f7   :  { %6040 = vmatpush3.bf16.msra.mxu1 %v6212_v34  ;;  %v6243_v34 = vld [vmem:[%s8773_s8 + $0x150] sm:$0xff]  }
 0x4f8   :  { %6041 = vmatprep.subr.bf16.mxu1 %v6288_v15  ;;  %5508 = vmatpush3.bf16.msra.mxu0 %v6223_v35  ;;  %v6245_v35 = vld [vmem:[%s8773_s8 + $0x110] sm:$0xff]  }
 0x4f9   :  { %5509 = vmatprep.subr.bf16.mxu0 %v6224_v39  ;;  %v6247_v39 = vld [vmem:[%s8773_s8 + $0x158] sm:$0xff]  }
 0x4fb   :  { %6042 = vmatpush3.bf16.msra.mxu1 %v6213_v10  ;;  %v6249_v10 = vld [vmem:[%s8773_s8 + $0x118] sm:$0xff]  }
 0x4fc   :  { %6043 = vmatprep.subr.bf16.mxu1 %v6288_v15  ;;  %5510 = vmatpush3.bf16.msra.mxu0 %v6225_v23  ;;  %v6251_v23 = vld [vmem:[%s8773_s8 + $0x160] sm:$0xff]  }
 0x4fd   :  { %5511 = vmatprep.subr.bf16.mxu0 %v6226_v33  ;;  %v3580_v33 = vsub.s32 3, %v8641_v6 }
 0x4ff   :  { %6044 = vmatpush3.bf16.msra.mxu1 %v6214_v7  ;;  %v6253_v7 = vld [vmem:[%s8773_s8 + $0x120] sm:$0xff]  }
 0x500   :  { %6045 = vmatprep.subr.bf16.mxu1 %v6288_v15  ;;  %5512 = vmatpush3.bf16.msra.mxu0 %v6227_v2  ;;  %v6255_v2 = vld [vmem:[%s8773_s8 + $0x168] sm:$0xff]  }
 0x501   :  { %5513 = vmatprep.subr.bf16.mxu0 %v6228_v58  ;;  %v3581_v58 = vrot.slane %v8648_v57, %v3580_v33 }
 0x503   :  { %6046 = vmatpush3.bf16.msra.mxu1 %v6215_v49  ;;  %v3584_v49 = vsub.s32 4, %v8641_v6 }
 0x504   :  { %6047 = vmatprep.subr.bf16.mxu1 %v6288_v15  ;;  %5514 = vmatpush3.bf16.msra.mxu0 %v6229_v28  ;;  %v3592_v28 = vsub.s32 6, %v8641_v6 }
 0x505   :  { %5515 = vmatprep.subr.bf16.mxu0 %v6230_v29  ;;  %v6259_v29 = vld [vmem:[%s8773_s8 + $0x170] sm:$0xff]  }
 0x507   :  { %6048 = vmatpush3.bf16.msra.mxu1 %v6216_v44  ;;  %v6257_v44 = vld [vmem:[%s8773_s8 + $0x128] sm:$0xff]  }
 0x508   :  { %6049 = vmatprep.subr.bf16.mxu1 %v6288_v15  ;;  %5516 = vmatpush3.bf16.msra.mxu0 %v6231_v24  ;;  %v6233_v15 = vld [vmem:[%s8773_s8 + $0x38] sm:$0xff]  }
 0x509   :  { %5517 = vmatprep.subr.bf16.mxu0 %v6232_v16  ;;  %v3585_v16 = vrot.slane %v8648_v57, %v3584_v49 }
 0x50b   :  { %6050 = vmatpush3.bf16.msra.mxu1 %v6217_v53  ;;  %v3588_v53 = vsub.s32 5, %v8641_v6 }
 0x50c   :  { %5518 = vmatpush3.bf16.msra.mxu0 %v6233_v15  ;;  %5525 = vmatprep.subr.bf16.mxu1 %v6234_v50  ;;  %v3593_v15 = vrot.slane %v8648_v57, %v3592_v28 }
 0x50d   :  { %5547 = vmatprep.subr.bf16.mxu0 %v6235_v62  ;;  %v3589_v50 = vrot.slane %v8648_v57, %v3588_v53  ;;  %v6261_v62 = vld [vmem:[%s8773_s8 + $0x130] sm:$0xff]  }
 0x50e   :  { %6052 = vmatmul.mubr.bf16.vlgmr.msra.gmra.mrb[140].mxu1 %v8414_v45  ;;  %v6254_v45 = vld [vmem:[%s8773_s8 + $0xe8] sm:$0xff]  }
 0x50f   :  { %5526 = vmatpush3.bf16.msra.mxu1 %v6236_v54  ;;  %v6263_v54 = vld [vmem:[%s8773_s8 + $0x178] sm:$0xff]  }
 0x510   :  { %5527 = vmatprep.subr.bf16.mxu1 %v6238_v61 }
 0x513   :  { %5528 = vmatpush3.bf16.msra.mxu1 %v6240_v14 }
 0x514   :  { %5529 = vmatprep.subr.bf16.mxu1 %v6242_v59 }
 0x517   :  { %5530 = vmatpush3.bf16.msra.mxu1 %v6244_v60 }
 0x518   :  { %5531 = vmatprep.subr.bf16.mxu1 %v6246_v4 }
 0x51b   :  { %5532 = vmatpush3.bf16.msra.mxu1 %v6248_v18 }
 0x51c   :  { %5533 = vmatprep.subr.bf16.mxu1 %v6250_v3 }
 0x51f   :  { %5534 = vmatpush3.bf16.msra.mxu1 %v6252_v52 }
 0x520   :  { %5535 = vmatprep.subr.bf16.mxu1 %v6254_v45 }
 0x523   :  { %5536 = vmatpush3.bf16.msra.mxu1 %v6256_v55 }
 0x524   :  { %5537 = vmatprep.subr.bf16.mxu1 %v6258_v32  ;;  %v6265_v32 = vld [vmem:[%s8773_s8 + $0x138] sm:$0xff]  }
 0x527   :  { %5538 = vmatpush3.bf16.msra.mxu1 %v6260_v8 }
 0x528   :  { %5539 = vmatprep.subr.bf16.mxu1 %v6262_v26 }
 0x52b   :  { %5540 = vmatpush3.bf16.msra.mxu1 %v6264_v27 }
 0x52c   :  { %5569 = vmatprep.subr.bf16.mxu1 %v6266_v17 }
 0x5a1   :  { %v4013_v36 = vpop.f32.mrb[132].mxu1  ;;  %v4054_v12 = vpop.f32.mrb[136].mxu0 }
 0x5a2   :  { %v4014_v25 = vadd.f32 %v4013_v36, %v3569_v42  ;;  %v4055_v51 = vadd.f32 %v4054_v12, %v3577_v21  ;;  %v4015_v56 = vpop.f32.mrb[133].mxu1  ;;  %v4056_v38 = vpop.f32.mrb[137].mxu0  ;;  %v6267_v36 = vld [vmem:[%s8773_s8 + $0x180] sm:$0xff]  }
 0x5a3   :  { %v4016_v46 = vadd.f32 %v4015_v56, %v3573_v9  ;;  %v4017_v43 = vpop.f32.mrb[134].mxu1  ;;  %v4058_v5 = vpop.f32.mrb[138].mxu0  ;;  %v4057_v24 = vadd.f32 %v4056_v38, %v3581_v58  ;;  %v6269_v56 = vld [vmem:[%s8773_s8 + $0x188] sm:$0xff]   ;;  %v6270_v38 = vld [vmem:[%s8773_s8 + $0x1d0] sm:$0xff]  }
 0x5a4   :  { %4895 = vst [vmem:[%s8775_s10] sm:$0xff] %v4014_v25  ;;  %vm4184_vm0 = vcmp.gt.f32.partialorder %v4055_v51, 0.0  ;;  %v4192_v30 = vmul.f32 0.01, %v4055_v51  ;;  %v4018_v20 = vpop.f32.mrb[135].mxu1  ;;  %v4059_v37 = vpop.f32.mrb[139].mxu0  ;;  %v6272_v43 = vld [vmem:[%s8773_s8 + $0x1d8] sm:$0xff]  }
 0x5a5   :  { %vm4183_vm7 = vcmp.gt.f32.partialorder %v4016_v46, 0.0  ;;  %v4191_v48 = vmul.f32 0.01, %v4016_v46  ;;  %v4193_v61 = vmul.f32 0.01, %v4057_v24  ;;  %vm4185_vm8 = vcmp.gt.f32.partialorder %v4057_v24, 0.0 }
 0x5a6   :  { %v4200_v11 = vsel %vm4184_vm0, %v4055_v51, %v4192_v30  ;;  %v6268_v51 = vld [vmem:[%s8773_s8 + $0x1c8] sm:$0xff]   ;;  %v6273_v5 = vld [vmem:[%s8773_s8 + $0x198] sm:$0xff]   ;;  %v6274_v30 = vld [vmem:[%s8773_s8 + $0x1e0] sm:$0xff]   ;;  %v3596_v20 = vsub.s32 7, %v8641_v6 }
 0x5a7   :  { %v4199_v41 = vsel %vm4183_vm7, %v4016_v46, %v4191_v48  ;;  %v4208_v31 = vpack.c.bf16 %v4200_v11, %v4200_v11  ;;  %v4201_v27 = vsel %vm4185_vm8, %v4057_v24, %v4193_v61  ;;  %v6271_v46 = vld [vmem:[%s8773_s8 + $0x190] sm:$0xff]   ;;  %v6275_v37 = vld [vmem:[%s8773_s8 + $0x1a0] sm:$0xff]   ;;  %v6276_v48 = vld [vmem:[%s8773_s8 + $0x1e8] sm:$0xff]  }
 0x5a8   :  { %v4207_v22 = vpack.c.bf16 %v4199_v41, %v4199_v41  ;;  %v4209_v12 = vpack.c.bf16 %v4201_v27, %v4201_v27  ;;  %v3597_v11 = vrot.slane %v8648_v57, %v3596_v20  ;;  %v6277_v41 = vld [vmem:[%s8773_s8 + $0x1a8] sm:$0xff]   ;;  %v6278_v6 = vld [vmem:[%s8773_s8 + $0x1f0] sm:$0xff]  }
 0x5a9   :  { %4766 = vmatprep.mubr.bf16.mxu0 %v4208_v31  ;;  %v6279_v57 = vld [vmem:[%s8773_s8 + $0x1b0] sm:$0xff]  }
 0x5aa   :  { %4767 = vmatmul.mubr.bf16.vlgmr.msra.gmra.mrb[144].mxu0 %v4207_v22  ;;  %v6280_v22 = vld [vmem:[%s8773_s8 + $0x1f8] sm:$0xff]  }
 0x5ab   :  { %5548 = vmatpush3.bf16.msra.mxu0 %v6237_v63  ;;  %v5137_v63 = vld [vmem:[%s8774_s7 + $0x8] ss:$0 sm:$0xff] }
 0x5ac   :  { %5549 = vmatprep.subr.bf16.mxu0 %v6239_v13 }
 0x5af   :  { %5550 = vmatpush3.bf16.msra.mxu0 %v6241_v40 }
 0x5b0   :  { %5551 = vmatprep.subr.bf16.mxu0 %v6243_v34 }
 0x5b3   :  { %5552 = vmatpush3.bf16.msra.mxu0 %v6245_v35 }
 0x5b4   :  { %5553 = vmatprep.subr.bf16.mxu0 %v6247_v39 }
 0x5b7   :  { %5554 = vmatpush3.bf16.msra.mxu0 %v6249_v10  ;;  %v6281_v10 = vld [vmem:[%s8773_s8 + $0x1b8] sm:$0xff]  }
 0x5b8   :  { %5555 = vmatprep.subr.bf16.mxu0 %v6251_v23 }
 0x5bb   :  { %5556 = vmatpush3.bf16.msra.mxu0 %v6253_v7 }
 0x5bc   :  { %5557 = vmatprep.subr.bf16.mxu0 %v6255_v2 }
 0x5bf   :  { %5558 = vmatpush3.bf16.msra.mxu0 %v6257_v44 }
 0x5c0   :  { %5559 = vmatprep.subr.bf16.mxu0 %v6259_v29 }
 0x5c1   :  { %v4095_v14 = vpop.f32.mrb[136].mxu1  ;;  %v4136_v59 = vpop.f32.mrb[140].mxu0 }
 0x5c2   :  { %v4096_v60 = vadd.f32 %v4095_v14, %v3585_v16  ;;  %v4137_v4 = vadd.f32 %v4136_v59, %v3593_v15  ;;  %v4097_v18 = vpop.f32.mrb[137].mxu1  ;;  %v4138_v3 = vpop.f32.mrb[141].mxu0  ;;  %v5210_v16 = vld [vmem:[%s8776_s9] ss:$0 sm:$0xff] }
 0x5c3   :  { %v4098_v52 = vadd.f32 %v4097_v18, %v3589_v50  ;;  %v4099_v45 = vpop.f32.mrb[138].mxu1  ;;  %v4140_v55 = vpop.f32.mrb[142].mxu0  ;;  %5560 = vmatpush3.bf16.msra.mxu0 %v6261_v62  ;;  %v4139_v31 = vadd.f32 %v4138_v3, %v3597_v11 }
 0x5c4   :  { %vm4186_vm9 = vcmp.gt.f32.partialorder %v4096_v60, 0.0  ;;  %v4194_v8 = vmul.f32 0.01, %v4096_v60  ;;  %vm4188_vm10 = vcmp.gt.f32.partialorder %v4137_v4, 0.0  ;;  %v4196_v26 = vmul.f32 0.01, %v4137_v4  ;;  %5561 = vmatprep.subr.bf16.mxu0 %v6263_v54 }
 0x5c5   :  { %vm4187_vm11 = vcmp.gt.f32.partialorder %v4098_v52, 0.0  ;;  %v4195_v17 = vmul.f32 0.01, %v4098_v52  ;;  %v4100_v0 = vpop.f32.mrb[139].mxu1  ;;  %v4141_v19 = vpop.f32.mrb[143].mxu0  ;;  %vm4189_vm12 = vcmp.gt.f32.partialorder %v4139_v31, 0.0 }
 0x5c6   :  { %v4202_v47 = vsel %vm4186_vm9, %v4096_v60, %v4194_v8  ;;  %v4204_v1 = vsel %vm4188_vm10, %v4137_v4, %v4196_v26  ;;  %v4197_v13 = vmul.f32 0.01, %v4139_v31 }
 0x5c7   :  { %v4203_v42 = vsel %vm4187_vm11, %v4098_v52, %v4195_v17  ;;  %5562 = vmatpush3.bf16.msra.mxu0 %v6265_v32  ;;  %v4210_v21 = vpack.c.bf16 %v4202_v47, %v4202_v47  ;;  %v4212_v9 = vpack.c.bf16 %v4204_v1, %v4204_v1 }
 0x5c8   :  { %v4211_v25 = vpack.c.bf16 %v4203_v42, %v4203_v42  ;;  %v4205_v7 = vsel %vm4189_vm12, %v4139_v31, %v4197_v13 }
 0x5c9   :  { %4806 = vmatprep.mubr.bf16.mxu1 %v4210_v21  ;;  %4846 = vmatprep.mubr.bf16.mxu0 %v4212_v9  ;;  %v4213_v49 = vpack.c.bf16 %v4205_v7, %v4205_v7 }
 0x5ca   :  { %4807 = vmatmul.mubr.bf16.vlgmr.msra.gmra.mrb[144].mxu1 %v4209_v12  ;;  %4847 = vmatmul.mubr.bf16.vlgmr.msra.gmra.mrb[148].mxu0 %v4211_v25 }
 0x5cb   :  { %5570 = vmatpush3.bf16.msra.mxu1 %v6267_v36 }
 0x5cc   :  { %5571 = vmatprep.subr.bf16.mxu1 %v6268_v51 }
 0x5cf   :  { %5572 = vmatpush3.bf16.msra.mxu1 %v6269_v56 }
 0x5d0   :  { %5573 = vmatprep.subr.bf16.mxu1 %v6270_v38 }
 0x5d3   :  { %5574 = vmatpush3.bf16.msra.mxu1 %v6271_v46 }
 0x5d4   :  { %5575 = vmatprep.subr.bf16.mxu1 %v6272_v43 }
 0x5d7   :  { %5576 = vmatpush3.bf16.msra.mxu1 %v6273_v5 }
 0x5d8   :  { %5577 = vmatprep.subr.bf16.mxu1 %v6274_v30 }
 0x5db   :  { %5578 = vmatpush3.bf16.msra.mxu1 %v6275_v37 }
 0x5dc   :  { %5579 = vmatprep.subr.bf16.mxu1 %v6276_v48 }
 0x5df   :  { %5580 = vmatpush3.bf16.msra.mxu1 %v6277_v41 }
 0x5e0   :  { %5581 = vmatprep.subr.bf16.mxu1 %v6278_v6 }
 0x5e1   :  { %v4177_v40 = vpop.f32.mrb[140].mxu1 }
 0x5e2   :  { %v4178_v34 = vadd.f32 %v5137_v63, %v4177_v40  ;;  %v6053_v35 = vpop.f32.mrb[141].mxu1 }
 0x5e3   :  { %v4180_v39 = vpop.f32.mrb[142].mxu1  ;;  %5582 = vmatpush3.bf16.msra.mxu1 %v6279_v57 }
 0x5e4   :  { %vm4190_vm13 = vcmp.gt.f32.partialorder %v4178_v34, 0.0  ;;  %v4198_v23 = vmul.f32 0.01, %v4178_v34  ;;  %v6054_v33 = vpop.f32.mrb[143].mxu1  ;;  %5583 = vmatprep.subr.bf16.mxu1 %v6280_v22 }
 0x5e6   :  { %v4206_v2 = vsel %vm4190_vm13, %v4178_v34, %v4198_v23 }
 0x5e7   :  { %5584 = vmatpush3.bf16.msra.mxu1 %v6281_v10  ;;  %v4214_v58 = vpack.c.bf16 %v4206_v2, %v4206_v2 }
 0x5e9   :  { %4886 = vmatprep.mubr.bf16.mxu1 %v4214_v58 }
 0x5ea   :  { %4887 = vmatmul.mubr.bf16.vlgmr.msra.gmra.mrb[148].mxu1 %v4213_v49 }
 0x67d   :  { %v5519_v28 = vpop.f32.mrb[144].mxu0 }
 0x67e   :  { %v5520_v44 = vpop.f32.mrb[145].mxu0 }
 0x67f   :  { %v5521_v53 = vadd.f32 %v5520_v44, %v5519_v28  ;;  %v5522_v29 = vpop.f32.mrb[146].mxu0 }
 0x680   :  { %v5523_v24 = vpop.f32.mrb[147].mxu0 }
 0x681   :  { %v4769_v61 = vadd.f32 %v5521_v53, %v5210_v16 }
 0x69d   :  { %v5541_v15 = vpop.f32.mrb[144].mxu1  ;;  %v5563_v50 = vpop.f32.mrb[148].mxu0 }
 0x69e   :  { %v5542_v62 = vpop.f32.mrb[145].mxu1  ;;  %v5564_v54 = vpop.f32.mrb[149].mxu0 }
 0x69f   :  { %v5543_v14 = vadd.f32 %v5542_v62, %v5541_v15  ;;  %v5565_v59 = vadd.f32 %v5564_v54, %v5563_v50  ;;  %v5544_v60 = vpop.f32.mrb[146].mxu1  ;;  %v5566_v4 = vpop.f32.mrb[150].mxu0 }
 0x6a0   :  { %v5545_v18 = vpop.f32.mrb[147].mxu1  ;;  %v5567_v3 = vpop.f32.mrb[151].mxu0 }
 0x6a1   :  { %v4809_v52 = vadd.f32 %v5543_v14, %v4769_v61 }
 0x6a3   :  { %v4849_v45 = vadd.f32 %v5565_v59, %v4809_v52 }
 0x6bd   :  { %v5585_v55 = vpop.f32.mrb[148].mxu1 }
 0x6be   :  { %v5586_v32 = vpop.f32.mrb[149].mxu1 }
 0x6bf   :  { %v5587_v8 = vadd.f32 %v5586_v32, %v5585_v55  ;;  %v5588_v26 = vpop.f32.mrb[150].mxu1 }
 0x6c0   :  { %v5589_v27 = vpop.f32.mrb[151].mxu1 }
 0x6c1   :  { %v4889_v17 = vadd.f32 %v5587_v8, %v4849_v45 }
 0x6c3   :  { %6282 = vtanh.f32 %v4889_v17 }
 0x6cd   :  { %v6283_v0 = vpop.eup %6282 }
 0x6ce   :  { %4896 = vst [vmem:[%s8775_s10 + $0x8] sm:$0xff] %v6283_v0 }

</bundles_post_ra>
